<compile_context>
chip_gen: v6e
topology: v6e:2x2x1
jax: 0.10.0
libtpu: 0.0.40
codegen_flags: <defaults>
</compile_context>

<pallas_src>
import jax
import jax.numpy as jnp
from jax.experimental import pallas as pl
from jax.experimental.pallas import tpu as pltpu

IN_FEATURES = 28 * 28 * 3          # 2352 (multiple of 8, full-dim block => no K pad needed)
HIDDEN = 512
OUT = 1
OUT_PAD = 128                      # lane-dense output block; wrapper keeps column 0
MAX_TB = 512                       # batch tile cap (512x2352 f32 x-tile = ~4.6 MiB)


def _round_up(n, m):
    return (n + m - 1) // m * m


def mlp_kernel(x_ref, w1_ref, b1_ref, w2_ref, b2_ref, w3_ref, b3_ref, o_ref):
    # x_ref: [TB, 2352] f32; weights bf16 (resident); biases f32; o_ref: [TB, OUT_PAD] f32
    x = x_ref[...].astype(jnp.bfloat16)            # fused cast (no upstream pre-pass)

    # Layer 1: Linear(2352 -> 512) + ReLU   (bf16 MXU, f32 accumulate, f32 epilogue)
    h1 = jnp.dot(x, w1_ref[...], preferred_element_type=jnp.float32)
    h1 = jnp.maximum(h1 + b1_ref[...], 0.0)

    # Layer 2: Linear(512 -> 512) + ReLU
    h2 = jnp.dot(h1.astype(jnp.bfloat16), w2_ref[...],
                 preferred_element_type=jnp.float32)
    h2 = jnp.maximum(h2 + b2_ref[...], 0.0)

    # Layer 3: Linear(512 -> OUT_PAD)  (only column 0 is the real logit)
    logits = jnp.dot(h2.astype(jnp.bfloat16), w3_ref[...],
                     preferred_element_type=jnp.float32)
    o_ref[...] = (logits + b3_ref[...]).astype(o_ref.dtype)


def pack_params(params):
    """One-time conversion of f32 math-shape params to the kernel layout.

    Call this once (e.g. after weight load / init), NOT inside the per-call
    forward path: bf16 weight casts and the lane-pad of the last layer are
    cached here instead of being re-materialized on every inference call.
    """
    w1, b1, w2, b2, w3, b3 = params
    return (
        w1.astype(jnp.bfloat16),                                        # (2352, 512)
        b1.reshape(1, HIDDEN).astype(jnp.float32),                      # (1, 512)
        w2.astype(jnp.bfloat16),                                        # (512, 512)
        b2.reshape(1, HIDDEN).astype(jnp.float32),                      # (1, 512)
        jnp.pad(w3, ((0, 0), (0, OUT_PAD - OUT))).astype(jnp.bfloat16), # (512, 128)
        jnp.pad(b3.reshape(1, OUT),
                ((0, 0), (0, OUT_PAD - OUT))).astype(jnp.float32),      # (1, 128)
    )


@jax.jit
def neural_network_forward(x, packed_params):
    """x: [B, 3, 28, 28] float32 (NCHW). Returns logits.squeeze() like PyTorch."""
    w1p, b1p, w2p, b2p, w3p, b3p = packed_params
    B = x.shape[0]
    x_flat = x.reshape(B, IN_FEATURES)             # nn.Flatten (row-major == torch)

    # Batch tile: as large as reasonable (amortizes ~0.35 us/grid-step overhead,
    # improves MXU M-utilization); padded rows are sliced off before return.
    TB = min(MAX_TB, _round_up(B, 8))
    B_pad = _round_up(B, TB)
    if B_pad != B:
        x_flat = jnp.pad(x_flat, ((0, B_pad - B), (0, 0)))

    grid = (B_pad // TB,)
    resident = lambda shape: pl.BlockSpec(shape, lambda i: (0, 0))

    flops = 2 * B_pad * (IN_FEATURES * HIDDEN + HIDDEN * HIDDEN + HIDDEN * OUT_PAD)
    bytes_accessed = (
        x_flat.size * 4                                   # f32 activations (read once)
        + (w1p.size + w2p.size + w3p.size) * 2            # bf16 weights
        + (b1p.size + b2p.size + b3p.size) * 4            # f32 biases
        + B_pad * OUT_PAD * 4                             # f32 output
    )

    out = pl.pallas_call(
        mlp_kernel,
        out_shape=jax.ShapeDtypeStruct((B_pad, OUT_PAD), jnp.float32),
        grid=grid,
        in_specs=[
            # x: f32, tiled over batch, full (unpadded) K — last dim equals the
            # full array dim so the (8,128) rule is satisfied without padding.
            pl.BlockSpec((TB, IN_FEATURES), lambda i: (i, 0)),
            resident((IN_FEATURES, HIDDEN)),               # w1 resident in VMEM
            resident((1, HIDDEN)),                         # b1
            resident((HIDDEN, HIDDEN)),                    # w2
            resident((1, HIDDEN)),                         # b2
            resident((HIDDEN, OUT_PAD)),                   # w3 (lane-padded)
            resident((1, OUT_PAD)),                        # b3 (lane-padded)
        ],
        out_specs=pl.BlockSpec((TB, OUT_PAD), lambda i: (i, 0)),
        compiler_params=pltpu.CompilerParams(
            dimension_semantics=("parallel",),             # megacore sharding on v7x
            vmem_limit_bytes=48 << 20,                     # < 64 MiB (v7x), << 128 MiB (v5e/v6e)
        ),
        cost_estimate=pl.CostEstimate(
            flops=flops, transcendentals=0, bytes_accessed=bytes_accessed),
    )(x_flat, w1p, b1p, w2p, b2p, w3p, b3p)

    # keep only real rows / the real logit column; PyTorch: logits.squeeze()
    return jnp.squeeze(out[:B, 0])


def init_params(key):
    """Deterministic init matching torch.nn.Linear default (U(-1/sqrt(fan_in), +))."""
    ks = jax.random.split(key, 6)

    def linear(kw, kb, fan_in, fan_out):
        bound = 1.0 / jnp.sqrt(fan_in)
        w = jax.random.uniform(kw, (fan_in, fan_out), jnp.float32, -bound, bound)
        b = jax.random.uniform(kb, (1, fan_out), jnp.float32, -bound, bound)
        return w, b

    w1, b1 = linear(ks[0], ks[1], IN_FEATURES, HIDDEN)
    w2, b2 = linear(ks[2], ks[3], HIDDEN, HIDDEN)
    w3, b3 = linear(ks[4], ks[5], HIDDEN, OUT)
    return (w1, b1, w2, b2, w3, b3)


if __name__ == "__main__":
    key = jax.random.PRNGKey(0)
    kx, kp = jax.random.split(key)
    params = init_params(kp)
    packed = pack_params(params)              # one-time packing (cached across calls)

    # Small batch, full 3x28x28 image (as implied by Linear(28*28*3, ...)).
    x = jax.random.normal(kx, (2, 3, 28, 28), dtype=jnp.float32)

    logits = neural_network_forward(x, packed)
    logits = jax.block_until_ready(logits)

    # Reference with the same bf16 weight/activation cast and f32 accumulation.
    w1, b1, w2, b2, w3, b3 = params
    xf = x.reshape(x.shape[0], -1)
    h = jnp.dot(xf.astype(jnp.bfloat16), w1.astype(jnp.bfloat16),
                preferred_element_type=jnp.float32)
    h = jnp.maximum(h + b1, 0.0)
    h = jnp.dot(h.astype(jnp.bfloat16), w2.astype(jnp.bfloat16),
                preferred_element_type=jnp.float32)
    h = jnp.maximum(h + b2, 0.0)
    ref = jnp.dot(h.astype(jnp.bfloat16), w3.astype(jnp.bfloat16),
                  preferred_element_type=jnp.float32) + b3
    ref = jnp.squeeze(ref)

    assert logits.shape == ref.shape == (2,), (logits.shape, ref.shape)
    assert jnp.allclose(logits, ref, atol=2e-2, rtol=2e-2), (logits, ref)

    print("KERNEL_OK")
</pallas_src>

<mosaic_0001>
module attributes {stable_mosaic.version = 11 : i64} {
  func.func @mlp_kernel(%arg0: i32, %arg1: memref<8x2352xf32, #tpu.memory_space<vmem>>, %arg2: memref<2352x512xbf16, #tpu.memory_space<vmem>>, %arg3: memref<1x512xf32, #tpu.memory_space<vmem>>, %arg4: memref<512x512xbf16, #tpu.memory_space<vmem>>, %arg5: memref<1x512xf32, #tpu.memory_space<vmem>>, %arg6: memref<512x128xbf16, #tpu.memory_space<vmem>>, %arg7: memref<1x128xf32, #tpu.memory_space<vmem>>, %arg8: memref<8x128xf32, #tpu.memory_space<vmem>>) attributes {dimension_semantics = [#tpu.dimension_semantics<parallel>], iteration_bounds = array<i64: 1>, scalar_prefetch = 0 : i64, scratch_operands = 0 : i64, tpu.core_type = #tpu.core_type<tc>, window_params = [{transform_indices = @transform_0, window_bounds = array<i64: 8, 2352>}, {pipeline_mode = #tpu.pipeline_mode<synchronous>, transform_indices = @transform_1, window_bounds = array<i64: 2352, 512>}, {pipeline_mode = #tpu.pipeline_mode<synchronous>, transform_indices = @transform_2, window_bounds = array<i64: 1, 512>}, {pipeline_mode = #tpu.pipeline_mode<synchronous>, transform_indices = @transform_3, window_bounds = array<i64: 512, 512>}, {pipeline_mode = #tpu.pipeline_mode<synchronous>, transform_indices = @transform_4, window_bounds = array<i64: 1, 512>}, {pipeline_mode = #tpu.pipeline_mode<synchronous>, transform_indices = @transform_5, window_bounds = array<i64: 512, 128>}, {pipeline_mode = #tpu.pipeline_mode<synchronous>, transform_indices = @transform_6, window_bounds = array<i64: 1, 128>}, {transform_indices = @transform_7, window_bounds = array<i64: 8, 128>}]} {
    %c0 = arith.constant 0 : index
    %c0_0 = arith.constant 0 : index
    %0 = vector.load %arg1[%c0, %c0_0] : memref<8x2352xf32, #tpu.memory_space<vmem>>, vector<8x2352xf32>
    %1 = arith.truncf %0 : vector<8x2352xf32> to vector<8x2352xbf16>
    %c0_1 = arith.constant 0 : index
    %c0_2 = arith.constant 0 : index
    %2 = vector.load %arg2[%c0_1, %c0_2] : memref<2352x512xbf16, #tpu.memory_space<vmem>>, vector<2352x512xbf16>
    %cst = arith.constant dense<0.000000e+00> : vector<8x512xf32>
    %3 = tpu.matmul %1, %2, %cst {dimension_numbers = #tpu.dot_dimension_numbers<[1], [0], [0], [1], [0, 0, 1, 1], [], []>} : vector<8x2352xbf16>, vector<2352x512xbf16>, vector<8x512xf32> -> vector<8x512xf32>
    %c0_3 = arith.constant 0 : index
    %c0_4 = arith.constant 0 : index
    %4 = vector.load %arg3[%c0_3, %c0_4] : memref<1x512xf32, #tpu.memory_space<vmem>>, vector<1x512xf32>
    %5 = vector.broadcast %4 : vector<1x512xf32> to vector<8x512xf32>
    %6 = arith.addf %3, %5 : vector<8x512xf32>
    %cst_5 = arith.constant 0.000000e+00 : f32
    %7 = vector.broadcast %cst_5 : f32 to vector<8x512xf32>
    %8 = arith.maximumf %6, %7 : vector<8x512xf32>
    %9 = arith.truncf %8 : vector<8x512xf32> to vector<8x512xbf16>
    %c0_6 = arith.constant 0 : index
    %c0_7 = arith.constant 0 : index
    %10 = vector.load %arg4[%c0_6, %c0_7] : memref<512x512xbf16, #tpu.memory_space<vmem>>, vector<512x512xbf16>
    %cst_8 = arith.constant dense<0.000000e+00> : vector<8x512xf32>
    %11 = tpu.matmul %9, %10, %cst_8 {dimension_numbers = #tpu.dot_dimension_numbers<[1], [0], [0], [1], [0, 0, 1, 1], [], []>} : vector<8x512xbf16>, vector<512x512xbf16>, vector<8x512xf32> -> vector<8x512xf32>
    %c0_9 = arith.constant 0 : index
    %c0_10 = arith.constant 0 : index
    %12 = vector.load %arg5[%c0_9, %c0_10] : memref<1x512xf32, #tpu.memory_space<vmem>>, vector<1x512xf32>
    %13 = vector.broadcast %12 : vector<1x512xf32> to vector<8x512xf32>
    %14 = arith.addf %11, %13 : vector<8x512xf32>
    %cst_11 = arith.constant 0.000000e+00 : f32
    %15 = vector.broadcast %cst_11 : f32 to vector<8x512xf32>
    %16 = arith.maximumf %14, %15 : vector<8x512xf32>
    %17 = arith.truncf %16 : vector<8x512xf32> to vector<8x512xbf16>
    %c0_12 = arith.constant 0 : index
    %c0_13 = arith.constant 0 : index
    %18 = vector.load %arg6[%c0_12, %c0_13] : memref<512x128xbf16, #tpu.memory_space<vmem>>, vector<512x128xbf16>
    %cst_14 = arith.constant dense<0.000000e+00> : vector<8x128xf32>
    %19 = tpu.matmul %17, %18, %cst_14 {dimension_numbers = #tpu.dot_dimension_numbers<[1], [0], [0], [1], [0, 0, 1, 1], [], []>} : vector<8x512xbf16>, vector<512x128xbf16>, vector<8x128xf32> -> vector<8x128xf32>
    %c0_15 = arith.constant 0 : index
    %c0_16 = arith.constant 0 : index
    %20 = vector.load %arg7[%c0_15, %c0_16] : memref<1x128xf32, #tpu.memory_space<vmem>>, vector<1x128xf32>
    %21 = vector.broadcast %20 : vector<1x128xf32> to vector<8x128xf32>
    %22 = arith.addf %19, %21 : vector<8x128xf32>
    %c0_17 = arith.constant 0 : index
    %c0_18 = arith.constant 0 : index
    %23 = vector.load %arg8[%c0_17, %c0_18] : memref<8x128xf32, #tpu.memory_space<vmem>>, vector<8x128xf32>
    tpu.vector_store %arg8[%c0_17, %c0_18], %22 {strides = array<i32>} : memref<8x128xf32, #tpu.memory_space<vmem>>, vector<8x128xf32>,
    return
  }
  func.func @transform_0(%arg0: i32) -> (i32, i32) {
    %c0_i32 = arith.constant 0 : i32
    %c0_i32_0 = arith.constant 0 : i32
    return %arg0, %c0_i32 : i32, i32
  }
  func.func @transform_1(%arg0: i32) -> (i32, i32) {
    %c0_i32 = arith.constant 0 : i32
    %c0_i32_0 = arith.constant 0 : i32
    %c0_i32_1 = arith.constant 0 : i32
    return %c0_i32, %c0_i32_0 : i32, i32
  }
  func.func @transform_2(%arg0: i32) -> (i32, i32) {
    %c0_i32 = arith.constant 0 : i32
    %c0_i32_0 = arith.constant 0 : i32
    %c0_i32_1 = arith.constant 0 : i32
    return %c0_i32, %c0_i32_0 : i32, i32
  }
  func.func @transform_3(%arg0: i32) -> (i32, i32) {
    %c0_i32 = arith.constant 0 : i32
    %c0_i32_0 = arith.constant 0 : i32
    %c0_i32_1 = arith.constant 0 : i32
    return %c0_i32, %c0_i32_0 : i32, i32
  }
  func.func @transform_4(%arg0: i32) -> (i32, i32) {
    %c0_i32 = arith.constant 0 : i32
    %c0_i32_0 = arith.constant 0 : i32
    %c0_i32_1 = arith.constant 0 : i32
    return %c0_i32, %c0_i32_0 : i32, i32
  }
  func.func @transform_5(%arg0: i32) -> (i32, i32) {
    %c0_i32 = arith.constant 0 : i32
    %c0_i32_0 = arith.constant 0 : i32
    %c0_i32_1 = arith.constant 0 : i32
    return %c0_i32, %c0_i32_0 : i32, i32
  }
  func.func @transform_6(%arg0: i32) -> (i32, i32) {
    %c0_i32 = arith.constant 0 : i32
    %c0_i32_0 = arith.constant 0 : i32
    %c0_i32_1 = arith.constant 0 : i32
    return %c0_i32, %c0_i32_0 : i32, i32
  }
  func.func @transform_7(%arg0: i32) -> (i32, i32) {
    %c0_i32 = arith.constant 0 : i32
    %c0_i32_0 = arith.constant 0 : i32
    return %arg0, %c0_i32 : i32, i32
  }
}

</mosaic_0001>

<bundles_post_ra>
// kernel: neural_network_forward.1
= control target key start
LH: loop header
LB: loop body
LE: loop exit
PB: predicated region body
PF: predicated region fallthrough
CT: control target
= control target key end

     0   :  { %12 = vsyncpa [#allocation3], 0  ;;  %s8175_s0 = inlined_call_operand.vmem [shape: f32[8,2352], index: 0, kind: input, shape index: {}]   ;;  %s8176_s1 = inlined_call_operand.hbm [shape: bf16[2352,512], index: 1, kind: input, shape index: {}]   ;;  %s8177_s2 = inlined_call_operand.hbm [shape: f32[1,512], index: 2, kind: input, shape index: {}]   ;;  %s8178_s3 = inlined_call_operand.hbm [shape: bf16[512,512], index: 3, kind: input, shape index: {}]   ;;  %s8179_s4 = inlined_call_operand.hbm [shape: f32[1,512], index: 4, kind: input, shape index: {}]   ;;  %s8180_s5 = inlined_call_operand.hbm [shape: bf16[512,128], index: 5, kind: input, shape index: {}]   ;;  %s8181_s6 = inlined_call_operand.hbm [shape: f32[1,128], index: 6, kind: input, shape index: {}]   ;;  %s8182_s7 = inlined_call_operand.vmem [shape: f32[8,128], index: 7, kind: output, shape index: {}]  }
   0x1   :  { %13 = vsyncpa [#allocation5], 0 }
   0x2   :  { %14 = vsyncpa [#allocation8], 0 }
   0x3   :  { %15 = vsyncpa [#allocation11], 0  ;;  %s7878_s24 = smov [#allocation4]   ;;  %s7879_s26 = smov [#allocation7]  }
   0x4   :  { %s36_s25 = sshll.u32 %s7878_s24, 4  ;;  %s58_s27 = sshll.u32 %s7879_s26, 4  ;;  %s37_s25 = int_to_ptr.vmem [resolvable:$true] %s36_s25  ;;  %s59_s27 = int_to_ptr.vmem [resolvable:$true] %s58_s27 }
   0x5   :  { %s7758_s28 = scalar_lea.vmem %s37_s25, 64  ;;  %p7763_p1 = scmp.lt.s32.totalorder %s37_s25, %s37_s25 }
   0x6   :  { %p7759_p0 = scmp.ne.s32.totalorder %s37_s25, %s7758_s28  ;;  %p7764_p2 = scmp.lt.s32.totalorder %s7758_s28, %s7758_s28 }
   0x8   :  { %p7765_p3 = por %p7764_p2, %p7763_p1 }
   0xa   :  { %p7766_p4 = pnand %p7765_p3, %p7759_p0 }
   0xc   :  { %7769 = shalt.err (!%p7766_p4)
}
   0xd   :  { %39 = dma.hbm_to_vmem [thread:$0]  %s8177_s2, 64, %s37_s25, [#allocation5]  }
   0xe   :  { %s7778_s8 = scalar_lea.vmem %s59_s27, 64  ;;  %p7783_p6 = scmp.lt.s32.totalorder %s59_s27, %s59_s27 }
   0xf   :  { %p7779_p5 = scmp.ne.s32.totalorder %s59_s27, %s7778_s8  ;;  %p7784_p7 = scmp.lt.s32.totalorder %s7778_s8, %s7778_s8 }
  0x11   :  { %p7785_p8 = por %p7784_p7, %p7783_p6 }
  0x13   :  { %p7786_p9 = pnand %p7785_p8, %p7779_p5 }
  0x15   :  { %7789 = shalt.err (!%p7786_p9)
}
  0x16   :  { %61 = dma.hbm_to_vmem [thread:$0]  %s8179_s4, 64, %s59_s27, [#allocation8]  }
  0x17   :  { %s7880_s11 = smov [#allocation2]  }
  0x18   :  { %s23_s12 = sshll.u32 %s7880_s11, 4  ;;  %s24_s12 = int_to_ptr.vmem [resolvable:$true] %s23_s12 }
  0x19   :  { %s7798_s13 = scalar_lea.vmem %s24_s12, 75264  ;;  %p7803_p11 = scmp.lt.s32.totalorder %s24_s12, %s24_s12 }
  0x1a   :  { %p7799_p10 = scmp.ne.s32.totalorder %s24_s12, %s7798_s13  ;;  %p7804_p12 = scmp.lt.s32.totalorder %s7798_s13, %s7798_s13 }
  0x1c   :  { %p7805_p13 = por %p7804_p12, %p7803_p11 }
  0x1e   :  { %p7806_p0 = pnand %p7805_p13, %p7799_p10 }
  0x20   :  { %7809 = shalt.err (!%p7806_p0)
}
  0x21   :  { %s7881_s2 = smov 256   ;;  %s7882_s14 = smov 16  }
  0x22   :  { %29 = dma.hbm_to_vmem [thread:$0]  %s8176_s1, 75264, %s24_s12, [#allocation3], %s7881_s2, %s7881_s2, %s7882_s14  }
  0x23   :  { %s7883_s17 = smov [#allocation6]   ;;  %s7884_s4 = smov [#allocation9]  }
  0x24   :  { %s45_s18 = sshll.u32 %s7883_s17, 4  ;;  %s67_s19 = sshll.u32 %s7884_s4, 4  ;;  %s46_s18 = int_to_ptr.vmem [resolvable:$true] %s45_s18  ;;  %s68_s19 = int_to_ptr.vmem [resolvable:$true] %s67_s19 }
  0x25   :  { %s7818_s20 = scalar_lea.vmem %s46_s18, 16384  ;;  %p7823_p2 = scmp.lt.s32.totalorder %s46_s18, %s46_s18 }
  0x26   :  { %p7819_p1 = scmp.ne.s32.totalorder %s46_s18, %s7818_s20  ;;  %p7824_p3 = scmp.lt.s32.totalorder %s7818_s20, %s7818_s20 }
  0x28   :  { %p7825_p4 = por %p7824_p3, %p7823_p2 }
  0x2a   :  { %p7826_p5 = pnand %p7825_p4, %p7819_p1 }
  0x2c   :  { %7829 = shalt.err (!%p7826_p5)
}
  0x2d   :  { %51 = dma.hbm_to_vmem [thread:$0]  %s8178_s3, 16384, %s46_s18, [#allocation5], %s7881_s2, %s7881_s2, %s7882_s14  }
  0x2e   :  { %s7838_s23 = scalar_lea.vmem %s68_s19, 4096  ;;  %p7843_p7 = scmp.lt.s32.totalorder %s68_s19, %s68_s19 }
  0x2f   :  { %p7839_p6 = scmp.ne.s32.totalorder %s68_s19, %s7838_s23  ;;  %p7844_p8 = scmp.lt.s32.totalorder %s7838_s23, %s7838_s23 }
  0x31   :  { %p7845_p9 = por %p7844_p8, %p7843_p7 }
  0x33   :  { %p7846_p10 = pnand %p7845_p9, %p7839_p6 }
  0x35   :  { %7849 = shalt.err (!%p7846_p10)
}
  0x36   :  { %s7885_s1 = smov 64   ;;  %s7886_s24 = smov 4  }
  0x37   :  { %73 = dma.hbm_to_vmem [thread:$0]  %s8180_s5, 4096, %s68_s19, [#allocation8], %s7885_s1, %s7885_s1, %s7886_s24  }
  0x38   :  { %s7887_s27 = smov [#allocation10]  }
  0x39   :  { %s80_s28 = sshll.u32 %s7887_s27, 4  ;;  %s81_s28 = int_to_ptr.vmem [resolvable:$true] %s80_s28 }
  0x3a   :  { %s7858_s29 = scalar_lea.vmem %s81_s28, 16  ;;  %s7862_s3 = scalar_lea.vmem %s81_s28, 32 }
  0x3b   :  { %p7859_p11 = scmp.ne.s32.totalorder %s81_s28, %s7858_s29  ;;  %p7863_p12 = scmp.lt.s32.totalorder %s81_s28, %s81_s28 }
  0x3c   :  { %p7864_p13 = scmp.lt.s32.totalorder %s7862_s3, %s7858_s29 }
  0x3e   :  { %p7865_p0 = por %p7864_p13, %p7863_p12 }
  0x40   :  { %p7866_p1 = pnand %p7865_p0, %p7859_p11 }
  0x42   :  { %7869 = shalt.err (!%p7866_p1)
}
  0x43   :  { %83 = dma.hbm_to_vmem [thread:$0]  %s8181_s6, 16, %s81_s28, [#allocation11]  }
  0x44   :  { %7870 = dma.done.wait [#allocation3], 75264  }
  0x45   :  { %7871 = vsyncadd [#allocation3], 4294892032 }
  0x46   :  { %7872 = dma.done.wait [#allocation5], 16448  }
  0x47   :  { %7873 = vsyncadd [#allocation5], 4294950848 }
  0x48   :  { %7874 = dma.done.wait [#allocation8], 4160  }
  0x49   :  { %7875 = vsyncadd [#allocation8], 4294963136 }
  0x4a   :  { %7876 = dma.done.wait [#allocation11], 16  }
  0x4b   :  { %7877 = vsyncadd [#allocation11], 4294967280  ;;  %v6643_v0 = vld [vmem:[#allocation2 + $0xe4] ss:$16 sps:$4 sm:$0xff]   ;;  %v6647_v2 = vld [vmem:[#allocation2 + $0xe0] ss:$16 sps:$4 sm:$0xff]  }
  0x4c   :  { %v6645_v1 = vld [vmem:[#allocation2 + $0x2e4] ss:$16 sps:$4 sm:$0xff]   ;;  %3695 = vmatprep.subr.bf16.mxu0 %v6643_v0  ;;  %v6648_v3 = vld [vmem:[#allocation2 + $0x2e0] ss:$16 sps:$4 sm:$0xff]   ;;  %v104_v46 = vld [vmem:[%s8175_s0 + $0x8] sm:$0xff]  ;;  %vm3691_vm0 = vcmask 392192  }
  0x4d   :  { %3736 = vmatprep.subr.bf16.mxu1 %v6645_v1  ;;  %v6649_v4 = vld [vmem:[#allocation2 + $0xc4] ss:$16 sps:$4 sm:$0xff]   ;;  %3696 = vmatpush1.bf16.msra.mxu0 %v6647_v2  ;;  %v6653_v6 = vld [vmem:[#allocation2 + $0xc0] ss:$16 sps:$4 sm:$0xff]   ;;  %v7950_v49 = vpack.c.bf16 %v104_v46, %v104_v46  ;;  %v106_v50 = vld [vmem:[%s8175_s0 + $0x18] sm:$0xff] }
  0x4e   :  { %3737 = vmatpush1.bf16.msra.mxu1 %v6648_v3  ;;  %v6651_v5 = vld [vmem:[#allocation2 + $0x2c4] ss:$16 sps:$4 sm:$0xff]   ;;  %3697 = vmatprep.subr.bf16.mxu0 %v6649_v4  ;;  %v6654_v7 = vld [vmem:[#allocation2 + $0x2c0] ss:$16 sps:$4 sm:$0xff]   ;;  %v7955_v52 = vpack.c.bf16 %v106_v50, %v106_v50 }
  0x4f   :  { %3738 = vmatprep.subr.bf16.mxu1 %v6651_v5  ;;  %v6655_v8 = vld [vmem:[#allocation2 + $0xa4] ss:$16 sps:$4 sm:$0xff]   ;;  %v6659_v10 = vld [vmem:[#allocation2 + $0xa0] ss:$16 sps:$4 sm:$0xff]   ;;  %3727 = vmatprep.mubr.bf16.mxu0 %v7950_v49 }
  0x50   :  { %v6657_v9 = vld [vmem:[#allocation2 + $0x2a4] ss:$16 sps:$4 sm:$0xff]   ;;  %v6660_v11 = vld [vmem:[#allocation2 + $0x2a0] ss:$16 sps:$4 sm:$0xff]   ;;  %3768 = vmatprep.mubr.bf16.mxu1 %v7955_v52 }
  0x51   :  { %3698 = vmatpush1.bf16.msra.mxu0 %v6653_v6  ;;  %v6661_v12 = vld [vmem:[#allocation2 + $0x84] ss:$16 sps:$4 sm:$0xff]   ;;  %v6665_v14 = vld [vmem:[#allocation2 + $0x80] ss:$16 sps:$4 sm:$0xff]  }
  0x52   :  { %3739 = vmatpush1.bf16.msra.mxu1 %v6654_v7  ;;  %3699 = vmatprep.subr.bf16.mxu0 %v6655_v8  ;;  %v6663_v13 = vld [vmem:[#allocation2 + $0x284] ss:$16 sps:$4 sm:$0xff]   ;;  %v6666_v15 = vld [vmem:[#allocation2 + $0x280] ss:$16 sps:$4 sm:$0xff]  }
  0x53   :  { %3740 = vmatprep.subr.bf16.mxu1 %v6657_v9  ;;  %v6667_v16 = vld [vmem:[#allocation2 + $0x64] ss:$16 sps:$4 sm:$0xff]   ;;  %v6671_v18 = vld [vmem:[#allocation2 + $0x60] ss:$16 sps:$4 sm:$0xff]  }
  0x54   :  { %v6669_v17 = vld [vmem:[#allocation2 + $0x264] ss:$16 sps:$4 sm:$0xff]   ;;  %v6672_v19 = vld [vmem:[#allocation2 + $0x260] ss:$16 sps:$4 sm:$0xff]  }
  0x55   :  { %3700 = vmatpush1.bf16.msra.mxu0 %v6659_v10  ;;  %v6673_v20 = vld [vmem:[#allocation2 + $0x44] ss:$16 sps:$4 sm:$0xff]   ;;  %v6677_v22 = vld [vmem:[#allocation2 + $0x40] ss:$16 sps:$4 sm:$0xff]  }
  0x56   :  { %3741 = vmatpush1.bf16.msra.mxu1 %v6660_v11  ;;  %3701 = vmatprep.subr.bf16.mxu0 %v6661_v12  ;;  %v6675_v21 = vld [vmem:[#allocation2 + $0x244] ss:$16 sps:$4 sm:$0xff]   ;;  %v6678_v23 = vld [vmem:[#allocation2 + $0x240] ss:$16 sps:$4 sm:$0xff]  }
  0x57   :  { %3742 = vmatprep.subr.bf16.mxu1 %v6663_v13  ;;  %v6679_v24 = vld [vmem:[#allocation2 + $0x24] ss:$16 sps:$4 sm:$0xff]   ;;  %v6683_v26 = vld [vmem:[#allocation2 + $0x20] ss:$16 sps:$4 sm:$0xff]  }
  0x58   :  { %v6681_v25 = vld [vmem:[#allocation2 + $0x224] ss:$16 sps:$4 sm:$0xff]   ;;  %v6684_v27 = vld [vmem:[#allocation2 + $0x220] ss:$16 sps:$4 sm:$0xff]  }
  0x59   :  { %3702 = vmatpush1.bf16.msra.mxu0 %v6665_v14  ;;  %v6685_v28 = vld [vmem:[#allocation2 + $0x4] ss:$16 sps:$4 sm:$0xff]   ;;  %v6689_v30 = vld [vmem:[#allocation2] ss:$16 sps:$4 sm:$0xff]  }
  0x5a   :  { %3743 = vmatpush1.bf16.msra.mxu1 %v6666_v15  ;;  %3703 = vmatprep.subr.bf16.mxu0 %v6667_v16  ;;  %v6687_v29 = vld [vmem:[#allocation2 + $0x204] ss:$16 sps:$4 sm:$0xff]   ;;  %v6690_v31 = vld [vmem:[#allocation2 + $0x200] ss:$16 sps:$4 sm:$0xff]  }
  0x5b   :  { %3744 = vmatprep.subr.bf16.mxu1 %v6669_v17  ;;  %v6691_v32 = vld [vmem:[#allocation2 + $0x1e4] ss:$16 sps:$4 sm:$0xff]   ;;  %v6695_v34 = vld [vmem:[#allocation2 + $0x1e0] ss:$16 sps:$4 sm:$0xff]  }
  0x5c   :  { %v6693_v33 = vld [vmem:[#allocation2 + $0x3e4] ss:$16 sps:$4 sm:$0xff]   ;;  %v6696_v35 = vld [vmem:[#allocation2 + $0x3e0] ss:$16 sps:$4 sm:$0xff]  }
  0x5d   :  { %3704 = vmatpush1.bf16.msra.mxu0 %v6671_v18  ;;  %v6697_v36 = vld [vmem:[#allocation2 + $0x1c4] ss:$16 sps:$4 sm:$0xff]   ;;  %v6701_v38 = vld [vmem:[#allocation2 + $0x1c0] ss:$16 sps:$4 sm:$0xff]  }
  0x5e   :  { %3745 = vmatpush1.bf16.msra.mxu1 %v6672_v19  ;;  %3705 = vmatprep.subr.bf16.mxu0 %v6673_v20  ;;  %v6699_v37 = vld [vmem:[#allocation2 + $0x3c4] ss:$16 sps:$4 sm:$0xff]   ;;  %v6702_v39 = vld [vmem:[#allocation2 + $0x3c0] ss:$16 sps:$4 sm:$0xff]  }
  0x5f   :  { %3746 = vmatprep.subr.bf16.mxu1 %v6675_v21  ;;  %v6703_v40 = vld [vmem:[#allocation2 + $0x1a4] ss:$16 sps:$4 sm:$0xff]   ;;  %v6707_v42 = vld [vmem:[#allocation2 + $0x1a0] ss:$16 sps:$4 sm:$0xff]  }
  0x60   :  { %v6705_v41 = vld [vmem:[#allocation2 + $0x3a4] ss:$16 sps:$4 sm:$0xff]   ;;  %v6708_v43 = vld [vmem:[#allocation2 + $0x3a0] ss:$16 sps:$4 sm:$0xff]  }
  0x61   :  { %3706 = vmatpush1.bf16.msra.mxu0 %v6677_v22  ;;  %v6709_v44 = vld [vmem:[#allocation2 + $0x184] ss:$16 sps:$4 sm:$0xff]   ;;  %v6713_v47 = vld [vmem:[#allocation2 + $0x180] ss:$16 sps:$4 sm:$0xff]  }
  0x62   :  { %3747 = vmatpush1.bf16.msra.mxu1 %v6678_v23  ;;  %3707 = vmatprep.subr.bf16.mxu0 %v6679_v24  ;;  %v6711_v45 = vld [vmem:[#allocation2 + $0x384] ss:$16 sps:$4 sm:$0xff]   ;;  %v6714_v48 = vld [vmem:[#allocation2 + $0x380] ss:$16 sps:$4 sm:$0xff]  }
  0x63   :  { %3748 = vmatprep.subr.bf16.mxu1 %v6681_v25  ;;  %v6715_v51 = vld [vmem:[#allocation2 + $0x164] ss:$16 sps:$4 sm:$0xff]   ;;  %v6719_v54 = vld [vmem:[#allocation2 + $0x160] ss:$16 sps:$4 sm:$0xff]  }
  0x64   :  { %v6717_v53 = vld [vmem:[#allocation2 + $0x364] ss:$16 sps:$4 sm:$0xff]   ;;  %v6720_v55 = vld [vmem:[#allocation2 + $0x360] ss:$16 sps:$4 sm:$0xff]  }
  0x65   :  { %3708 = vmatpush1.bf16.msra.mxu0 %v6683_v26  ;;  %v6721_v56 = vld [vmem:[#allocation2 + $0x144] ss:$16 sps:$4 sm:$0xff]   ;;  %v6725_v58 = vld [vmem:[#allocation2 + $0x140] ss:$16 sps:$4 sm:$0xff]  }
  0x66   :  { %3749 = vmatpush1.bf16.msra.mxu1 %v6684_v27  ;;  %3709 = vmatprep.subr.bf16.mxu0 %v6685_v28  ;;  %v6723_v57 = vld [vmem:[#allocation2 + $0x344] ss:$16 sps:$4 sm:$0xff]   ;;  %v6726_v59 = vld [vmem:[#allocation2 + $0x340] ss:$16 sps:$4 sm:$0xff]  }
  0x67   :  { %3750 = vmatprep.subr.bf16.mxu1 %v6687_v29  ;;  %v6727_v60 = vld [vmem:[#allocation2 + $0x124] ss:$16 sps:$4 sm:$0xff]   ;;  %v6731_v62 = vld [vmem:[#allocation2 + $0x120] ss:$16 sps:$4 sm:$0xff]  }
  0x68   :  { %v6729_v61 = vld [vmem:[#allocation2 + $0x324] ss:$16 sps:$4 sm:$0xff]   ;;  %v6732_v63 = vld [vmem:[#allocation2 + $0x320] ss:$16 sps:$4 sm:$0xff]  }
  0x69   :  { %3710 = vmatpush1.bf16.msra.mxu0 %v6689_v30  ;;  %v6733_v0 = vld [vmem:[#allocation2 + $0x104] ss:$16 sps:$4 sm:$0xff]   ;;  %v6737_v2 = vld [vmem:[#allocation2 + $0x100] ss:$16 sps:$4 sm:$0xff]  }
  0x6a   :  { %3751 = vmatpush1.bf16.msra.mxu1 %v6690_v31  ;;  %3711 = vmatprep.subr.bf16.mxu0 %v6691_v32  ;;  %v6735_v1 = vld [vmem:[#allocation2 + $0x304] ss:$16 sps:$4 sm:$0xff]   ;;  %v6738_v3 = vld [vmem:[#allocation2 + $0x300] ss:$16 sps:$4 sm:$0xff]  }
  0x6b   :  { %3752 = vmatprep.subr.bf16.mxu1 %v6693_v33  ;;  %v103_v4 = vld [vmem:[%s8175_s0] sm:$0xff]  ;;  %v105_v5 = vld [vmem:[%s8175_s0 + $0x10] sm:$0xff] }
  0x6c   :  { %v6741_v6 = vld [vmem:[#allocation2 + $0x4e4] ss:$16 sps:$4 sm:$0xff]   ;;  %v7965_v8 = vpack.c.bf16 %v103_v4, %v103_v4  ;;  %v7967_v9 = vpack.c.bf16 %v105_v5, %v105_v5  ;;  %v6739_v10 = vld [vmem:[#allocation2 + $0x4e0] ss:$16 sps:$4 sm:$0xff]  }
  0x6d   :  { %3712 = vmatpush2.bf16.msra.mxu0 %v6695_v34  ;;  %v6744_v7 = vld [vmem:[#allocation2 + $0x6e4] ss:$16 sps:$4 sm:$0xff]   ;;  %v6742_v11 = vld [vmem:[#allocation2 + $0x6e0] ss:$16 sps:$4 sm:$0xff]   ;;  %v108_v34 = vld [vmem:[%s8175_s0 + $0x28] sm:$0xff] }
  0x6e   :  { %3753 = vmatpush2.bf16.msra.mxu1 %v6696_v35  ;;  %3713 = vmatprep.subr.bf16.mxu0 %v6697_v36  ;;  %v6747_v12 = vld [vmem:[#allocation2 + $0x4c4] ss:$16 sps:$4 sm:$0xff]   ;;  %v6745_v14 = vld [vmem:[#allocation2 + $0x4c0] ss:$16 sps:$4 sm:$0xff]  }
  0x6f   :  { %3754 = vmatprep.subr.bf16.mxu1 %v6699_v37  ;;  %v6750_v13 = vld [vmem:[#allocation2 + $0x6c4] ss:$16 sps:$4 sm:$0xff]   ;;  %v6748_v15 = vld [vmem:[#allocation2 + $0x6c0] ss:$16 sps:$4 sm:$0xff]   ;;  %v7974_v37 = vpack.c.bf16 %v108_v34, %v108_v34 }
  0x70   :  { %v6753_v16 = vld [vmem:[#allocation2 + $0x4a4] ss:$16 sps:$4 sm:$0xff]   ;;  %v6751_v18 = vld [vmem:[#allocation2 + $0x4a0] ss:$16 sps:$4 sm:$0xff]  }
  0x71   :  { %3714 = vmatpush2.bf16.msra.mxu0 %v6701_v38  ;;  %v6756_v17 = vld [vmem:[#allocation2 + $0x6a4] ss:$16 sps:$4 sm:$0xff]   ;;  %v6754_v19 = vld [vmem:[#allocation2 + $0x6a0] ss:$16 sps:$4 sm:$0xff]   ;;  %v110_v38 = vld [vmem:[%s8175_s0 + $0x38] sm:$0xff] }
  0x72   :  { %3755 = vmatpush2.bf16.msra.mxu1 %v6702_v39  ;;  %3715 = vmatprep.subr.bf16.mxu0 %v6703_v40  ;;  %v6759_v20 = vld [vmem:[#allocation2 + $0x484] ss:$16 sps:$4 sm:$0xff]   ;;  %v6757_v22 = vld [vmem:[#allocation2 + $0x480] ss:$16 sps:$4 sm:$0xff]   ;;  %v7979_v40 = vpack.c.bf16 %v110_v38, %v110_v38 }
  0x73   :  { %3756 = vmatprep.subr.bf16.mxu1 %v6705_v41  ;;  %v6762_v21 = vld [vmem:[#allocation2 + $0x684] ss:$16 sps:$4 sm:$0xff]   ;;  %v6760_v23 = vld [vmem:[#allocation2 + $0x680] ss:$16 sps:$4 sm:$0xff]  }
  0x74   :  { %v6765_v24 = vld [vmem:[#allocation2 + $0x464] ss:$16 sps:$4 sm:$0xff]   ;;  %v6763_v26 = vld [vmem:[#allocation2 + $0x460] ss:$16 sps:$4 sm:$0xff]  }
  0x75   :  { %3716 = vmatpush2.bf16.msra.mxu0 %v6707_v42  ;;  %v6768_v25 = vld [vmem:[#allocation2 + $0x664] ss:$16 sps:$4 sm:$0xff]   ;;  %v6766_v27 = vld [vmem:[#allocation2 + $0x660] ss:$16 sps:$4 sm:$0xff]  }
  0x76   :  { %3757 = vmatpush2.bf16.msra.mxu1 %v6708_v43  ;;  %3717 = vmatprep.subr.bf16.mxu0 %v6709_v44  ;;  %v6771_v28 = vld [vmem:[#allocation2 + $0x444] ss:$16 sps:$4 sm:$0xff]   ;;  %v6769_v30 = vld [vmem:[#allocation2 + $0x440] ss:$16 sps:$4 sm:$0xff]  }
  0x77   :  { %3758 = vmatprep.subr.bf16.mxu1 %v6711_v45  ;;  %v6774_v29 = vld [vmem:[#allocation2 + $0x644] ss:$16 sps:$4 sm:$0xff]   ;;  %v6772_v31 = vld [vmem:[#allocation2 + $0x640] ss:$16 sps:$4 sm:$0xff]  }
  0x78   :  { %v6777_v32 = vld [vmem:[#allocation2 + $0x424] ss:$16 sps:$4 sm:$0xff]   ;;  %v6775_v35 = vld [vmem:[#allocation2 + $0x420] ss:$16 sps:$4 sm:$0xff]  }
  0x79   :  { %3718 = vmatpush2.bf16.msra.mxu0 %v6713_v47  ;;  %v6780_v33 = vld [vmem:[#allocation2 + $0x624] ss:$16 sps:$4 sm:$0xff]   ;;  %v6778_v36 = vld [vmem:[#allocation2 + $0x620] ss:$16 sps:$4 sm:$0xff]  }
  0x7a   :  { %3759 = vmatpush2.bf16.msra.mxu1 %v6714_v48  ;;  %3719 = vmatprep.subr.bf16.mxu0 %v6715_v51  ;;  %v6783_v39 = vld [vmem:[#allocation2 + $0x404] ss:$16 sps:$4 sm:$0xff]   ;;  %v6781_v42 = vld [vmem:[#allocation2 + $0x400] ss:$16 sps:$4 sm:$0xff]  }
  0x7b   :  { %3760 = vmatprep.subr.bf16.mxu1 %v6717_v53  ;;  %v6786_v41 = vld [vmem:[#allocation2 + $0x604] ss:$16 sps:$4 sm:$0xff]   ;;  %v6784_v43 = vld [vmem:[#allocation2 + $0x600] ss:$16 sps:$4 sm:$0xff]  }
  0x7c   :  { %v6789_v44 = vld [vmem:[#allocation2 + $0x5e4] ss:$16 sps:$4 sm:$0xff]   ;;  %v6787_v46 = vld [vmem:[#allocation2 + $0x5e0] ss:$16 sps:$4 sm:$0xff]  }
  0x7d   :  { %3720 = vmatpush2.bf16.msra.mxu0 %v6719_v54  ;;  %v6792_v45 = vld [vmem:[#allocation2 + $0x7e4] ss:$16 sps:$4 sm:$0xff]   ;;  %v6790_v47 = vld [vmem:[#allocation2 + $0x7e0] ss:$16 sps:$4 sm:$0xff]  }
  0x7e   :  { %3761 = vmatpush2.bf16.msra.mxu1 %v6720_v55  ;;  %3721 = vmatprep.subr.bf16.mxu0 %v6721_v56  ;;  %v6795_v48 = vld [vmem:[#allocation2 + $0x5c4] ss:$16 sps:$4 sm:$0xff]   ;;  %v6793_v51 = vld [vmem:[#allocation2 + $0x5c0] ss:$16 sps:$4 sm:$0xff]  }
  0x7f   :  { %3762 = vmatprep.subr.bf16.mxu1 %v6723_v57  ;;  %v6798_v50 = vld [vmem:[#allocation2 + $0x7c4] ss:$16 sps:$4 sm:$0xff]   ;;  %v6796_v53 = vld [vmem:[#allocation2 + $0x7c0] ss:$16 sps:$4 sm:$0xff]  }
  0x80   :  { %v6801_v54 = vld [vmem:[#allocation2 + $0x5a4] ss:$16 sps:$4 sm:$0xff]   ;;  %v6799_v56 = vld [vmem:[#allocation2 + $0x5a0] ss:$16 sps:$4 sm:$0xff]  }
  0x81   :  { %3722 = vmatpush2.bf16.msra.mxu0 %v6725_v58  ;;  %v6804_v55 = vld [vmem:[#allocation2 + $0x7a4] ss:$16 sps:$4 sm:$0xff]   ;;  %v6802_v57 = vld [vmem:[#allocation2 + $0x7a0] ss:$16 sps:$4 sm:$0xff]  }
  0x82   :  { %3763 = vmatpush2.bf16.msra.mxu1 %v6726_v59  ;;  %3723 = vmatprep.subr.bf16.mxu0 %v6727_v60  ;;  %v6807_v58 = vld [vmem:[#allocation2 + $0x584] ss:$16 sps:$4 sm:$0xff]   ;;  %v6805_v60 = vld [vmem:[#allocation2 + $0x580] ss:$16 sps:$4 sm:$0xff]  }
  0x83   :  { %3764 = vmatprep.subr.bf16.mxu1 %v6729_v61  ;;  %v6810_v59 = vld [vmem:[#allocation2 + $0x784] ss:$16 sps:$4 sm:$0xff]   ;;  %v6808_v61 = vld [vmem:[#allocation2 + $0x780] ss:$16 sps:$4 sm:$0xff]  }
  0x84   :  { %v6817_v4 = vld [vmem:[#allocation2 + $0x540] ss:$16 sps:$4 sm:$0xff]   ;;  %v6858_v38 = vld [vmem:[#allocation2 + $0xa84] ss:$16 sps:$4 sm:$0xff]  }
  0x85   :  { %3724 = vmatpush2.bf16.msra.mxu0 %v6731_v62  ;;  %v6813_v62 = vld [vmem:[#allocation2 + $0x564] ss:$16 sps:$4 sm:$0xff]   ;;  %v6820_v5 = vld [vmem:[#allocation2 + $0x740] ss:$16 sps:$4 sm:$0xff]  }
  0x86   :  { %3765 = vmatpush2.bf16.msra.mxu1 %v6732_v63  ;;  %3725 = vmatprep.subr.bf16.mxu0 %v6733_v0  ;;  %v6816_v63 = vld [vmem:[#allocation2 + $0x764] ss:$16 sps:$4 sm:$0xff]   ;;  %v6811_v0 = vld [vmem:[#allocation2 + $0x560] ss:$16 sps:$4 sm:$0xff]  }
  0x87   :  { %3766 = vmatprep.subr.bf16.mxu1 %v6735_v1  ;;  %v6814_v1 = vld [vmem:[#allocation2 + $0x760] ss:$16 sps:$4 sm:$0xff]  }
  0x88   :  { %v6847_v34 = vld [vmem:[#allocation2 + $0x8a0] ss:$16 sps:$4 sm:$0xff]  }
  0x89   :  { %3726 = vmatpush2.bf16.msra.mxu0 %v6737_v2  ;;  %v6819_v2 = vld [vmem:[#allocation2 + $0x544] ss:$16 sps:$4 sm:$0xff]  }
  0x8a   :  { %3767 = vmatpush2.bf16.msra.mxu1 %v6738_v3  ;;  %3777 = vmatprep.subr.bf16.mxu0 %v6741_v6  ;;  %v6822_v3 = vld [vmem:[#allocation2 + $0x744] ss:$16 sps:$4 sm:$0xff]  }
  0x8b   :  { %3818 = vmatprep.subr.bf16.mxu1 %v6744_v7  ;;  %v6825_v6 = vld [vmem:[#allocation2 + $0x524] ss:$16 sps:$4 sm:$0xff]  }
  0x8c   :  { %3728 = vmatmul.mubr.bf16.vlgmr.msra.gmra.mxu0 %v7965_v8  ;;  %v6828_v7 = vld [vmem:[#allocation2 + $0x724] ss:$16 sps:$4 sm:$0xff]  }
  0x8d   :  { %3769 = vmatmul.mubr.bf16.vlgmr.msra.gmra.mxu1 %v7967_v9  ;;  %3778 = vmatpush1.bf16.msra.mxu0 %v6739_v10  ;;  %v6823_v10 = vld [vmem:[#allocation2 + $0x520] ss:$16 sps:$4 sm:$0xff]  }
  0x8e   :  { %3819 = vmatpush1.bf16.msra.mxu1 %v6742_v11  ;;  %3779 = vmatprep.subr.bf16.mxu0 %v6747_v12  ;;  %v6826_v11 = vld [vmem:[#allocation2 + $0x720] ss:$16 sps:$4 sm:$0xff]   ;;  %v6831_v12 = vld [vmem:[#allocation2 + $0x504] ss:$16 sps:$4 sm:$0xff]  }
  0x8f   :  { %3820 = vmatprep.subr.bf16.mxu1 %v6750_v13  ;;  %3809 = vmatprep.mubr.bf16.mxu0 %v7974_v37  ;;  %v6834_v13 = vld [vmem:[#allocation2 + $0x704] ss:$16 sps:$4 sm:$0xff]  }
  0x90   :  { %3850 = vmatprep.mubr.bf16.mxu1 %v7979_v40 }
  0x91   :  { %3780 = vmatpush1.bf16.msra.mxu0 %v6745_v14  ;;  %v6829_v14 = vld [vmem:[#allocation2 + $0x500] ss:$16 sps:$4 sm:$0xff]  }
  0x92   :  { %3821 = vmatpush1.bf16.msra.mxu1 %v6748_v15  ;;  %3781 = vmatprep.subr.bf16.mxu0 %v6753_v16  ;;  %v6832_v15 = vld [vmem:[#allocation2 + $0x700] ss:$16 sps:$4 sm:$0xff]  }
  0x93   :  { %3822 = vmatprep.subr.bf16.mxu1 %v6756_v17  ;;  %v107_v16 = vld [vmem:[%s8175_s0 + $0x20] sm:$0xff]  ;;  %v109_v17 = vld [vmem:[%s8175_s0 + $0x30] sm:$0xff] }
  0x95   :  { %3782 = vmatpush1.bf16.msra.mxu0 %v6751_v18  ;;  %v6837_v18 = vld [vmem:[#allocation2 + $0x8e4] ss:$16 sps:$4 sm:$0xff]  }
  0x96   :  { %3823 = vmatpush1.bf16.msra.mxu1 %v6754_v19  ;;  %3783 = vmatprep.subr.bf16.mxu0 %v6759_v20  ;;  %v6840_v19 = vld [vmem:[#allocation2 + $0xae4] ss:$16 sps:$4 sm:$0xff]   ;;  %v7989_v20 = vpack.c.bf16 %v107_v16, %v107_v16  ;;  %v6907_v16 = vld [vmem:[#allocation2 + $0x960] ss:$16 sps:$4 sm:$0xff]  }
  0x97   :  { %3824 = vmatprep.subr.bf16.mxu1 %v6762_v21  ;;  %v7991_v21 = vpack.c.bf16 %v109_v17, %v109_v17  ;;  %v6910_v17 = vld [vmem:[#allocation2 + $0xb60] ss:$16 sps:$4 sm:$0xff]  }
  0x99   :  { %3784 = vmatpush1.bf16.msra.mxu0 %v6757_v22  ;;  %v6835_v22 = vld [vmem:[#allocation2 + $0x8e0] ss:$16 sps:$4 sm:$0xff]  }
  0x9a   :  { %3825 = vmatpush1.bf16.msra.mxu1 %v6760_v23  ;;  %3785 = vmatprep.subr.bf16.mxu0 %v6765_v24  ;;  %v6838_v23 = vld [vmem:[#allocation2 + $0xae0] ss:$16 sps:$4 sm:$0xff]   ;;  %v6843_v24 = vld [vmem:[#allocation2 + $0x8c4] ss:$16 sps:$4 sm:$0xff]  }
  0x9b   :  { %3826 = vmatprep.subr.bf16.mxu1 %v6768_v25  ;;  %v6846_v25 = vld [vmem:[#allocation2 + $0xac4] ss:$16 sps:$4 sm:$0xff]  }
  0x9d   :  { %3786 = vmatpush1.bf16.msra.mxu0 %v6763_v26  ;;  %v112_v26 = vld [vmem:[%s8175_s0 + $0x48] sm:$0xff] }
  0x9e   :  { %3827 = vmatpush1.bf16.msra.mxu1 %v6766_v27  ;;  %3787 = vmatprep.subr.bf16.mxu0 %v6771_v28  ;;  %v6841_v27 = vld [vmem:[#allocation2 + $0x8c0] ss:$16 sps:$4 sm:$0xff]  }
  0x9f   :  { %3828 = vmatprep.subr.bf16.mxu1 %v6774_v29  ;;  %v6844_v28 = vld [vmem:[#allocation2 + $0xac0] ss:$16 sps:$4 sm:$0xff]   ;;  %v7998_v29 = vpack.c.bf16 %v112_v26, %v112_v26 }
  0xa0   :  { %v6919_v26 = vld [vmem:[#allocation2 + $0x920] ss:$16 sps:$4 sm:$0xff]  }
  0xa1   :  { %3788 = vmatpush1.bf16.msra.mxu0 %v6769_v30  ;;  %v114_v30 = vld [vmem:[%s8175_s0 + $0x58] sm:$0xff] }
  0xa2   :  { %3829 = vmatpush1.bf16.msra.mxu1 %v6772_v31  ;;  %3789 = vmatprep.subr.bf16.mxu0 %v6777_v32  ;;  %v6849_v31 = vld [vmem:[#allocation2 + $0x8a4] ss:$16 sps:$4 sm:$0xff]   ;;  %v8003_v32 = vpack.c.bf16 %v114_v30, %v114_v30 }
  0xa3   :  { %3830 = vmatprep.subr.bf16.mxu1 %v6780_v33  ;;  %v6852_v33 = vld [vmem:[#allocation2 + $0xaa4] ss:$16 sps:$4 sm:$0xff]  }
  0xa4   :  { %v6930_v30 = vld [vmem:[#allocation2 + $0xb04] ss:$16 sps:$4 sm:$0xff]  }
  0xa5   :  { %3790 = vmatpush1.bf16.msra.mxu0 %v6775_v35  ;;  %v6850_v35 = vld [vmem:[#allocation2 + $0xaa0] ss:$16 sps:$4 sm:$0xff]  }
  0xa6   :  { %3831 = vmatpush1.bf16.msra.mxu1 %v6778_v36  ;;  %3791 = vmatprep.subr.bf16.mxu0 %v6783_v39  ;;  %v6855_v36 = vld [vmem:[#allocation2 + $0x884] ss:$16 sps:$4 sm:$0xff]   ;;  %v6853_v39 = vld [vmem:[#allocation2 + $0x880] ss:$16 sps:$4 sm:$0xff]  }
  0xa7   :  { %3832 = vmatprep.subr.bf16.mxu1 %v6786_v41  ;;  %v6856_v41 = vld [vmem:[#allocation2 + $0xa80] ss:$16 sps:$4 sm:$0xff]  }
  0xa9   :  { %3792 = vmatpush1.bf16.msra.mxu0 %v6781_v42  ;;  %v6861_v42 = vld [vmem:[#allocation2 + $0x864] ss:$16 sps:$4 sm:$0xff]  }
  0xaa   :  { %3833 = vmatpush1.bf16.msra.mxu1 %v6784_v43  ;;  %3793 = vmatprep.subr.bf16.mxu0 %v6789_v44  ;;  %v6864_v43 = vld [vmem:[#allocation2 + $0xa64] ss:$16 sps:$4 sm:$0xff]   ;;  %v6859_v44 = vld [vmem:[#allocation2 + $0x860] ss:$16 sps:$4 sm:$0xff]  }
  0xab   :  { %3834 = vmatprep.subr.bf16.mxu1 %v6792_v45  ;;  %v6862_v45 = vld [vmem:[#allocation2 + $0xa60] ss:$16 sps:$4 sm:$0xff]  }
  0xad   :  { %3794 = vmatpush2.bf16.msra.mxu0 %v6787_v46  ;;  %v6867_v46 = vld [vmem:[#allocation2 + $0x844] ss:$16 sps:$4 sm:$0xff]  }
  0xae   :  { %3835 = vmatpush2.bf16.msra.mxu1 %v6790_v47  ;;  %3795 = vmatprep.subr.bf16.mxu0 %v6795_v48  ;;  %v6870_v47 = vld [vmem:[#allocation2 + $0xa44] ss:$16 sps:$4 sm:$0xff]   ;;  %v6865_v48 = vld [vmem:[#allocation2 + $0x840] ss:$16 sps:$4 sm:$0xff]  }
  0xaf   :  { %3836 = vmatprep.subr.bf16.mxu1 %v6798_v50  ;;  %v6868_v50 = vld [vmem:[#allocation2 + $0xa40] ss:$16 sps:$4 sm:$0xff]  }
  0xb1   :  { %3796 = vmatpush2.bf16.msra.mxu0 %v6793_v51  ;;  %v6873_v51 = vld [vmem:[#allocation2 + $0x824] ss:$16 sps:$4 sm:$0xff]  }
  0xb2   :  { %3837 = vmatpush2.bf16.msra.mxu1 %v6796_v53  ;;  %3797 = vmatprep.subr.bf16.mxu0 %v6801_v54  ;;  %v6876_v53 = vld [vmem:[#allocation2 + $0xa24] ss:$16 sps:$4 sm:$0xff]   ;;  %v6871_v54 = vld [vmem:[#allocation2 + $0x820] ss:$16 sps:$4 sm:$0xff]  }
  0xb3   :  { %3838 = vmatprep.subr.bf16.mxu1 %v6804_v55  ;;  %v6874_v55 = vld [vmem:[#allocation2 + $0xa20] ss:$16 sps:$4 sm:$0xff]  }
  0xb5   :  { %3798 = vmatpush2.bf16.msra.mxu0 %v6799_v56  ;;  %v6879_v56 = vld [vmem:[#allocation2 + $0x804] ss:$16 sps:$4 sm:$0xff]  }
  0xb6   :  { %3839 = vmatpush2.bf16.msra.mxu1 %v6802_v57  ;;  %3799 = vmatprep.subr.bf16.mxu0 %v6807_v58  ;;  %v6882_v57 = vld [vmem:[#allocation2 + $0xa04] ss:$16 sps:$4 sm:$0xff]   ;;  %v6877_v58 = vld [vmem:[#allocation2 + $0x800] ss:$16 sps:$4 sm:$0xff]  }
  0xb7   :  { %3840 = vmatprep.subr.bf16.mxu1 %v6810_v59  ;;  %v6880_v59 = vld [vmem:[#allocation2 + $0xa00] ss:$16 sps:$4 sm:$0xff]  }
  0xb9   :  { %3800 = vmatpush2.bf16.msra.mxu0 %v6805_v60  ;;  %v6885_v60 = vld [vmem:[#allocation2 + $0x9e4] ss:$16 sps:$4 sm:$0xff]  }
  0xba   :  { %3841 = vmatpush2.bf16.msra.mxu1 %v6808_v61  ;;  %3801 = vmatprep.subr.bf16.mxu0 %v6813_v62  ;;  %v6888_v61 = vld [vmem:[#allocation2 + $0xbe4] ss:$16 sps:$4 sm:$0xff]   ;;  %v6883_v62 = vld [vmem:[#allocation2 + $0x9e0] ss:$16 sps:$4 sm:$0xff]  }
  0xbb   :  { %3842 = vmatprep.subr.bf16.mxu1 %v6816_v63  ;;  %v6886_v63 = vld [vmem:[#allocation2 + $0xbe0] ss:$16 sps:$4 sm:$0xff]  }
  0xbd   :  { %3802 = vmatpush2.bf16.msra.mxu0 %v6811_v0  ;;  %v6891_v0 = vld [vmem:[#allocation2 + $0x9c4] ss:$16 sps:$4 sm:$0xff]  }
  0xbe   :  { %3843 = vmatpush2.bf16.msra.mxu1 %v6814_v1  ;;  %3803 = vmatprep.subr.bf16.mxu0 %v6819_v2  ;;  %v6894_v1 = vld [vmem:[#allocation2 + $0xbc4] ss:$16 sps:$4 sm:$0xff]   ;;  %v6889_v2 = vld [vmem:[#allocation2 + $0x9c0] ss:$16 sps:$4 sm:$0xff]  }
  0xbf   :  { %3844 = vmatprep.subr.bf16.mxu1 %v6822_v3  ;;  %v6892_v3 = vld [vmem:[#allocation2 + $0xbc0] ss:$16 sps:$4 sm:$0xff]  }
  0xc1   :  { %3804 = vmatpush2.bf16.msra.mxu0 %v6817_v4  ;;  %v6897_v4 = vld [vmem:[#allocation2 + $0x9a4] ss:$16 sps:$4 sm:$0xff]  }
  0xc2   :  { %3845 = vmatpush2.bf16.msra.mxu1 %v6820_v5  ;;  %3805 = vmatprep.subr.bf16.mxu0 %v6825_v6  ;;  %v6900_v5 = vld [vmem:[#allocation2 + $0xba4] ss:$16 sps:$4 sm:$0xff]   ;;  %v6895_v6 = vld [vmem:[#allocation2 + $0x9a0] ss:$16 sps:$4 sm:$0xff]  }
  0xc3   :  { %3846 = vmatprep.subr.bf16.mxu1 %v6828_v7  ;;  %v6898_v7 = vld [vmem:[#allocation2 + $0xba0] ss:$16 sps:$4 sm:$0xff]  }
  0xc5   :  { %3806 = vmatpush2.bf16.msra.mxu0 %v6823_v10  ;;  %v6903_v10 = vld [vmem:[#allocation2 + $0x984] ss:$16 sps:$4 sm:$0xff]  }
  0xc6   :  { %3847 = vmatpush2.bf16.msra.mxu1 %v6826_v11  ;;  %3807 = vmatprep.subr.bf16.mxu0 %v6831_v12  ;;  %v6906_v11 = vld [vmem:[#allocation2 + $0xb84] ss:$16 sps:$4 sm:$0xff]   ;;  %v6901_v12 = vld [vmem:[#allocation2 + $0x980] ss:$16 sps:$4 sm:$0xff]  }
  0xc7   :  { %3848 = vmatprep.subr.bf16.mxu1 %v6834_v13  ;;  %v6904_v13 = vld [vmem:[#allocation2 + $0xb80] ss:$16 sps:$4 sm:$0xff]  }
  0xc9   :  { %3808 = vmatpush2.bf16.msra.mxu0 %v6829_v14  ;;  %v6909_v14 = vld [vmem:[#allocation2 + $0x964] ss:$16 sps:$4 sm:$0xff]  }
  0xca   :  { %3849 = vmatpush2.bf16.msra.mxu1 %v6832_v15  ;;  %3859 = vmatprep.subr.bf16.mxu0 %v6837_v18  ;;  %v6912_v15 = vld [vmem:[#allocation2 + $0xb64] ss:$16 sps:$4 sm:$0xff]  }
  0xcb   :  { %3900 = vmatprep.subr.bf16.mxu1 %v6840_v19  ;;  %v6915_v18 = vld [vmem:[#allocation2 + $0x944] ss:$16 sps:$4 sm:$0xff]  }
  0xcc   :  { %3810 = vmatmul.mubr.bf16.vlgmr.msra.gmra.mxu0 %v7989_v20  ;;  %v6918_v19 = vld [vmem:[#allocation2 + $0xb44] ss:$16 sps:$4 sm:$0xff]  }
  0xcd   :  { %3851 = vmatmul.mubr.bf16.vlgmr.msra.gmra.mxu1 %v7991_v21  ;;  %3860 = vmatpush1.bf16.msra.mxu0 %v6835_v22  ;;  %v6913_v22 = vld [vmem:[#allocation2 + $0x940] ss:$16 sps:$4 sm:$0xff]  }
  0xce   :  { %3901 = vmatpush1.bf16.msra.mxu1 %v6838_v23  ;;  %3861 = vmatprep.subr.bf16.mxu0 %v6843_v24  ;;  %v6916_v23 = vld [vmem:[#allocation2 + $0xb40] ss:$16 sps:$4 sm:$0xff]   ;;  %v6921_v24 = vld [vmem:[#allocation2 + $0x924] ss:$16 sps:$4 sm:$0xff]  }
  0xcf   :  { %3902 = vmatprep.subr.bf16.mxu1 %v6846_v25  ;;  %3891 = vmatprep.mubr.bf16.mxu0 %v7998_v29  ;;  %v6924_v25 = vld [vmem:[#allocation2 + $0xb24] ss:$16 sps:$4 sm:$0xff]  }
  0xd0   :  { %3932 = vmatprep.mubr.bf16.mxu1 %v8003_v32 }
  0xd1   :  { %3862 = vmatpush1.bf16.msra.mxu0 %v6841_v27  ;;  %v6922_v27 = vld [vmem:[#allocation2 + $0xb20] ss:$16 sps:$4 sm:$0xff]  }
  0xd2   :  { %3903 = vmatpush1.bf16.msra.mxu1 %v6844_v28  ;;  %3863 = vmatprep.subr.bf16.mxu0 %v6849_v31  ;;  %v6927_v28 = vld [vmem:[#allocation2 + $0x904] ss:$16 sps:$4 sm:$0xff]   ;;  %v6925_v31 = vld [vmem:[#allocation2 + $0x900] ss:$16 sps:$4 sm:$0xff]  }
  0xd3   :  { %3904 = vmatprep.subr.bf16.mxu1 %v6852_v33  ;;  %v6928_v33 = vld [vmem:[#allocation2 + $0xb00] ss:$16 sps:$4 sm:$0xff]  }
  0xd5   :  { %3864 = vmatpush1.bf16.msra.mxu0 %v6847_v34  ;;  %v111_v34 = vld [vmem:[%s8175_s0 + $0x40] sm:$0xff] }
  0xd6   :  { %3905 = vmatpush1.bf16.msra.mxu1 %v6850_v35  ;;  %3865 = vmatprep.subr.bf16.mxu0 %v6855_v36  ;;  %v113_v35 = vld [vmem:[%s8175_s0 + $0x50] sm:$0xff] }
  0xd7   :  { %3906 = vmatprep.subr.bf16.mxu1 %v6858_v38  ;;  %v6933_v36 = vld [vmem:[#allocation2 + $0xce4] ss:$16 sps:$4 sm:$0xff]  }
  0xd8   :  { %v6936_v38 = vld [vmem:[#allocation2 + $0xee4] ss:$16 sps:$4 sm:$0xff]  }
  0xd9   :  { %3866 = vmatpush1.bf16.msra.mxu0 %v6853_v39  ;;  %v116_v39 = vld [vmem:[%s8175_s0 + $0x68] sm:$0xff] }
  0xda   :  { %3907 = vmatpush1.bf16.msra.mxu1 %v6856_v41  ;;  %3867 = vmatprep.subr.bf16.mxu0 %v6861_v42  ;;  %v8016_v41 = vpack.c.bf16 %v111_v34, %v111_v34  ;;  %v8018_v42 = vpack.c.bf16 %v113_v35, %v113_v35  ;;  %v6997_v34 = vld [vmem:[#allocation2 + $0xd80] ss:$16 sps:$4 sm:$0xff]  }
  0xdb   :  { %3908 = vmatprep.subr.bf16.mxu1 %v6864_v43  ;;  %v118_v43 = vld [vmem:[%s8175_s0 + $0x78] sm:$0xff]  ;;  %v7000_v35 = vld [vmem:[#allocation2 + $0xf80] ss:$16 sps:$4 sm:$0xff]  }
  0xdd   :  { %3868 = vmatpush1.bf16.msra.mxu0 %v6859_v44  ;;  %v6931_v44 = vld [vmem:[#allocation2 + $0xce0] ss:$16 sps:$4 sm:$0xff]  }
  0xde   :  { %3909 = vmatpush1.bf16.msra.mxu1 %v6862_v45  ;;  %3869 = vmatprep.subr.bf16.mxu0 %v6867_v46  ;;  %v6934_v45 = vld [vmem:[#allocation2 + $0xee0] ss:$16 sps:$4 sm:$0xff]   ;;  %v6939_v46 = vld [vmem:[#allocation2 + $0xcc4] ss:$16 sps:$4 sm:$0xff]  }
  0xdf   :  { %3910 = vmatprep.subr.bf16.mxu1 %v6870_v47  ;;  %v6942_v47 = vld [vmem:[#allocation2 + $0xec4] ss:$16 sps:$4 sm:$0xff]  }
  0xe1   :  { %3870 = vmatpush1.bf16.msra.mxu0 %v6865_v48  ;;  %v8023_v48 = vpack.c.bf16 %v116_v39, %v116_v39  ;;  %v7003_v39 = vld [vmem:[#allocation2 + $0xd60] ss:$16 sps:$4 sm:$0xff]  }
  0xe2   :  { %3911 = vmatpush1.bf16.msra.mxu1 %v6868_v50  ;;  %3871 = vmatprep.subr.bf16.mxu0 %v6873_v51  ;;  %v8025_v50 = vpack.c.bf16 %v118_v43, %v118_v43  ;;  %v6937_v51 = vld [vmem:[#allocation2 + $0xcc0] ss:$16 sps:$4 sm:$0xff]  }
  0xe3   :  { %3912 = vmatprep.subr.bf16.mxu1 %v6876_v53  ;;  %v6940_v53 = vld [vmem:[#allocation2 + $0xec0] ss:$16 sps:$4 sm:$0xff]  }
  0xe4   :  { %v7006_v43 = vld [vmem:[#allocation2 + $0xf60] ss:$16 sps:$4 sm:$0xff]  }
  0xe5   :  { %3872 = vmatpush1.bf16.msra.mxu0 %v6871_v54  ;;  %v6945_v54 = vld [vmem:[#allocation2 + $0xca4] ss:$16 sps:$4 sm:$0xff]  }
  0xe6   :  { %3913 = vmatpush1.bf16.msra.mxu1 %v6874_v55  ;;  %3873 = vmatprep.subr.bf16.mxu0 %v6879_v56  ;;  %v6948_v55 = vld [vmem:[#allocation2 + $0xea4] ss:$16 sps:$4 sm:$0xff]   ;;  %v6943_v56 = vld [vmem:[#allocation2 + $0xca0] ss:$16 sps:$4 sm:$0xff]  }
  0xe7   :  { %3914 = vmatprep.subr.bf16.mxu1 %v6882_v57  ;;  %v6946_v57 = vld [vmem:[#allocation2 + $0xea0] ss:$16 sps:$4 sm:$0xff]  }
  0xe9   :  { %3874 = vmatpush1.bf16.msra.mxu0 %v6877_v58  ;;  %v6951_v58 = vld [vmem:[#allocation2 + $0xc84] ss:$16 sps:$4 sm:$0xff]  }
  0xea   :  { %3915 = vmatpush1.bf16.msra.mxu1 %v6880_v59  ;;  %3875 = vmatprep.subr.bf16.mxu0 %v6885_v60  ;;  %v6954_v59 = vld [vmem:[#allocation2 + $0xe84] ss:$16 sps:$4 sm:$0xff]   ;;  %v6949_v60 = vld [vmem:[#allocation2 + $0xc80] ss:$16 sps:$4 sm:$0xff]  }
  0xeb   :  { %3916 = vmatprep.subr.bf16.mxu1 %v6888_v61  ;;  %v6952_v61 = vld [vmem:[#allocation2 + $0xe80] ss:$16 sps:$4 sm:$0xff]  }
  0xed   :  { %3876 = vmatpush2.bf16.msra.mxu0 %v6883_v62  ;;  %v6957_v62 = vld [vmem:[#allocation2 + $0xc64] ss:$16 sps:$4 sm:$0xff]  }
  0xee   :  { %3917 = vmatpush2.bf16.msra.mxu1 %v6886_v63  ;;  %3877 = vmatprep.subr.bf16.mxu0 %v6891_v0  ;;  %v6960_v63 = vld [vmem:[#allocation2 + $0xe64] ss:$16 sps:$4 sm:$0xff]   ;;  %v6955_v0 = vld [vmem:[#allocation2 + $0xc60] ss:$16 sps:$4 sm:$0xff]  }
  0xef   :  { %3918 = vmatprep.subr.bf16.mxu1 %v6894_v1  ;;  %v6958_v1 = vld [vmem:[#allocation2 + $0xe60] ss:$16 sps:$4 sm:$0xff]  }
  0xf1   :  { %3878 = vmatpush2.bf16.msra.mxu0 %v6889_v2  ;;  %v6963_v2 = vld [vmem:[#allocation2 + $0xc44] ss:$16 sps:$4 sm:$0xff]  }
  0xf2   :  { %3919 = vmatpush2.bf16.msra.mxu1 %v6892_v3  ;;  %3879 = vmatprep.subr.bf16.mxu0 %v6897_v4  ;;  %v6966_v3 = vld [vmem:[#allocation2 + $0xe44] ss:$16 sps:$4 sm:$0xff]   ;;  %v6961_v4 = vld [vmem:[#allocation2 + $0xc40] ss:$16 sps:$4 sm:$0xff]  }
  0xf3   :  { %3920 = vmatprep.subr.bf16.mxu1 %v6900_v5  ;;  %v6964_v5 = vld [vmem:[#allocation2 + $0xe40] ss:$16 sps:$4 sm:$0xff]  }
  0xf5   :  { %3880 = vmatpush2.bf16.msra.mxu0 %v6895_v6  ;;  %v6969_v6 = vld [vmem:[#allocation2 + $0xc24] ss:$16 sps:$4 sm:$0xff]  }
  0xf6   :  { %3921 = vmatpush2.bf16.msra.mxu1 %v6898_v7  ;;  %3881 = vmatprep.subr.bf16.mxu0 %v6903_v10  ;;  %v6972_v7 = vld [vmem:[#allocation2 + $0xe24] ss:$16 sps:$4 sm:$0xff]   ;;  %v6967_v10 = vld [vmem:[#allocation2 + $0xc20] ss:$16 sps:$4 sm:$0xff]  }
  0xf7   :  { %3922 = vmatprep.subr.bf16.mxu1 %v6906_v11  ;;  %v6970_v11 = vld [vmem:[#allocation2 + $0xe20] ss:$16 sps:$4 sm:$0xff]  }
  0xf9   :  { %3882 = vmatpush2.bf16.msra.mxu0 %v6901_v12  ;;  %v6975_v12 = vld [vmem:[#allocation2 + $0xc04] ss:$16 sps:$4 sm:$0xff]  }
  0xfa   :  { %3923 = vmatpush2.bf16.msra.mxu1 %v6904_v13  ;;  %3883 = vmatprep.subr.bf16.mxu0 %v6909_v14  ;;  %v6978_v13 = vld [vmem:[#allocation2 + $0xe04] ss:$16 sps:$4 sm:$0xff]   ;;  %v6973_v14 = vld [vmem:[#allocation2 + $0xc00] ss:$16 sps:$4 sm:$0xff]  }
  0xfb   :  { %3924 = vmatprep.subr.bf16.mxu1 %v6912_v15  ;;  %v6976_v15 = vld [vmem:[#allocation2 + $0xe00] ss:$16 sps:$4 sm:$0xff]  }
  0xfd   :  { %3884 = vmatpush2.bf16.msra.mxu0 %v6907_v16  ;;  %v6981_v16 = vld [vmem:[#allocation2 + $0xde4] ss:$16 sps:$4 sm:$0xff]  }
  0xfe   :  { %3925 = vmatpush2.bf16.msra.mxu1 %v6910_v17  ;;  %3885 = vmatprep.subr.bf16.mxu0 %v6915_v18  ;;  %v6984_v17 = vld [vmem:[#allocation2 + $0xfe4] ss:$16 sps:$4 sm:$0xff]   ;;  %v6979_v18 = vld [vmem:[#allocation2 + $0xde0] ss:$16 sps:$4 sm:$0xff]  }
  0xff   :  { %3926 = vmatprep.subr.bf16.mxu1 %v6918_v19  ;;  %v6982_v19 = vld [vmem:[#allocation2 + $0xfe0] ss:$16 sps:$4 sm:$0xff]  }
 0x101   :  { %3886 = vmatpush2.bf16.msra.mxu0 %v6913_v22  ;;  %v6987_v22 = vld [vmem:[#allocation2 + $0xdc4] ss:$16 sps:$4 sm:$0xff]  }
 0x102   :  { %3927 = vmatpush2.bf16.msra.mxu1 %v6916_v23  ;;  %3887 = vmatprep.subr.bf16.mxu0 %v6921_v24  ;;  %v6990_v23 = vld [vmem:[#allocation2 + $0xfc4] ss:$16 sps:$4 sm:$0xff]   ;;  %v6985_v24 = vld [vmem:[#allocation2 + $0xdc0] ss:$16 sps:$4 sm:$0xff]  }
 0x103   :  { %3928 = vmatprep.subr.bf16.mxu1 %v6924_v25  ;;  %v6988_v25 = vld [vmem:[#allocation2 + $0xfc0] ss:$16 sps:$4 sm:$0xff]  }
 0x105   :  { %3888 = vmatpush2.bf16.msra.mxu0 %v6919_v26  ;;  %v6993_v26 = vld [vmem:[#allocation2 + $0xda4] ss:$16 sps:$4 sm:$0xff]  }
 0x106   :  { %3929 = vmatpush2.bf16.msra.mxu1 %v6922_v27  ;;  %3889 = vmatprep.subr.bf16.mxu0 %v6927_v28  ;;  %v6996_v27 = vld [vmem:[#allocation2 + $0xfa4] ss:$16 sps:$4 sm:$0xff]   ;;  %v6991_v28 = vld [vmem:[#allocation2 + $0xda0] ss:$16 sps:$4 sm:$0xff]  }
 0x107   :  { %3930 = vmatprep.subr.bf16.mxu1 %v6930_v30  ;;  %v6994_v30 = vld [vmem:[#allocation2 + $0xfa0] ss:$16 sps:$4 sm:$0xff]  }
 0x109   :  { %3890 = vmatpush2.bf16.msra.mxu0 %v6925_v31  ;;  %v6999_v31 = vld [vmem:[#allocation2 + $0xd84] ss:$16 sps:$4 sm:$0xff]  }
 0x10a   :  { %3931 = vmatpush2.bf16.msra.mxu1 %v6928_v33  ;;  %3941 = vmatprep.subr.bf16.mxu0 %v6933_v36  ;;  %v7002_v33 = vld [vmem:[#allocation2 + $0xf84] ss:$16 sps:$4 sm:$0xff]  }
 0x10b   :  { %3982 = vmatprep.subr.bf16.mxu1 %v6936_v38  ;;  %v7005_v36 = vld [vmem:[#allocation2 + $0xd64] ss:$16 sps:$4 sm:$0xff]  }
 0x10c   :  { %3892 = vmatmul.mubr.bf16.vlgmr.msra.gmra.mxu0 %v8016_v41  ;;  %v7008_v38 = vld [vmem:[#allocation2 + $0xf64] ss:$16 sps:$4 sm:$0xff]  }
 0x10d   :  { %3933 = vmatmul.mubr.bf16.vlgmr.msra.gmra.mxu1 %v8018_v42  ;;  %3942 = vmatpush1.bf16.msra.mxu0 %v6931_v44  ;;  %v7011_v44 = vld [vmem:[#allocation2 + $0xd44] ss:$16 sps:$4 sm:$0xff]  }
 0x10e   :  { %3983 = vmatpush1.bf16.msra.mxu1 %v6934_v45  ;;  %3943 = vmatprep.subr.bf16.mxu0 %v6939_v46  ;;  %v7014_v45 = vld [vmem:[#allocation2 + $0xf44] ss:$16 sps:$4 sm:$0xff]   ;;  %v7009_v46 = vld [vmem:[#allocation2 + $0xd40] ss:$16 sps:$4 sm:$0xff]  }
 0x10f   :  { %3984 = vmatprep.subr.bf16.mxu1 %v6942_v47  ;;  %3973 = vmatprep.mubr.bf16.mxu0 %v8023_v48  ;;  %v7012_v47 = vld [vmem:[#allocation2 + $0xf40] ss:$16 sps:$4 sm:$0xff]  }
 0x110   :  { %4014 = vmatprep.mubr.bf16.mxu1 %v8025_v50 }
 0x111   :  { %3944 = vmatpush1.bf16.msra.mxu0 %v6937_v51  ;;  %v7017_v51 = vld [vmem:[#allocation2 + $0xd24] ss:$16 sps:$4 sm:$0xff]  }
 0x112   :  { %3985 = vmatpush1.bf16.msra.mxu1 %v6940_v53  ;;  %3945 = vmatprep.subr.bf16.mxu0 %v6945_v54  ;;  %v731_v53 = vlaneseq  ;;  %v7020_v54 = vld [vmem:[#allocation2 + $0xf24] ss:$16 sps:$4 sm:$0xff]  }
 0x113   :  { %3986 = vmatprep.subr.bf16.mxu1 %v6948_v55  ;;  %v7015_v55 = vld [vmem:[#allocation2 + $0xd20] ss:$16 sps:$4 sm:$0xff]  }
 0x115   :  { %3946 = vmatpush1.bf16.msra.mxu0 %v6943_v56  ;;  %v7018_v56 = vld [vmem:[#allocation2 + $0xf20] ss:$16 sps:$4 sm:$0xff]  }
 0x116   :  { %3987 = vmatpush1.bf16.msra.mxu1 %v6946_v57  ;;  %3947 = vmatprep.subr.bf16.mxu0 %v6951_v58  ;;  %v7023_v57 = vld [vmem:[#allocation2 + $0xd04] ss:$16 sps:$4 sm:$0xff]   ;;  %v8031_v58 = vshrl.u32 %v731_v53, 7  ;;  %v7048_v53 = vld [vmem:[#allocation2 + $0xe8] ss:$16 sps:$4 sm:$0xff]  }
 0x117   :  { %3988 = vmatprep.subr.bf16.mxu1 %v6954_v59  ;;  %v7026_v59 = vld [vmem:[#allocation2 + $0xf04] ss:$16 sps:$4 sm:$0xff]  }
 0x119   :  { %3948 = vmatpush1.bf16.msra.mxu0 %v6949_v60  ;;  %v7021_v60 = vld [vmem:[#allocation2 + $0xd00] ss:$16 sps:$4 sm:$0xff]  }
 0x11a   :  { %3989 = vmatpush1.bf16.msra.mxu1 %v6952_v61  ;;  %3949 = vmatprep.subr.bf16.mxu0 %v6957_v62  ;;  %v7024_v61 = vld [vmem:[#allocation2 + $0xf00] ss:$16 sps:$4 sm:$0xff]  }
 0x11b   :  { %3990 = vmatprep.subr.bf16.mxu1 %v6960_v63  ;;  %v729_v62 = vld [vmem:[#allocation4] sm:$0xf] }
 0x11c   :  { %v115_v63 = vld [vmem:[%s8175_s0 + $0x60] sm:$0xff] }
 0x11d   :  { %3950 = vmatpush1.bf16.msra.mxu0 %v6955_v0  ;;  %v117_v0 = vld [vmem:[%s8175_s0 + $0x70] sm:$0xff] }
 0x11e   :  { %3991 = vmatpush1.bf16.msra.mxu1 %v6958_v1  ;;  %3951 = vmatprep.subr.bf16.mxu0 %v6963_v2  ;;  %v733_v1 = vsub.s32 0, %v8031_v58  ;;  %v7029_v2 = vld [vmem:[#allocation2 + $0x10e4] ss:$16 sps:$4 sm:$0xff]  }
 0x11f   :  { %3992 = vmatprep.subr.bf16.mxu1 %v6966_v3  ;;  %v7032_v3 = vld [vmem:[#allocation2 + $0x1244] ss:$16 sps:$4 sm:$0xff]  }
 0x121   :  { %3952 = vmatpush1.bf16.msra.mxu0 %v6961_v4  ;;  %v7027_v4 = vld [vmem:[#allocation2 + $0x10e0] ss:$16 sps:$4 sm:$0xff]  }
 0x122   :  { %3993 = vmatpush1.bf16.msra.mxu1 %v6964_v5  ;;  %3953 = vmatprep.subr.bf16.mxu0 %v6969_v6  ;;  %v737_v5 = vsub.s32 1, %v8031_v58  ;;  %v8041_v6 = vpack.c.bf16 %v115_v63, %v115_v63  ;;  %v7065_v63 = vld [vmem:[#allocation2 + $0x1024] ss:$16 sps:$4 sm:$0xff]  }
 0x123   :  { %3994 = vmatprep.subr.bf16.mxu1 %v6972_v7  ;;  %v8043_v7 = vpack.c.bf16 %v117_v0, %v117_v0  ;;  %v7068_v0 = vld [vmem:[#allocation2 + $0x8c] ss:$16 sps:$4 sm:$0xff]  }
 0x125   :  { %3954 = vmatpush1.bf16.msra.mxu0 %v6967_v10  ;;  %v7030_v10 = vld [vmem:[#allocation2 + $0x1240] ss:$16 sps:$4 sm:$0xff]  }
 0x126   :  { %3995 = vmatpush1.bf16.msra.mxu1 %v6970_v11  ;;  %3955 = vmatprep.subr.bf16.mxu0 %v6975_v12  ;;  %v120_v11 = vld [vmem:[%s8175_s0 + $0x88] sm:$0xff]  ;;  %v734_v12 = vrot.slane %v729_v62, %v733_v1 }
 0x127   :  { %3996 = vmatprep.subr.bf16.mxu1 %v6978_v13  ;;  %v7035_v13 = vld [vmem:[#allocation2 + $0x10c4] ss:$16 sps:$4 sm:$0xff]  }
 0x129   :  { %3956 = vmatpush1.bf16.msra.mxu0 %v6973_v14  ;;  %v7038_v14 = vld [vmem:[#allocation2 + $0x1224] ss:$16 sps:$4 sm:$0xff]  }
 0x12a   :  { %3997 = vmatpush1.bf16.msra.mxu1 %v6976_v15  ;;  %3957 = vmatprep.subr.bf16.mxu0 %v6981_v16  ;;  %v738_v15 = vrot.slane %v729_v62, %v737_v5  ;;  %v8052_v16 = vpack.c.bf16 %v120_v11, %v120_v11  ;;  %v7060_v62 = vld [vmem:[#allocation2 + $0xa8] ss:$16 sps:$4 sm:$0xff]   ;;  %v7069_v11 = vld [vmem:[#allocation2 + $0x1000] ss:$16 sps:$4 sm:$0xff]  }
 0x12b   :  { %3998 = vmatprep.subr.bf16.mxu1 %v6984_v17 }
 0x12d   :  { %3958 = vmatpush2.bf16.msra.mxu0 %v6979_v18 }
 0x12e   :  { %3999 = vmatpush2.bf16.msra.mxu1 %v6982_v19  ;;  %3959 = vmatprep.subr.bf16.mxu0 %v6987_v22  ;;  %v7033_v19 = vld [vmem:[#allocation2 + $0x10c0] ss:$16 sps:$4 sm:$0xff]  }
 0x12f   :  { %4000 = vmatprep.subr.bf16.mxu1 %v6990_v23  ;;  %v7036_v22 = vld [vmem:[#allocation2 + $0x1220] ss:$16 sps:$4 sm:$0xff]  }
 0x131   :  { %3960 = vmatpush2.bf16.msra.mxu0 %v6985_v24  ;;  %v7041_v24 = vld [vmem:[#allocation2 + $0x10a4] ss:$16 sps:$4 sm:$0xff]  }
 0x132   :  { %4001 = vmatpush2.bf16.msra.mxu1 %v6988_v25  ;;  %3961 = vmatprep.subr.bf16.mxu0 %v6993_v26 }
 0x133   :  { %4002 = vmatprep.subr.bf16.mxu1 %v6996_v27  ;;  %v7044_v27 = vld [vmem:[#allocation2 + $0x1204] ss:$16 sps:$4 sm:$0xff]  }
 0x135   :  { %3962 = vmatpush2.bf16.msra.mxu0 %v6991_v28 }
 0x136   :  { %4003 = vmatpush2.bf16.msra.mxu1 %v6994_v30  ;;  %3963 = vmatprep.subr.bf16.mxu0 %v6999_v31  ;;  %v7039_v31 = vld [vmem:[#allocation2 + $0x10a0] ss:$16 sps:$4 sm:$0xff]  }
 0x137   :  { %4004 = vmatprep.subr.bf16.mxu1 %v7002_v33  ;;  %v7888_v33 = vmov 0  }
 0x139   :  { %3964 = vmatpush2.bf16.msra.mxu0 %v6997_v34 }
 0x13a   :  { %4005 = vmatpush2.bf16.msra.mxu1 %v7000_v35  ;;  %3965 = vmatprep.subr.bf16.mxu0 %v7005_v36  ;;  %v7042_v36 = vld [vmem:[#allocation2 + $0x1200] ss:$16 sps:$4 sm:$0xff]  }
 0x13b   :  { %4006 = vmatprep.subr.bf16.mxu1 %v7008_v38  ;;  %v7047_v38 = vld [vmem:[#allocation2 + $0x1084] ss:$16 sps:$4 sm:$0xff]  }
 0x13d   :  { %3966 = vmatpush2.bf16.msra.mxu0 %v7003_v39 }
 0x13e   :  { %4007 = vmatpush2.bf16.msra.mxu1 %v7006_v43  ;;  %3967 = vmatprep.subr.bf16.mxu0 %v7011_v44  ;;  %v121_v43 = vld [vmem:[%s8175_s0 + $0x90] sm:$0xff] }
 0x13f   :  { %4008 = vmatprep.subr.bf16.mxu1 %v7014_v45 }
 0x141   :  { %3968 = vmatpush2.bf16.msra.mxu0 %v7009_v46  ;;  %v7050_v46 = vld [vmem:[#allocation2 + $0xec] ss:$16 sps:$4 sm:$0xff]  }
 0x142   :  { %4009 = vmatpush2.bf16.msra.mxu1 %v7012_v47  ;;  %3969 = vmatprep.subr.bf16.mxu0 %v7017_v51  ;;  %v7045_v47 = vld [vmem:[#allocation2 + $0x1080] ss:$16 sps:$4 sm:$0xff]   ;;  %v8065_v51 = vpack.c.bf16 %v121_v43, %v121_v43  ;;  %v7102_v43 = vld [vmem:[#allocation2 + $0x1c8] ss:$16 sps:$4 sm:$0xff]  }
 0x143   :  { %4010 = vmatprep.subr.bf16.mxu1 %v7020_v54  ;;  %v7053_v54 = vld [vmem:[#allocation2 + $0x1064] ss:$16 sps:$4 sm:$0xff]  }
 0x145   :  { %3970 = vmatpush2.bf16.msra.mxu0 %v7015_v55  ;;  %v7056_v55 = vld [vmem:[#allocation2 + $0xcc] ss:$16 sps:$4 sm:$0xff]  }
 0x146   :  { %4011 = vmatpush2.bf16.msra.mxu1 %v7018_v56  ;;  %3971 = vmatprep.subr.bf16.mxu0 %v7023_v57  ;;  %v7051_v56 = vld [vmem:[#allocation2 + $0x1060] ss:$16 sps:$4 sm:$0xff]   ;;  %v7054_v57 = vld [vmem:[#allocation2 + $0xc8] ss:$16 sps:$4 sm:$0xff]  }
 0x147   :  { %4012 = vmatprep.subr.bf16.mxu1 %v7026_v59  ;;  %v7059_v59 = vld [vmem:[#allocation2 + $0x1044] ss:$16 sps:$4 sm:$0xff]  }
 0x149   :  { %3972 = vmatpush2.bf16.msra.mxu0 %v7021_v60  ;;  %v7062_v60 = vld [vmem:[#allocation2 + $0xac] ss:$16 sps:$4 sm:$0xff]  }
 0x14a   :  { %4013 = vmatpush2.bf16.msra.mxu1 %v7024_v61  ;;  %4023 = vmatprep.subr.bf16.mxu0 %v7029_v2  ;;  %v7057_v61 = vld [vmem:[#allocation2 + $0x1040] ss:$16 sps:$4 sm:$0xff]  }
 0x14b   :  { %4074 = vmatprep.subr.bf16.mxu1 %v7032_v3  ;;  %v7063_v2 = vld [vmem:[#allocation2 + $0x1020] ss:$16 sps:$4 sm:$0xff]   ;;  %v7066_v3 = vld [vmem:[#allocation2 + $0x88] ss:$16 sps:$4 sm:$0xff]  }
 0x14c   :  { %v3729_v17 = vpop.f32.mrf.mxu0  ;;  %3974 = vmatmul.mubr.bf16.vlgmr.msra.gmra.mxu0 %v8041_v6 }
 0x14d   :  { %v3770_v18 = vpop.f32.mrf.mxu1  ;;  %4015 = vmatmul.mubr.bf16.vlgmr.msra.gmra.mxu1 %v8043_v7  ;;  %v3730_v23 = vadd.f32 %v3729_v17, %v734_v12  ;;  %4024 = vmatpush1.bf16.msra.mxu0 %v7027_v4  ;;  %v7071_v4 = vld [vmem:[#allocation2 + $0x1004] ss:$16 sps:$4 sm:$0xff]  }
 0x14e   :  { %4075 = vmatpush1.bf16.msra.mxu1 %v7030_v10  ;;  %v3731_v25 = vpop.f32.mrf.mxu0  ;;  %4025 = vmatprep.subr.bf16.mxu0 %v7035_v13  ;;  %v7074_v10 = vld [vmem:[#allocation2 + $0x6c] ss:$16 sps:$4 sm:$0xff]   ;;  %v7077_v12 = vld [vmem:[#allocation2 + $0x11e4] ss:$16 sps:$4 sm:$0xff]  }
 0x14f   :  { %v3772_v26 = vpop.f32.mrf.mxu1  ;;  %4076 = vmatprep.subr.bf16.mxu1 %v7038_v14  ;;  %v8056_v28 = vadd.f32 %v3770_v18, %v3730_v23  ;;  %v3732_v30 = vadd.f32 %v3731_v25, %v738_v15  ;;  %4096 = vmatprep.mubr.bf16.mxu1 %v7888_v33  ;;  %v7080_v13 = vld [vmem:[#allocation2 + $0x4c] ss:$16 sps:$4 sm:$0xff]   ;;  %v7075_v14 = vld [vmem:[#allocation2 + $0x11e0] ss:$16 sps:$4 sm:$0xff]   ;;  %v7078_v15 = vld [vmem:[#allocation2 + $0x48] ss:$16 sps:$4 sm:$0xff]  }
 0x150   :  { %4055 = vmatprep.mubr.bf16.mxu0 %v8052_v16  ;;  %v3733_v34 = vpop.f32.mrf.mxu0  ;;  %v7083_v17 = vld [vmem:[#allocation2 + $0x11c4] ss:$16 sps:$4 sm:$0xff]   ;;  %v7086_v18 = vld [vmem:[#allocation2 + $0x2c] ss:$16 sps:$4 sm:$0xff]   ;;  %v7087_v25 = vld [vmem:[#allocation2 + $0x11a0] ss:$16 sps:$4 sm:$0xff]  }
 0x151   :  { %v3774_v35 = vpop.f32.mrf.mxu1  ;;  %v8060_v39 = vadd.f32 %v3772_v26, %v3732_v30  ;;  %4026 = vmatpush1.bf16.msra.mxu0 %v7033_v19  ;;  %v7081_v19 = vld [vmem:[#allocation2 + $0x11c0] ss:$16 sps:$4 sm:$0xff]   ;;  %v7089_v23 = vld [vmem:[#allocation2 + $0x11a4] ss:$16 sps:$4 sm:$0xff]   ;;  %v7090_v26 = vld [vmem:[#allocation2 + $0x8] ss:$16 sps:$4 sm:$0xff]  }
 0x152   :  { %4077 = vmatpush1.bf16.msra.mxu1 %v7036_v22  ;;  %v3734_v44 = vpop.f32.mrf.mxu0  ;;  %4027 = vmatprep.subr.bf16.mxu0 %v7041_v24  ;;  %v7084_v22 = vld [vmem:[#allocation2 + $0x28] ss:$16 sps:$4 sm:$0xff]   ;;  %v7092_v24 = vld [vmem:[#allocation2 + $0xc] ss:$16 sps:$4 sm:$0xff]   ;;  %v7101_v35 = vld [vmem:[#allocation2 + $0x1164] ss:$16 sps:$4 sm:$0xff]  }
 0x153   :  { %v3775_v45 = vpop.f32.mrf.mxu1  ;;  %4078 = vmatprep.subr.bf16.mxu1 %v7044_v27  ;;  %v7095_v27 = vld [vmem:[#allocation2 + $0x1184] ss:$16 sps:$4 sm:$0xff]   ;;  %v7098_v30 = vld [vmem:[#allocation2 + $0x1ec] ss:$16 sps:$4 sm:$0xff]   ;;  %v7096_v34 = vld [vmem:[#allocation2 + $0x1e8] ss:$16 sps:$4 sm:$0xff]  }
 0x154   :  { %v7107_v44 = vld [vmem:[#allocation2 + $0x1144] ss:$16 sps:$4 sm:$0xff]   ;;  %v7110_v45 = vld [vmem:[#allocation2 + $0x1ac] ss:$16 sps:$4 sm:$0xff]  }
 0x155   :  { %4028 = vmatpush1.bf16.msra.mxu0 %v7039_v31  ;;  %v7093_v31 = vld [vmem:[#allocation2 + $0x1180] ss:$16 sps:$4 sm:$0xff]  }
 0x156   :  { %4079 = vmatpush1.bf16.msra.mxu1 %v7042_v36  ;;  %4029 = vmatprep.subr.bf16.mxu0 %v7047_v38  ;;  %v7104_v36 = vld [vmem:[#allocation2 + $0x1cc] ss:$16 sps:$4 sm:$0xff]   ;;  %v7099_v38 = vld [vmem:[#allocation2 + $0x1160] ss:$16 sps:$4 sm:$0xff]  }
 0x157   :  { %4105 = vmatprep.subr.bf16.mxu1 %v7050_v46  ;;  %v7105_v46 = vld [vmem:[#allocation2 + $0x1140] ss:$16 sps:$4 sm:$0xff]  }
 0x159   :  { %6425 = vmatmul.mubr.msk.bf16.vlgmr.msra.gmra.mxu1 %vm3691_vm0, %v8065_v51  ;;  %4030 = vmatpush1.bf16.msra.mxu0 %v7045_v47  ;;  %v7108_v47 = vld [vmem:[#allocation2 + $0x1a8] ss:$16 sps:$4 sm:$0xff]  }
 0x15a   :  { %4106 = vmatpush1.bf16.msra.mxu1 %v7048_v53  ;;  %4031 = vmatprep.subr.bf16.mxu0 %v7053_v54  ;;  %v7113_v53 = vld [vmem:[#allocation2 + $0x1124] ss:$16 sps:$4 sm:$0xff]   ;;  %v7116_v54 = vld [vmem:[#allocation2 + $0x18c] ss:$16 sps:$4 sm:$0xff]  }
 0x15b   :  { %4107 = vmatprep.subr.bf16.mxu1 %v7056_v55  ;;  %4137 = vmatprep.mubr.bf16.mxu1 %v7950_v49  ;;  %v7072_v49 = vld [vmem:[#allocation2 + $0x68] ss:$16 sps:$4 sm:$0xff]   ;;  %v7111_v55 = vld [vmem:[#allocation2 + $0x1120] ss:$16 sps:$4 sm:$0xff]  }
 0x15d   :  { %4032 = vmatpush1.bf16.msra.mxu0 %v7051_v56  ;;  %v7114_v56 = vld [vmem:[#allocation2 + $0x188] ss:$16 sps:$4 sm:$0xff]  }
 0x15e   :  { %4108 = vmatpush1.bf16.msra.mxu1 %v7054_v57  ;;  %4033 = vmatprep.subr.bf16.mxu0 %v7059_v59  ;;  %v7119_v57 = vld [vmem:[#allocation2 + $0x1104] ss:$16 sps:$4 sm:$0xff]   ;;  %v7122_v59 = vld [vmem:[#allocation2 + $0x16c] ss:$16 sps:$4 sm:$0xff]  }
 0x15f   :  { %4109 = vmatprep.subr.bf16.mxu1 %v7062_v60  ;;  %v7117_v60 = vld [vmem:[#allocation2 + $0x1100] ss:$16 sps:$4 sm:$0xff]  }
 0x161   :  { %4034 = vmatpush1.bf16.msra.mxu0 %v7057_v61  ;;  %v7120_v61 = vld [vmem:[#allocation2 + $0x168] ss:$16 sps:$4 sm:$0xff]  }
 0x162   :  { %4110 = vmatpush1.bf16.msra.mxu1 %v7060_v62  ;;  %4035 = vmatprep.subr.bf16.mxu0 %v7065_v63  ;;  %v119_v62 = vld [vmem:[%s8175_s0 + $0x80] sm:$0xff]  ;;  %v7125_v63 = vld [vmem:[#allocation2 + $0x14c] ss:$16 sps:$4 sm:$0xff]  }
 0x163   :  { %4111 = vmatprep.subr.bf16.mxu1 %v7068_v0  ;;  %v7128_v0 = vld [vmem:[#allocation2 + $0x2ec] ss:$16 sps:$4 sm:$0xff]  }
 0x165   :  { %4036 = vmatpush1.bf16.msra.mxu0 %v7063_v2  ;;  %v7123_v2 = vld [vmem:[#allocation2 + $0x148] ss:$16 sps:$4 sm:$0xff]  }
 0x166   :  { %4112 = vmatpush1.bf16.msra.mxu1 %v7066_v3  ;;  %4037 = vmatprep.subr.bf16.mxu0 %v7071_v4  ;;  %v7126_v3 = vld [vmem:[#allocation2 + $0x2e8] ss:$16 sps:$4 sm:$0xff]   ;;  %v8073_v4 = vpack.c.bf16 %v119_v62, %v119_v62 }
 0x167   :  { %4113 = vmatprep.subr.bf16.mxu1 %v7074_v10  ;;  %v7131_v10 = vld [vmem:[#allocation2 + $0x12c] ss:$16 sps:$4 sm:$0xff]   ;;  %v7168_v62 = vld [vmem:[#allocation2 + $0x468] ss:$16 sps:$4 sm:$0xff]  }
 0x169   :  { %4038 = vmatpush1.bf16.msra.mxu0 %v7069_v11  ;;  %v7134_v11 = vld [vmem:[#allocation2 + $0x2cc] ss:$16 sps:$4 sm:$0xff]  }
 0x16a   :  { %4114 = vmatpush1.bf16.msra.mxu1 %v7072_v49  ;;  %4039 = vmatprep.subr.bf16.mxu0 %v7077_v12  ;;  %v7129_v49 = vld [vmem:[#allocation2 + $0x128] ss:$16 sps:$4 sm:$0xff]  }
 0x16b   :  { %4115 = vmatprep.subr.bf16.mxu1 %v7080_v13  ;;  %v7132_v12 = vld [vmem:[#allocation2 + $0x2c8] ss:$16 sps:$4 sm:$0xff]  }
 0x16d   :  { %4040 = vmatpush2.bf16.msra.mxu0 %v7075_v14 }
 0x16e   :  { %4116 = vmatpush1.bf16.msra.mxu1 %v7078_v15  ;;  %4041 = vmatprep.subr.bf16.mxu0 %v7083_v17 }
 0x16f   :  { %4117 = vmatprep.subr.bf16.mxu1 %v7086_v18 }
 0x171   :  { %4042 = vmatpush2.bf16.msra.mxu0 %v7081_v19  ;;  %v7137_v19 = vld [vmem:[#allocation2 + $0x10c] ss:$16 sps:$4 sm:$0xff]  }
 0x172   :  { %4118 = vmatpush1.bf16.msra.mxu1 %v7084_v22  ;;  %4043 = vmatprep.subr.bf16.mxu0 %v7089_v23  ;;  %v7140_v22 = vld [vmem:[#allocation2 + $0x2ac] ss:$16 sps:$4 sm:$0xff]  }
 0x173   :  { %4119 = vmatprep.subr.bf16.mxu1 %v7092_v24 }
 0x175   :  { %4044 = vmatpush2.bf16.msra.mxu0 %v7087_v25  ;;  %v7135_v25 = vld [vmem:[#allocation2 + $0x108] ss:$16 sps:$4 sm:$0xff]  }
 0x176   :  { %4120 = vmatpush1.bf16.msra.mxu1 %v7090_v26  ;;  %4045 = vmatprep.subr.bf16.mxu0 %v7095_v27  ;;  %v7138_v26 = vld [vmem:[#allocation2 + $0x2a8] ss:$16 sps:$4 sm:$0xff]  }
 0x177   :  { %4121 = vmatprep.subr.bf16.mxu1 %v7098_v30 }
 0x179   :  { %4046 = vmatpush2.bf16.msra.mxu0 %v7093_v31 }
 0x17a   :  { %4122 = vmatpush2.bf16.msra.mxu1 %v7096_v34  ;;  %4047 = vmatprep.subr.bf16.mxu0 %v7101_v35  ;;  %v7143_v35 = vld [vmem:[#allocation2 + $0x28c] ss:$16 sps:$4 sm:$0xff]  }
 0x17b   :  { %4123 = vmatprep.subr.bf16.mxu1 %v7104_v36  ;;  %v7146_v36 = vld [vmem:[#allocation2 + $0x4ec] ss:$16 sps:$4 sm:$0xff]  }
 0x17d   :  { %4048 = vmatpush2.bf16.msra.mxu0 %v7099_v38  ;;  %v7141_v38 = vld [vmem:[#allocation2 + $0x288] ss:$16 sps:$4 sm:$0xff]  }
 0x17e   :  { %4124 = vmatpush2.bf16.msra.mxu1 %v7102_v43  ;;  %4049 = vmatprep.subr.bf16.mxu0 %v7107_v44  ;;  %v7144_v43 = vld [vmem:[#allocation2 + $0x4e8] ss:$16 sps:$4 sm:$0xff]  }
 0x17f   :  { %4125 = vmatprep.subr.bf16.mxu1 %v7110_v45  ;;  %v7147_v44 = vld [vmem:[#allocation2 + $0x268] ss:$16 sps:$4 sm:$0xff]  }
 0x180   :  { %v7150_v45 = vld [vmem:[#allocation2 + $0x4c8] ss:$16 sps:$4 sm:$0xff]  }
 0x181   :  { %4050 = vmatpush2.bf16.msra.mxu0 %v7105_v46  ;;  %v7155_v46 = vld [vmem:[#allocation2 + $0x24c] ss:$16 sps:$4 sm:$0xff]  }
 0x182   :  { %4126 = vmatpush2.bf16.msra.mxu1 %v7108_v47  ;;  %4051 = vmatprep.subr.bf16.mxu0 %v7113_v53  ;;  %v7158_v47 = vld [vmem:[#allocation2 + $0x4ac] ss:$16 sps:$4 sm:$0xff]   ;;  %v7153_v53 = vld [vmem:[#allocation2 + $0x248] ss:$16 sps:$4 sm:$0xff]  }
 0x183   :  { %4127 = vmatprep.subr.bf16.mxu1 %v7116_v54  ;;  %v7156_v54 = vld [vmem:[#allocation2 + $0x4a8] ss:$16 sps:$4 sm:$0xff]  }
 0x185   :  { %4052 = vmatpush2.bf16.msra.mxu0 %v7111_v55  ;;  %v7161_v55 = vld [vmem:[#allocation2 + $0x22c] ss:$16 sps:$4 sm:$0xff]  }
 0x186   :  { %4128 = vmatpush2.bf16.msra.mxu1 %v7114_v56  ;;  %4053 = vmatprep.subr.bf16.mxu0 %v7119_v57  ;;  %v7164_v56 = vld [vmem:[#allocation2 + $0x48c] ss:$16 sps:$4 sm:$0xff]   ;;  %v7159_v57 = vld [vmem:[#allocation2 + $0x228] ss:$16 sps:$4 sm:$0xff]  }
 0x187   :  { %4129 = vmatprep.subr.bf16.mxu1 %v7122_v59  ;;  %v7167_v59 = vld [vmem:[#allocation2 + $0x20c] ss:$16 sps:$4 sm:$0xff]  }
 0x189   :  { %4054 = vmatpush2.bf16.msra.mxu0 %v7117_v60  ;;  %v7170_v60 = vld [vmem:[#allocation2 + $0x46c] ss:$16 sps:$4 sm:$0xff]  }
 0x18a   :  { %4130 = vmatpush2.bf16.msra.mxu1 %v7120_v61  ;;  %4146 = vmatprep.subr.bf16.mxu0 %v7128_v0  ;;  %v7165_v61 = vld [vmem:[#allocation2 + $0x208] ss:$16 sps:$4 sm:$0xff]  }
 0x18b   :  { %4131 = vmatprep.subr.bf16.mxu1 %v7125_v63  ;;  %v7176_v63 = vld [vmem:[#allocation2 + $0x44c] ss:$16 sps:$4 sm:$0xff]   ;;  %v7171_v0 = vld [vmem:[#allocation2 + $0x3e8] ss:$16 sps:$4 sm:$0xff]  }
 0x18c   :  { %v3811_v13 = vpop.f32.mrf.mxu0  ;;  %4056 = vmatmul.mubr.bf16.vlgmr.msra.gmra.mxu0 %v8073_v4 }
 0x18d   :  { %v3852_v14 = vpop.f32.mrf.mxu1  ;;  %v3812_v15 = vadd.f32 %v3811_v13, %v8056_v28  ;;  %4147 = vmatpush1.bf16.msra.mxu0 %v7126_v3  ;;  %4178 = vmatprep.mubr.bf16.mxu0 %v7955_v52  ;;  %v7152_v52 = vld [vmem:[#allocation2 + $0x4cc] ss:$16 sps:$4 sm:$0xff]  }
 0x18e   :  { %4132 = vmatpush2.bf16.msra.mxu1 %v7123_v2  ;;  %v3813_v17 = vpop.f32.mrf.mxu0  ;;  %4148 = vmatprep.subr.bf16.mxu0 %v7134_v11  ;;  %v7174_v2 = vld [vmem:[#allocation2 + $0x448] ss:$16 sps:$4 sm:$0xff]   ;;  %v7179_v3 = vld [vmem:[#allocation2 + $0x3cc] ss:$16 sps:$4 sm:$0xff]  }
 0x18f   :  { %v3854_v18 = vpop.f32.mrf.mxu1  ;;  %4133 = vmatprep.subr.bf16.mxu1 %v7131_v10  ;;  %v8077_v23 = vadd.f32 %v3852_v14, %v3812_v15  ;;  %v3814_v24 = vadd.f32 %v3813_v17, %v8060_v39  ;;  %v7149_v39 = vld [vmem:[#allocation2 + $0x26c] ss:$16 sps:$4 sm:$0xff]   ;;  %v7177_v11 = vld [vmem:[#allocation2 + $0x3c8] ss:$16 sps:$4 sm:$0xff]  }
 0x190   :  { %v3815_v27 = vpop.f32.mrf.mxu0  ;;  %v7182_v10 = vld [vmem:[#allocation2 + $0x42c] ss:$16 sps:$4 sm:$0xff]   ;;  %v7183_v14 = vld [vmem:[#allocation2 + $0x3a8] ss:$16 sps:$4 sm:$0xff]  }
 0x191   :  { %v3856_v30 = vpop.f32.mrf.mxu1  ;;  %v8081_v31 = vadd.f32 %v3854_v18, %v3814_v24  ;;  %4149 = vmatpush1.bf16.msra.mxu0 %v7132_v12  ;;  %v7185_v12 = vld [vmem:[#allocation2 + $0x3ac] ss:$16 sps:$4 sm:$0xff]   ;;  %v7186_v15 = vld [vmem:[#allocation2 + $0x408] ss:$16 sps:$4 sm:$0xff]  }
 0x192   :  { %4134 = vmatpush2.bf16.msra.mxu1 %v7129_v49  ;;  %v3816_v28 = vpop.f32.mrf.mxu0  ;;  %4150 = vmatprep.subr.bf16.mxu0 %v7140_v22  ;;  %v7180_v49 = vld [vmem:[#allocation2 + $0x428] ss:$16 sps:$4 sm:$0xff]   ;;  %v7188_v13 = vld [vmem:[#allocation2 + $0x40c] ss:$16 sps:$4 sm:$0xff]  }
 0x193   :  { %v3857_v34 = vpop.f32.mrf.mxu1  ;;  %4135 = vmatprep.subr.bf16.mxu1 %v7137_v19  ;;  %v7191_v17 = vld [vmem:[#allocation2 + $0x38c] ss:$16 sps:$4 sm:$0xff]   ;;  %v7189_v19 = vld [vmem:[#allocation2 + $0x388] ss:$16 sps:$4 sm:$0xff]  }
 0x194   :  { %v7194_v18 = vld [vmem:[#allocation2 + $0x5ec] ss:$16 sps:$4 sm:$0xff]   ;;  %v7192_v22 = vld [vmem:[#allocation2 + $0x5e8] ss:$16 sps:$4 sm:$0xff]  }
 0x195   :  { %4151 = vmatpush1.bf16.msra.mxu0 %v7138_v26  ;;  %v7197_v24 = vld [vmem:[#allocation2 + $0x36c] ss:$16 sps:$4 sm:$0xff]   ;;  %v7195_v26 = vld [vmem:[#allocation2 + $0x368] ss:$16 sps:$4 sm:$0xff]  }
 0x196   :  { %4136 = vmatpush2.bf16.msra.mxu1 %v7135_v25  ;;  %4152 = vmatprep.subr.bf16.mxu0 %v7143_v35  ;;  %v7200_v25 = vld [vmem:[#allocation2 + $0x5cc] ss:$16 sps:$4 sm:$0xff]   ;;  %v7198_v27 = vld [vmem:[#allocation2 + $0x5c8] ss:$16 sps:$4 sm:$0xff]  }
 0x197   :  { %4187 = vmatprep.subr.bf16.mxu1 %v7146_v36  ;;  %v7203_v30 = vld [vmem:[#allocation2 + $0x34c] ss:$16 sps:$4 sm:$0xff]   ;;  %v7201_v34 = vld [vmem:[#allocation2 + $0x348] ss:$16 sps:$4 sm:$0xff]  }
 0x198   :  { %v7206_v28 = vld [vmem:[#allocation2 + $0x5ac] ss:$16 sps:$4 sm:$0xff]   ;;  %v7204_v35 = vld [vmem:[#allocation2 + $0x5a8] ss:$16 sps:$4 sm:$0xff]  }
 0x199   :  { %4138 = vmatmul.mubr.bf16.vlgmr.msra.gmra.mxu1 %v7965_v8  ;;  %4153 = vmatpush1.bf16.msra.mxu0 %v7141_v38  ;;  %v7162_v8 = vld [vmem:[#allocation2 + $0x488] ss:$16 sps:$4 sm:$0xff]   ;;  %v7209_v36 = vld [vmem:[#allocation2 + $0x32c] ss:$16 sps:$4 sm:$0xff]  }
 0x19a   :  { %4188 = vmatpush1.bf16.msra.mxu1 %v7144_v43  ;;  %4154 = vmatprep.subr.bf16.mxu0 %v7149_v39  ;;  %v7212_v38 = vld [vmem:[#allocation2 + $0x58c] ss:$16 sps:$4 sm:$0xff]   ;;  %v7207_v43 = vld [vmem:[#allocation2 + $0x328] ss:$16 sps:$4 sm:$0xff]  }
 0x19b   :  { %4189 = vmatprep.subr.bf16.mxu1 %v7152_v52  ;;  %4219 = vmatprep.mubr.bf16.mxu1 %v7974_v37  ;;  %v7173_v37 = vld [vmem:[#allocation2 + $0x3ec] ss:$16 sps:$4 sm:$0xff]   ;;  %v7210_v39 = vld [vmem:[#allocation2 + $0x588] ss:$16 sps:$4 sm:$0xff]  }
 0x19c   :  { %v7215_v52 = vld [vmem:[#allocation2 + $0x30c] ss:$16 sps:$4 sm:$0xff]  }
 0x19d   :  { %4155 = vmatpush1.bf16.msra.mxu0 %v7147_v44  ;;  %v7218_v44 = vld [vmem:[#allocation2 + $0x56c] ss:$16 sps:$4 sm:$0xff]  }
 0x19e   :  { %4190 = vmatpush1.bf16.msra.mxu1 %v7150_v45  ;;  %4156 = vmatprep.subr.bf16.mxu0 %v7155_v46  ;;  %v7213_v45 = vld [vmem:[#allocation2 + $0x308] ss:$16 sps:$4 sm:$0xff]  }
 0x19f   :  { %4191 = vmatprep.subr.bf16.mxu1 %v7158_v47  ;;  %v7216_v46 = vld [vmem:[#allocation2 + $0x568] ss:$16 sps:$4 sm:$0xff]   ;;  %v7221_v47 = vld [vmem:[#allocation2 + $0x54c] ss:$16 sps:$4 sm:$0xff]  }
 0x1a1   :  { %4157 = vmatpush1.bf16.msra.mxu0 %v7153_v53  ;;  %v7224_v53 = vld [vmem:[#allocation2 + $0x6ec] ss:$16 sps:$4 sm:$0xff]  }
 0x1a2   :  { %4192 = vmatpush1.bf16.msra.mxu1 %v7156_v54  ;;  %4158 = vmatprep.subr.bf16.mxu0 %v7161_v55  ;;  %v7219_v54 = vld [vmem:[#allocation2 + $0x548] ss:$16 sps:$4 sm:$0xff]  }
 0x1a3   :  { %4193 = vmatprep.subr.bf16.mxu1 %v7164_v56  ;;  %v7222_v55 = vld [vmem:[#allocation2 + $0x6e8] ss:$16 sps:$4 sm:$0xff]   ;;  %v7227_v56 = vld [vmem:[#allocation2 + $0x52c] ss:$16 sps:$4 sm:$0xff]  }
 0x1a5   :  { %4159 = vmatpush1.bf16.msra.mxu0 %v7159_v57  ;;  %v7230_v57 = vld [vmem:[#allocation2 + $0x6cc] ss:$16 sps:$4 sm:$0xff]  }
 0x1a6   :  { %4194 = vmatpush1.bf16.msra.mxu1 %v7162_v8  ;;  %4160 = vmatprep.subr.bf16.mxu0 %v7167_v59  ;;  %v7225_v8 = vld [vmem:[#allocation2 + $0x528] ss:$16 sps:$4 sm:$0xff]  }
 0x1a7   :  { %4195 = vmatprep.subr.bf16.mxu1 %v7170_v60  ;;  %v7228_v59 = vld [vmem:[#allocation2 + $0x6c8] ss:$16 sps:$4 sm:$0xff]  }
 0x1a9   :  { %4161 = vmatpush1.bf16.msra.mxu0 %v7165_v61 }
 0x1aa   :  { %4196 = vmatpush1.bf16.msra.mxu1 %v7168_v62  ;;  %4162 = vmatprep.subr.bf16.mxu0 %v7173_v37 }
 0x1ab   :  { %4197 = vmatprep.subr.bf16.mxu1 %v7176_v63 }
 0x1ad   :  { %4163 = vmatpush2.bf16.msra.mxu0 %v7171_v0  ;;  %v7233_v0 = vld [vmem:[#allocation2 + $0x50c] ss:$16 sps:$4 sm:$0xff]  }
 0x1ae   :  { %4198 = vmatpush1.bf16.msra.mxu1 %v7174_v2  ;;  %4164 = vmatprep.subr.bf16.mxu0 %v7179_v3  ;;  %v7236_v2 = vld [vmem:[#allocation2 + $0x6ac] ss:$16 sps:$4 sm:$0xff]  }
 0x1af   :  { %4199 = vmatprep.subr.bf16.mxu1 %v7182_v10 }
 0x1b1   :  { %4165 = vmatpush2.bf16.msra.mxu0 %v7177_v11  ;;  %v7231_v11 = vld [vmem:[#allocation2 + $0x508] ss:$16 sps:$4 sm:$0xff]  }
 0x1b2   :  { %4200 = vmatpush1.bf16.msra.mxu1 %v7180_v49  ;;  %4166 = vmatprep.subr.bf16.mxu0 %v7185_v12  ;;  %v7234_v49 = vld [vmem:[#allocation2 + $0x6a8] ss:$16 sps:$4 sm:$0xff]  }
 0x1b3   :  { %4201 = vmatprep.subr.bf16.mxu1 %v7188_v13 }
 0x1b5   :  { %4167 = vmatpush2.bf16.msra.mxu0 %v7183_v14 }
 0x1b6   :  { %4202 = vmatpush1.bf16.msra.mxu1 %v7186_v15  ;;  %4168 = vmatprep.subr.bf16.mxu0 %v7191_v17  ;;  %v7239_v15 = vld [vmem:[#allocation2 + $0x68c] ss:$16 sps:$4 sm:$0xff]  }
 0x1b7   :  { %4203 = vmatprep.subr.bf16.mxu1 %v7194_v18  ;;  %v7242_v17 = vld [vmem:[#allocation2 + $0x8ec] ss:$16 sps:$4 sm:$0xff]   ;;  %v7237_v18 = vld [vmem:[#allocation2 + $0x688] ss:$16 sps:$4 sm:$0xff]  }
 0x1b9   :  { %4169 = vmatpush2.bf16.msra.mxu0 %v7189_v19  ;;  %v7240_v19 = vld [vmem:[#allocation2 + $0x8e8] ss:$16 sps:$4 sm:$0xff]  }
 0x1ba   :  { %4204 = vmatpush2.bf16.msra.mxu1 %v7192_v22  ;;  %4170 = vmatprep.subr.bf16.mxu0 %v7197_v24  ;;  %v7243_v22 = vld [vmem:[#allocation2 + $0x668] ss:$16 sps:$4 sm:$0xff]  }
 0x1bb   :  { %4205 = vmatprep.subr.bf16.mxu1 %v7200_v25  ;;  %v7246_v24 = vld [vmem:[#allocation2 + $0x8c8] ss:$16 sps:$4 sm:$0xff]   ;;  %v7251_v25 = vld [vmem:[#allocation2 + $0x64c] ss:$16 sps:$4 sm:$0xff]  }
 0x1bd   :  { %4171 = vmatpush2.bf16.msra.mxu0 %v7195_v26  ;;  %v7254_v26 = vld [vmem:[#allocation2 + $0x8ac] ss:$16 sps:$4 sm:$0xff]  }
 0x1be   :  { %4206 = vmatpush2.bf16.msra.mxu1 %v7198_v27  ;;  %4172 = vmatprep.subr.bf16.mxu0 %v7203_v30  ;;  %v7249_v27 = vld [vmem:[#allocation2 + $0x648] ss:$16 sps:$4 sm:$0xff]  }
 0x1bf   :  { %4207 = vmatprep.subr.bf16.mxu1 %v7206_v28  ;;  %v7252_v30 = vld [vmem:[#allocation2 + $0x8a8] ss:$16 sps:$4 sm:$0xff]   ;;  %v7257_v28 = vld [vmem:[#allocation2 + $0x62c] ss:$16 sps:$4 sm:$0xff]  }
 0x1c1   :  { %4173 = vmatpush2.bf16.msra.mxu0 %v7201_v34  ;;  %v7260_v34 = vld [vmem:[#allocation2 + $0x88c] ss:$16 sps:$4 sm:$0xff]  }
 0x1c2   :  { %4208 = vmatpush2.bf16.msra.mxu1 %v7204_v35  ;;  %4174 = vmatprep.subr.bf16.mxu0 %v7209_v36  ;;  %v7255_v35 = vld [vmem:[#allocation2 + $0x628] ss:$16 sps:$4 sm:$0xff]   ;;  %v7263_v36 = vld [vmem:[#allocation2 + $0x60c] ss:$16 sps:$4 sm:$0xff]  }
 0x1c3   :  { %4209 = vmatprep.subr.bf16.mxu1 %v7212_v38  ;;  %v7266_v38 = vld [vmem:[#allocation2 + $0x86c] ss:$16 sps:$4 sm:$0xff]  }
 0x1c5   :  { %4175 = vmatpush2.bf16.msra.mxu0 %v7207_v43  ;;  %v7261_v43 = vld [vmem:[#allocation2 + $0x608] ss:$16 sps:$4 sm:$0xff]  }
 0x1c6   :  { %4210 = vmatpush2.bf16.msra.mxu1 %v7210_v39  ;;  %4176 = vmatprep.subr.bf16.mxu0 %v7215_v52  ;;  %v7264_v39 = vld [vmem:[#allocation2 + $0x868] ss:$16 sps:$4 sm:$0xff]   ;;  %v7272_v52 = vld [vmem:[#allocation2 + $0x84c] ss:$16 sps:$4 sm:$0xff]  }
 0x1c7   :  { %4211 = vmatprep.subr.bf16.mxu1 %v7218_v44  ;;  %v7267_v44 = vld [vmem:[#allocation2 + $0x7e8] ss:$16 sps:$4 sm:$0xff]  }
 0x1c9   :  { %4177 = vmatpush2.bf16.msra.mxu0 %v7213_v45  ;;  %v7270_v45 = vld [vmem:[#allocation2 + $0x848] ss:$16 sps:$4 sm:$0xff]  }
 0x1ca   :  { %4212 = vmatpush2.bf16.msra.mxu1 %v7216_v46  ;;  %4228 = vmatprep.subr.bf16.mxu0 %v7224_v53  ;;  %v7275_v46 = vld [vmem:[#allocation2 + $0x7cc] ss:$16 sps:$4 sm:$0xff]   ;;  %v7273_v53 = vld [vmem:[#allocation2 + $0x7c8] ss:$16 sps:$4 sm:$0xff]  }
 0x1cb   :  { %4213 = vmatprep.subr.bf16.mxu1 %v7221_v47  ;;  %v7278_v47 = vld [vmem:[#allocation2 + $0x82c] ss:$16 sps:$4 sm:$0xff]  }
 0x1cc   :  { %v3893_v60 = vpop.f32.mrf.mxu0  ;;  %4179 = vmatmul.mubr.bf16.vlgmr.msra.gmra.mxu0 %v7967_v9 }
 0x1cd   :  { %v3934_v61 = vpop.f32.mrf.mxu1  ;;  %v3894_v62 = vadd.f32 %v3893_v60, %v8077_v23  ;;  %4229 = vmatpush1.bf16.msra.mxu0 %v7222_v55  ;;  %4260 = vmatprep.mubr.bf16.mxu0 %v7979_v40  ;;  %v7248_v40 = vld [vmem:[#allocation2 + $0x8cc] ss:$16 sps:$4 sm:$0xff]  }
 0x1ce   :  { %4214 = vmatpush2.bf16.msra.mxu1 %v7219_v54  ;;  %v3895_v37 = vpop.f32.mrf.mxu0  ;;  %4230 = vmatprep.subr.bf16.mxu0 %v7230_v57  ;;  %v7276_v54 = vld [vmem:[#allocation2 + $0x828] ss:$16 sps:$4 sm:$0xff]   ;;  %v7281_v55 = vld [vmem:[#allocation2 + $0x7ac] ss:$16 sps:$4 sm:$0xff]  }
 0x1cf   :  { %v3936_v63 = vpop.f32.mrf.mxu1  ;;  %4215 = vmatprep.subr.bf16.mxu1 %v7227_v56  ;;  %v8087_v3 = vadd.f32 %v3934_v61, %v3894_v62  ;;  %v3896_v10 = vadd.f32 %v3895_v37, %v8081_v31  ;;  %v7245_v31 = vld [vmem:[#allocation2 + $0x66c] ss:$16 sps:$4 sm:$0xff]   ;;  %v7279_v57 = vld [vmem:[#allocation2 + $0x7a8] ss:$16 sps:$4 sm:$0xff]  }
 0x1d0   :  { %v3897_v12 = vpop.f32.mrf.mxu0  ;;  %v7284_v56 = vld [vmem:[#allocation2 + $0x80c] ss:$16 sps:$4 sm:$0xff]   ;;  %v7285_v61 = vld [vmem:[#allocation2 + $0x788] ss:$16 sps:$4 sm:$0xff]  }
 0x1d1   :  { %v3938_v9 = vpop.f32.mrf.mxu1  ;;  %v8091_v13 = vadd.f32 %v3936_v63, %v3896_v10  ;;  %4231 = vmatpush1.bf16.msra.mxu0 %v7228_v59  ;;  %v7287_v59 = vld [vmem:[#allocation2 + $0x78c] ss:$16 sps:$4 sm:$0xff]   ;;  %v7288_v62 = vld [vmem:[#allocation2 + $0x9e8] ss:$16 sps:$4 sm:$0xff]  }
 0x1d2   :  { %4216 = vmatpush2.bf16.msra.mxu1 %v7225_v8  ;;  %v3898_v23 = vpop.f32.mrf.mxu0  ;;  %4232 = vmatprep.subr.bf16.mxu0 %v7236_v2  ;;  %v7282_v8 = vld [vmem:[#allocation2 + $0x808] ss:$16 sps:$4 sm:$0xff]   ;;  %v7290_v60 = vld [vmem:[#allocation2 + $0x9ec] ss:$16 sps:$4 sm:$0xff]  }
 0x1d3   :  { %v3939_v14 = vpop.f32.mrf.mxu1  ;;  %4217 = vmatprep.subr.bf16.mxu1 %v7233_v0  ;;  %v7293_v37 = vld [vmem:[#allocation2 + $0x76c] ss:$16 sps:$4 sm:$0xff]   ;;  %v7291_v0 = vld [vmem:[#allocation2 + $0x768] ss:$16 sps:$4 sm:$0xff]  }
 0x1d4   :  { %v7296_v63 = vld [vmem:[#allocation2 + $0x9cc] ss:$16 sps:$4 sm:$0xff]   ;;  %v7294_v2 = vld [vmem:[#allocation2 + $0x9c8] ss:$16 sps:$4 sm:$0xff]  }
 0x1d5   :  { %4233 = vmatpush1.bf16.msra.mxu0 %v7234_v49  ;;  %v7299_v10 = vld [vmem:[#allocation2 + $0x74c] ss:$16 sps:$4 sm:$0xff]   ;;  %v7297_v49 = vld [vmem:[#allocation2 + $0x748] ss:$16 sps:$4 sm:$0xff]  }
 0x1d6   :  { %4218 = vmatpush2.bf16.msra.mxu1 %v7231_v11  ;;  %4234 = vmatprep.subr.bf16.mxu0 %v7239_v15  ;;  %v7302_v11 = vld [vmem:[#allocation2 + $0x9ac] ss:$16 sps:$4 sm:$0xff]   ;;  %v7300_v12 = vld [vmem:[#allocation2 + $0x9a8] ss:$16 sps:$4 sm:$0xff]  }
 0x1d7   :  { %4269 = vmatprep.subr.bf16.mxu1 %v7242_v17  ;;  %v7305_v9 = vld [vmem:[#allocation2 + $0x72c] ss:$16 sps:$4 sm:$0xff]   ;;  %v7303_v14 = vld [vmem:[#allocation2 + $0x728] ss:$16 sps:$4 sm:$0xff]  }
 0x1d8   :  { %v7308_v23 = vld [vmem:[#allocation2 + $0x98c] ss:$16 sps:$4 sm:$0xff]   ;;  %v7306_v15 = vld [vmem:[#allocation2 + $0x988] ss:$16 sps:$4 sm:$0xff]  }
 0x1d9   :  { %4220 = vmatmul.mubr.bf16.vlgmr.msra.gmra.mxu1 %v7989_v20  ;;  %4235 = vmatpush1.bf16.msra.mxu0 %v7237_v18  ;;  %v7258_v20 = vld [vmem:[#allocation2 + $0x888] ss:$16 sps:$4 sm:$0xff]   ;;  %v7311_v17 = vld [vmem:[#allocation2 + $0x70c] ss:$16 sps:$4 sm:$0xff]  }
 0x1da   :  { %4270 = vmatpush1.bf16.msra.mxu1 %v7240_v19  ;;  %4236 = vmatprep.subr.bf16.mxu0 %v7245_v31  ;;  %v7314_v18 = vld [vmem:[#allocation2 + $0x96c] ss:$16 sps:$4 sm:$0xff]   ;;  %v7309_v19 = vld [vmem:[#allocation2 + $0x708] ss:$16 sps:$4 sm:$0xff]  }
 0x1db   :  { %4271 = vmatprep.subr.bf16.mxu1 %v7248_v40  ;;  %4301 = vmatprep.mubr.bf16.mxu1 %v7998_v29  ;;  %v7269_v29 = vld [vmem:[#allocation2 + $0x7ec] ss:$16 sps:$4 sm:$0xff]   ;;  %v7312_v31 = vld [vmem:[#allocation2 + $0x968] ss:$16 sps:$4 sm:$0xff]  }
 0x1dc   :  { %v7317_v40 = vld [vmem:[#allocation2 + $0x94c] ss:$16 sps:$4 sm:$0xff]  }
 0x1dd   :  { %4237 = vmatpush1.bf16.msra.mxu0 %v7243_v22  ;;  %v7320_v22 = vld [vmem:[#allocation2 + $0xaec] ss:$16 sps:$4 sm:$0xff]  }
 0x1de   :  { %4272 = vmatpush1.bf16.msra.mxu1 %v7246_v24  ;;  %4238 = vmatprep.subr.bf16.mxu0 %v7251_v25  ;;  %v7315_v24 = vld [vmem:[#allocation2 + $0x948] ss:$16 sps:$4 sm:$0xff]  }
 0x1df   :  { %4273 = vmatprep.subr.bf16.mxu1 %v7254_v26  ;;  %v7318_v25 = vld [vmem:[#allocation2 + $0xae8] ss:$16 sps:$4 sm:$0xff]   ;;  %v7323_v26 = vld [vmem:[#allocation2 + $0x92c] ss:$16 sps:$4 sm:$0xff]  }
 0x1e1   :  { %4239 = vmatpush1.bf16.msra.mxu0 %v7249_v27  ;;  %v7326_v27 = vld [vmem:[#allocation2 + $0xacc] ss:$16 sps:$4 sm:$0xff]  }
 0x1e2   :  { %4274 = vmatpush1.bf16.msra.mxu1 %v7252_v30  ;;  %4240 = vmatprep.subr.bf16.mxu0 %v7257_v28  ;;  %v7321_v30 = vld [vmem:[#allocation2 + $0x928] ss:$16 sps:$4 sm:$0xff]  }
 0x1e3   :  { %4275 = vmatprep.subr.bf16.mxu1 %v7260_v34  ;;  %v7324_v28 = vld [vmem:[#allocation2 + $0xac8] ss:$16 sps:$4 sm:$0xff]  }
 0x1e5   :  { %4241 = vmatpush1.bf16.msra.mxu0 %v7255_v35 }
 0x1e6   :  { %4276 = vmatpush1.bf16.msra.mxu1 %v7258_v20  ;;  %4242 = vmatprep.subr.bf16.mxu0 %v7263_v36 }
 0x1e7   :  { %4277 = vmatprep.subr.bf16.mxu1 %v7266_v38 }
 0x1e9   :  { %4243 = vmatpush1.bf16.msra.mxu0 %v7261_v43  ;;  %v7329_v43 = vld [vmem:[#allocation2 + $0x90c] ss:$16 sps:$4 sm:$0xff]  }
 0x1ea   :  { %4278 = vmatpush1.bf16.msra.mxu1 %v7264_v39  ;;  %4244 = vmatprep.subr.bf16.mxu0 %v7269_v29  ;;  %v7332_v39 = vld [vmem:[#allocation2 + $0xaac] ss:$16 sps:$4 sm:$0xff]  }
 0x1eb   :  { %4279 = vmatprep.subr.bf16.mxu1 %v7272_v52 }
 0x1ed   :  { %4245 = vmatpush2.bf16.msra.mxu0 %v7267_v44  ;;  %v7327_v44 = vld [vmem:[#allocation2 + $0x908] ss:$16 sps:$4 sm:$0xff]  }
 0x1ee   :  { %4280 = vmatpush1.bf16.msra.mxu1 %v7270_v45  ;;  %4246 = vmatprep.subr.bf16.mxu0 %v7275_v46  ;;  %v7330_v45 = vld [vmem:[#allocation2 + $0xaa8] ss:$16 sps:$4 sm:$0xff]  }
 0x1ef   :  { %4281 = vmatprep.subr.bf16.mxu1 %v7278_v47 }
 0x1f1   :  { %4247 = vmatpush2.bf16.msra.mxu0 %v7273_v53 }
 0x1f2   :  { %4282 = vmatpush1.bf16.msra.mxu1 %v7276_v54  ;;  %4248 = vmatprep.subr.bf16.mxu0 %v7281_v55  ;;  %v7335_v54 = vld [vmem:[#allocation2 + $0xa8c] ss:$16 sps:$4 sm:$0xff]  }
 0x1f3   :  { %4283 = vmatprep.subr.bf16.mxu1 %v7284_v56  ;;  %v7338_v55 = vld [vmem:[#allocation2 + $0xcec] ss:$16 sps:$4 sm:$0xff]   ;;  %v7333_v56 = vld [vmem:[#allocation2 + $0xa88] ss:$16 sps:$4 sm:$0xff]  }
 0x1f5   :  { %4249 = vmatpush2.bf16.msra.mxu0 %v7279_v57  ;;  %v7336_v57 = vld [vmem:[#allocation2 + $0xce8] ss:$16 sps:$4 sm:$0xff]  }
 0x1f6   :  { %4284 = vmatpush1.bf16.msra.mxu1 %v7282_v8  ;;  %4250 = vmatprep.subr.bf16.mxu0 %v7287_v59  ;;  %v7341_v8 = vld [vmem:[#allocation2 + $0xa6c] ss:$16 sps:$4 sm:$0xff]   ;;  %v7339_v59 = vld [vmem:[#allocation2 + $0xa68] ss:$16 sps:$4 sm:$0xff]  }
 0x1f7   :  { %4285 = vmatprep.subr.bf16.mxu1 %v7290_v60  ;;  %v7342_v60 = vld [vmem:[#allocation2 + $0xcc8] ss:$16 sps:$4 sm:$0xff]  }
 0x1f9   :  { %4251 = vmatpush2.bf16.msra.mxu0 %v7285_v61 }
 0x1fa   :  { %4286 = vmatpush2.bf16.msra.mxu1 %v7288_v62  ;;  %4252 = vmatprep.subr.bf16.mxu0 %v7293_v37  ;;  %v7347_v62 = vld [vmem:[#allocation2 + $0xa4c] ss:$16 sps:$4 sm:$0xff]  }
 0x1fb   :  { %4287 = vmatprep.subr.bf16.mxu1 %v7296_v63  ;;  %v7350_v37 = vld [vmem:[#allocation2 + $0xcac] ss:$16 sps:$4 sm:$0xff]  }
 0x1fd   :  { %4253 = vmatpush2.bf16.msra.mxu0 %v7291_v0  ;;  %v7345_v0 = vld [vmem:[#allocation2 + $0xa48] ss:$16 sps:$4 sm:$0xff]  }
 0x1fe   :  { %4288 = vmatpush2.bf16.msra.mxu1 %v7294_v2  ;;  %4254 = vmatprep.subr.bf16.mxu0 %v7299_v10  ;;  %v7348_v2 = vld [vmem:[#allocation2 + $0xca8] ss:$16 sps:$4 sm:$0xff]  }
 0x1ff   :  { %4289 = vmatprep.subr.bf16.mxu1 %v7302_v11  ;;  %v7356_v11 = vld [vmem:[#allocation2 + $0xc8c] ss:$16 sps:$4 sm:$0xff]  }
 0x201   :  { %4255 = vmatpush2.bf16.msra.mxu0 %v7297_v49  ;;  %v7351_v49 = vld [vmem:[#allocation2 + $0xa28] ss:$16 sps:$4 sm:$0xff]  }
 0x202   :  { %4290 = vmatpush2.bf16.msra.mxu1 %v7300_v12  ;;  %4256 = vmatprep.subr.bf16.mxu0 %v7305_v9  ;;  %v7354_v12 = vld [vmem:[#allocation2 + $0xc88] ss:$16 sps:$4 sm:$0xff]   ;;  %v7359_v9 = vld [vmem:[#allocation2 + $0xa0c] ss:$16 sps:$4 sm:$0xff]  }
 0x203   :  { %4291 = vmatprep.subr.bf16.mxu1 %v7308_v23  ;;  %v7362_v23 = vld [vmem:[#allocation2 + $0xc6c] ss:$16 sps:$4 sm:$0xff]  }
 0x205   :  { %4257 = vmatpush2.bf16.msra.mxu0 %v7303_v14  ;;  %v7360_v14 = vld [vmem:[#allocation2 + $0xc68] ss:$16 sps:$4 sm:$0xff]  }
 0x206   :  { %4292 = vmatpush2.bf16.msra.mxu1 %v7306_v15  ;;  %4258 = vmatprep.subr.bf16.mxu0 %v7311_v17  ;;  %v7365_v15 = vld [vmem:[#allocation2 + $0xbec] ss:$16 sps:$4 sm:$0xff]  }
 0x207   :  { %4293 = vmatprep.subr.bf16.mxu1 %v7314_v18  ;;  %v7368_v17 = vld [vmem:[#allocation2 + $0xc4c] ss:$16 sps:$4 sm:$0xff]   ;;  %v7363_v18 = vld [vmem:[#allocation2 + $0xbe8] ss:$16 sps:$4 sm:$0xff]  }
 0x209   :  { %4259 = vmatpush2.bf16.msra.mxu0 %v7309_v19  ;;  %v7366_v19 = vld [vmem:[#allocation2 + $0xc48] ss:$16 sps:$4 sm:$0xff]  }
 0x20a   :  { %4294 = vmatpush2.bf16.msra.mxu1 %v7312_v31  ;;  %4310 = vmatprep.subr.bf16.mxu0 %v7320_v22  ;;  %v7371_v31 = vld [vmem:[#allocation2 + $0xbcc] ss:$16 sps:$4 sm:$0xff]   ;;  %v7369_v22 = vld [vmem:[#allocation2 + $0xbc8] ss:$16 sps:$4 sm:$0xff]  }
 0x20b   :  { %4295 = vmatprep.subr.bf16.mxu1 %v7317_v40  ;;  %v7374_v40 = vld [vmem:[#allocation2 + $0xc2c] ss:$16 sps:$4 sm:$0xff]  }
 0x20c   :  { %v3975_v34 = vpop.f32.mrf.mxu0  ;;  %4261 = vmatmul.mubr.bf16.vlgmr.msra.gmra.mxu0 %v7991_v21 }
 0x20d   :  { %v4016_v35 = vpop.f32.mrf.mxu1  ;;  %v3976_v20 = vadd.f32 %v3975_v34, %v8087_v3  ;;  %4311 = vmatpush1.bf16.msra.mxu0 %v7318_v25  ;;  %4342 = vmatprep.mubr.bf16.mxu0 %v8003_v32  ;;  %v7344_v32 = vld [vmem:[#allocation2 + $0xccc] ss:$16 sps:$4 sm:$0xff]  }
 0x20e   :  { %4296 = vmatpush2.bf16.msra.mxu1 %v7315_v24  ;;  %v3977_v36 = vpop.f32.mrf.mxu0  ;;  %4312 = vmatprep.subr.bf16.mxu0 %v7326_v27  ;;  %v7372_v24 = vld [vmem:[#allocation2 + $0xc28] ss:$16 sps:$4 sm:$0xff]   ;;  %v7377_v25 = vld [vmem:[#allocation2 + $0xbac] ss:$16 sps:$4 sm:$0xff]  }
 0x20f   :  { %v4018_v38 = vpop.f32.mrf.mxu1  ;;  %4297 = vmatprep.subr.bf16.mxu1 %v7323_v26  ;;  %v8097_v29 = vadd.f32 %v4016_v35, %v3976_v20  ;;  %v3978_v52 = vadd.f32 %v3977_v36, %v8091_v13  ;;  %v7380_v26 = vld [vmem:[#allocation2 + $0xc0c] ss:$16 sps:$4 sm:$0xff]   ;;  %v7375_v27 = vld [vmem:[#allocation2 + $0xba8] ss:$16 sps:$4 sm:$0xff]  }
 0x210   :  { %v3979_v46 = vpop.f32.mrf.mxu0  ;;  %v7386_v34 = vld [vmem:[#allocation2 + $0xdec] ss:$16 sps:$4 sm:$0xff]   ;;  %v7381_v35 = vld [vmem:[#allocation2 + $0xb88] ss:$16 sps:$4 sm:$0xff]  }
 0x211   :  { %v4020_v21 = vpop.f32.mrf.mxu1  ;;  %v8101_v47 = vadd.f32 %v4018_v38, %v3978_v52  ;;  %4313 = vmatpush1.bf16.msra.mxu0 %v7324_v28  ;;  %v7383_v28 = vld [vmem:[#allocation2 + $0xb8c] ss:$16 sps:$4 sm:$0xff]   ;;  %v7384_v20 = vld [vmem:[#allocation2 + $0xde8] ss:$16 sps:$4 sm:$0xff]  }
 0x212   :  { %4298 = vmatpush2.bf16.msra.mxu1 %v7321_v30  ;;  %v3980_v3 = vpop.f32.mrf.mxu0  ;;  %4314 = vmatprep.subr.bf16.mxu0 %v7332_v39  ;;  %v7378_v30 = vld [vmem:[#allocation2 + $0xc08] ss:$16 sps:$4 sm:$0xff]   ;;  %v7389_v36 = vld [vmem:[#allocation2 + $0xb6c] ss:$16 sps:$4 sm:$0xff]  }
 0x213   :  { %v4021_v53 = vpop.f32.mrf.mxu1  ;;  %4299 = vmatprep.subr.bf16.mxu1 %v7329_v43  ;;  %v7392_v38 = vld [vmem:[#allocation2 + $0xdcc] ss:$16 sps:$4 sm:$0xff]   ;;  %v7387_v43 = vld [vmem:[#allocation2 + $0xb68] ss:$16 sps:$4 sm:$0xff]  }
 0x214   :  { %v7390_v39 = vld [vmem:[#allocation2 + $0xdc8] ss:$16 sps:$4 sm:$0xff]   ;;  %v7395_v52 = vld [vmem:[#allocation2 + $0xb4c] ss:$16 sps:$4 sm:$0xff]  }
 0x215   :  { %4315 = vmatpush1.bf16.msra.mxu0 %v7330_v45  ;;  %v7393_v45 = vld [vmem:[#allocation2 + $0xb48] ss:$16 sps:$4 sm:$0xff]   ;;  %v7401_v21 = vld [vmem:[#allocation2 + $0xb2c] ss:$16 sps:$4 sm:$0xff]  }
 0x216   :  { %4300 = vmatpush2.bf16.msra.mxu1 %v7327_v44  ;;  %4316 = vmatprep.subr.bf16.mxu0 %v7335_v54  ;;  %v7398_v44 = vld [vmem:[#allocation2 + $0xdac] ss:$16 sps:$4 sm:$0xff]   ;;  %v7396_v46 = vld [vmem:[#allocation2 + $0xda8] ss:$16 sps:$4 sm:$0xff]  }
 0x217   :  { %4351 = vmatprep.subr.bf16.mxu1 %v7338_v55  ;;  %v7404_v3 = vld [vmem:[#allocation2 + $0xd8c] ss:$16 sps:$4 sm:$0xff]   ;;  %v7399_v53 = vld [vmem:[#allocation2 + $0xb28] ss:$16 sps:$4 sm:$0xff]  }
 0x218   :  { %v7402_v54 = vld [vmem:[#allocation2 + $0xd88] ss:$16 sps:$4 sm:$0xff]   ;;  %v7407_v55 = vld [vmem:[#allocation2 + $0xb0c] ss:$16 sps:$4 sm:$0xff]  }
 0x219   :  { %v8103_v13 = vpop.f32.mrf.mxu1  ;;  %4302 = vmatmul.mubr.bf16.vlgmr.msra.gmra.mxu1 %v8016_v41  ;;  %4317 = vmatpush1.bf16.msra.mxu0 %v7333_v56  ;;  %v7353_v41 = vld [vmem:[#allocation2 + $0xa2c] ss:$16 sps:$4 sm:$0xff]  }
 0x21a   :  { %4352 = vmatpush1.bf16.msra.mxu1 %v7336_v57  ;;  %4318 = vmatprep.subr.bf16.mxu0 %v7341_v8  ;;  %v7410_v56 = vld [vmem:[#allocation2 + $0xd6c] ss:$16 sps:$4 sm:$0xff]   ;;  %v7405_v57 = vld [vmem:[#allocation2 + $0xb08] ss:$16 sps:$4 sm:$0xff]  }
 0x21b   :  { %v8106_v61 = vpop.f32.mrf.mxu1  ;;  %4353 = vmatprep.subr.bf16.mxu1 %v7344_v32  ;;  %4383 = vmatprep.mubr.bf16.mxu1 %v8023_v48  ;;  %v7357_v48 = vld [vmem:[#allocation2 + $0xa08] ss:$16 sps:$4 sm:$0xff]   ;;  %v7413_v32 = vld [vmem:[#allocation2 + $0xd4c] ss:$16 sps:$4 sm:$0xff]  }
 0x21c   :  { %v7408_v8 = vld [vmem:[#allocation2 + $0xd68] ss:$16 sps:$4 sm:$0xff]  }
 0x21d   :  { %v4102_v63 = vpop.f32.mrf.mxu1  ;;  %4319 = vmatpush1.bf16.msra.mxu0 %v7339_v59  ;;  %v7416_v59 = vld [vmem:[#allocation2 + $0xeec] ss:$16 sps:$4 sm:$0xff]  }
 0x21e   :  { %4354 = vmatpush1.bf16.msra.mxu1 %v7342_v60  ;;  %4320 = vmatprep.subr.bf16.mxu0 %v7347_v62  ;;  %v7411_v60 = vld [vmem:[#allocation2 + $0xd48] ss:$16 sps:$4 sm:$0xff]   ;;  %v7422_v63 = vld [vmem:[#allocation2 + $0xecc] ss:$16 sps:$4 sm:$0xff]  }
 0x21f   :  { %v4103_v10 = vpop.f32.mrf.mxu1  ;;  %4355 = vmatprep.subr.bf16.mxu1 %v7350_v37  ;;  %v7414_v62 = vld [vmem:[#allocation2 + $0xee8] ss:$16 sps:$4 sm:$0xff]   ;;  %v7419_v37 = vld [vmem:[#allocation2 + $0xd2c] ss:$16 sps:$4 sm:$0xff]  }
 0x220   :  { %v7417_v10 = vld [vmem:[#allocation2 + $0xd28] ss:$16 sps:$4 sm:$0xff]  }
 0x221   :  { %4321 = vmatpush1.bf16.msra.mxu0 %v7345_v0 }
 0x222   :  { %4356 = vmatpush1.bf16.msra.mxu1 %v7348_v2  ;;  %4322 = vmatprep.subr.bf16.mxu0 %v7353_v41  ;;  %v7420_v41 = vld [vmem:[#allocation2 + $0xec8] ss:$16 sps:$4 sm:$0xff]  }
 0x223   :  { %4357 = vmatprep.subr.bf16.mxu1 %v7356_v11 }
 0x225   :  { %4323 = vmatpush1.bf16.msra.mxu0 %v7351_v49  ;;  %v7425_v49 = vld [vmem:[#allocation2 + $0xd0c] ss:$16 sps:$4 sm:$0xff]  }
 0x226   :  { %4358 = vmatpush1.bf16.msra.mxu1 %v7354_v12  ;;  %4324 = vmatprep.subr.bf16.mxu0 %v7359_v9  ;;  %v7428_v12 = vld [vmem:[#allocation2 + $0xeac] ss:$16 sps:$4 sm:$0xff]  }
 0x227   :  { %4359 = vmatprep.subr.bf16.mxu1 %v7362_v23 }
 0x229   :  { %4325 = vmatpush1.bf16.msra.mxu0 %v7357_v48 }
 0x22a   :  { %4360 = vmatpush1.bf16.msra.mxu1 %v7360_v14  ;;  %4326 = vmatprep.subr.bf16.mxu0 %v7365_v15  ;;  %v7426_v14 = vld [vmem:[#allocation2 + $0xea8] ss:$16 sps:$4 sm:$0xff]  }
 0x22b   :  { %4361 = vmatprep.subr.bf16.mxu1 %v7368_v17  ;;  %v7431_v17 = vld [vmem:[#allocation2 + $0xe8c] ss:$16 sps:$4 sm:$0xff]  }
 0x22d   :  { %4327 = vmatpush2.bf16.msra.mxu0 %v7363_v18  ;;  %v7434_v18 = vld [vmem:[#allocation2 + $0x10ec] ss:$16 sps:$4 sm:$0xff]  }
 0x22e   :  { %4362 = vmatpush1.bf16.msra.mxu1 %v7366_v19  ;;  %4328 = vmatprep.subr.bf16.mxu0 %v7371_v31  ;;  %v7432_v19 = vld [vmem:[#allocation2 + $0x10e8] ss:$16 sps:$4 sm:$0xff]  }
 0x22f   :  { %4363 = vmatprep.subr.bf16.mxu1 %v7374_v40  ;;  %v7438_v40 = vld [vmem:[#allocation2 + $0x10c8] ss:$16 sps:$4 sm:$0xff]  }
 0x231   :  { %4329 = vmatpush2.bf16.msra.mxu0 %v7369_v22 }
 0x232   :  { %4364 = vmatpush1.bf16.msra.mxu1 %v7372_v24  ;;  %4330 = vmatprep.subr.bf16.mxu0 %v7377_v25  ;;  %v7443_v24 = vld [vmem:[#allocation2 + $0xe4c] ss:$16 sps:$4 sm:$0xff]  }
 0x233   :  { %4365 = vmatprep.subr.bf16.mxu1 %v7380_v26  ;;  %v7446_v25 = vld [vmem:[#allocation2 + $0x10ac] ss:$16 sps:$4 sm:$0xff]  }
 0x235   :  { %4331 = vmatpush2.bf16.msra.mxu0 %v7375_v27  ;;  %v7441_v27 = vld [vmem:[#allocation2 + $0xe48] ss:$16 sps:$4 sm:$0xff]  }
 0x236   :  { %4366 = vmatpush1.bf16.msra.mxu1 %v7378_v30  ;;  %4332 = vmatprep.subr.bf16.mxu0 %v7383_v28  ;;  %v7444_v30 = vld [vmem:[#allocation2 + $0x10a8] ss:$16 sps:$4 sm:$0xff]  }
 0x237   :  { %4367 = vmatprep.subr.bf16.mxu1 %v7386_v34  ;;  %v7452_v34 = vld [vmem:[#allocation2 + $0x108c] ss:$16 sps:$4 sm:$0xff]  }
 0x239   :  { %4333 = vmatpush2.bf16.msra.mxu0 %v7381_v35  ;;  %v7447_v35 = vld [vmem:[#allocation2 + $0xe28] ss:$16 sps:$4 sm:$0xff]  }
 0x23a   :  { %4368 = vmatpush2.bf16.msra.mxu1 %v7384_v20  ;;  %4334 = vmatprep.subr.bf16.mxu0 %v7389_v36  ;;  %v7450_v20 = vld [vmem:[#allocation2 + $0x1088] ss:$16 sps:$4 sm:$0xff]   ;;  %v7455_v36 = vld [vmem:[#allocation2 + $0xe0c] ss:$16 sps:$4 sm:$0xff]  }
 0x23b   :  { %4369 = vmatprep.subr.bf16.mxu1 %v7392_v38  ;;  %v7458_v38 = vld [vmem:[#allocation2 + $0x106c] ss:$16 sps:$4 sm:$0xff]  }
 0x23d   :  { %4335 = vmatpush2.bf16.msra.mxu0 %v7387_v43  ;;  %v7456_v43 = vld [vmem:[#allocation2 + $0x1068] ss:$16 sps:$4 sm:$0xff]  }
 0x23e   :  { %4370 = vmatpush2.bf16.msra.mxu1 %v7390_v39  ;;  %4336 = vmatprep.subr.bf16.mxu0 %v7395_v52  ;;  %v7461_v39 = vld [vmem:[#allocation2 + $0xfec] ss:$16 sps:$4 sm:$0xff]  }
 0x23f   :  { %4371 = vmatprep.subr.bf16.mxu1 %v7398_v44  ;;  %v7464_v52 = vld [vmem:[#allocation2 + $0x104c] ss:$16 sps:$4 sm:$0xff]   ;;  %v7459_v44 = vld [vmem:[#allocation2 + $0xfe8] ss:$16 sps:$4 sm:$0xff]  }
 0x241   :  { %4337 = vmatpush2.bf16.msra.mxu0 %v7393_v45  ;;  %v7462_v45 = vld [vmem:[#allocation2 + $0x1048] ss:$16 sps:$4 sm:$0xff]  }
 0x242   :  { %4372 = vmatpush2.bf16.msra.mxu1 %v7396_v46  ;;  %4338 = vmatprep.subr.bf16.mxu0 %v7401_v21  ;;  %v7467_v46 = vld [vmem:[#allocation2 + $0xfcc] ss:$16 sps:$4 sm:$0xff]  }
 0x243   :  { %4373 = vmatprep.subr.bf16.mxu1 %v7404_v3  ;;  %v7470_v21 = vld [vmem:[#allocation2 + $0x102c] ss:$16 sps:$4 sm:$0xff]   ;;  %v7465_v3 = vld [vmem:[#allocation2 + $0xfc8] ss:$16 sps:$4 sm:$0xff]  }
 0x245   :  { %4339 = vmatpush2.bf16.msra.mxu0 %v7399_v53  ;;  %v7468_v53 = vld [vmem:[#allocation2 + $0x1028] ss:$16 sps:$4 sm:$0xff]  }
 0x246   :  { %4374 = vmatpush2.bf16.msra.mxu1 %v7402_v54  ;;  %4340 = vmatprep.subr.bf16.mxu0 %v7407_v55  ;;  %v7473_v54 = vld [vmem:[#allocation2 + $0xfac] ss:$16 sps:$4 sm:$0xff]  }
 0x247   :  { %4375 = vmatprep.subr.bf16.mxu1 %v7410_v56  ;;  %v7476_v55 = vld [vmem:[#allocation2 + $0x100c] ss:$16 sps:$4 sm:$0xff]   ;;  %v7471_v56 = vld [vmem:[#allocation2 + $0xfa8] ss:$16 sps:$4 sm:$0xff]  }
 0x249   :  { %4341 = vmatpush2.bf16.msra.mxu0 %v7405_v57  ;;  %v7474_v57 = vld [vmem:[#allocation2 + $0x1008] ss:$16 sps:$4 sm:$0xff]  }
 0x24a   :  { %4376 = vmatpush2.bf16.msra.mxu1 %v7408_v8  ;;  %4392 = vmatprep.subr.bf16.mxu0 %v7416_v59  ;;  %v7479_v8 = vld [vmem:[#allocation2 + $0xf8c] ss:$16 sps:$4 sm:$0xff]   ;;  %v7477_v59 = vld [vmem:[#allocation2 + $0xf88] ss:$16 sps:$4 sm:$0xff]  }
 0x24b   :  { %4377 = vmatprep.subr.bf16.mxu1 %v7413_v32  ;;  %v7482_v32 = vld [vmem:[#allocation2 + $0x11ec] ss:$16 sps:$4 sm:$0xff]  }
 0x24c   :  { %v4057_v0 = vpop.f32.mrf.mxu0  ;;  %4343 = vmatmul.mubr.bf16.vlgmr.msra.gmra.mxu0 %v8018_v42 }
 0x24d   :  { %v4058_v2 = vadd.f32 %v4057_v0, %v8097_v29  ;;  %4393 = vmatpush1.bf16.msra.mxu0 %v7414_v62  ;;  %4424 = vmatprep.mubr.bf16.mxu0 %v8025_v50  ;;  %v7423_v29 = vld [vmem:[#allocation2 + $0xd08] ss:$16 sps:$4 sm:$0xff]   ;;  %v7437_v50 = vld [vmem:[#allocation2 + $0xe6c] ss:$16 sps:$4 sm:$0xff]  }
 0x24e   :  { %4378 = vmatpush2.bf16.msra.mxu1 %v7411_v60  ;;  %v4059_v11 = vpop.f32.mrf.mxu0  ;;  %4394 = vmatprep.subr.bf16.mxu0 %v7422_v63  ;;  %v7480_v60 = vld [vmem:[#allocation2 + $0x11e8] ss:$16 sps:$4 sm:$0xff]   ;;  %v7485_v62 = vld [vmem:[#allocation2 + $0xf6c] ss:$16 sps:$4 sm:$0xff]  }
 0x24f   :  { %4379 = vmatprep.subr.bf16.mxu1 %v7419_v37  ;;  %v8112_v9 = vadd.f32 %v8103_v13, %v4058_v2  ;;  %v4060_v23 = vadd.f32 %v4059_v11, %v8101_v47  ;;  %v7429_v13 = vld [vmem:[#allocation2 + $0xe88] ss:$16 sps:$4 sm:$0xff]   ;;  %v7440_v47 = vld [vmem:[#allocation2 + $0x10cc] ss:$16 sps:$4 sm:$0xff]  }
 0x250   :  { %v4061_v48 = vpop.f32.mrf.mxu0  ;;  %v7488_v37 = vld [vmem:[#allocation2 + $0x11cc] ss:$16 sps:$4 sm:$0xff]   ;;  %v7483_v63 = vld [vmem:[#allocation2 + $0xf68] ss:$16 sps:$4 sm:$0xff]  }
 0x251   :  { %v8117_v42 = vadd.f32 %v8106_v61, %v4060_v23  ;;  %4395 = vmatpush1.bf16.msra.mxu0 %v7420_v41  ;;  %v7435_v61 = vld [vmem:[#allocation2 + $0xe68] ss:$16 sps:$4 sm:$0xff]   ;;  %v7491_v2 = vld [vmem:[#allocation2 + $0xf4c] ss:$16 sps:$4 sm:$0xff]  }
 0x252   :  { %4380 = vmatpush2.bf16.msra.mxu1 %v7417_v10  ;;  %v4062_v15 = vpop.f32.mrf.mxu0  ;;  %4396 = vmatprep.subr.bf16.mxu0 %v7428_v12  ;;  %v7486_v0 = vld [vmem:[#allocation2 + $0x11c8] ss:$16 sps:$4 sm:$0xff]   ;;  %v7494_v10 = vld [vmem:[#allocation2 + $0x11ac] ss:$16 sps:$4 sm:$0xff]  }
 0x253   :  { %4381 = vmatprep.subr.bf16.mxu1 %v7425_v49  ;;  %v7489_v41 = vld [vmem:[#allocation2 + $0xf48] ss:$16 sps:$4 sm:$0xff]   ;;  %v7497_v49 = vld [vmem:[#allocation2 + $0xf2c] ss:$16 sps:$4 sm:$0xff]   ;;  %v741_v15 = vsub.s32 2, %v8031_v58 }
 0x254   :  { %v7492_v11 = vld [vmem:[#allocation2 + $0x11a8] ss:$16 sps:$4 sm:$0xff]   ;;  %v7500_v12 = vld [vmem:[#allocation2 + $0x118c] ss:$16 sps:$4 sm:$0xff]  }
 0x255   :  { %4397 = vmatpush1.bf16.msra.mxu0 %v7426_v14  ;;  %v7495_v23 = vld [vmem:[#allocation2 + $0xf28] ss:$16 sps:$4 sm:$0xff]   ;;  %v7506_v14 = vld [vmem:[#allocation2 + $0x116c] ss:$16 sps:$4 sm:$0xff]  }
 0x256   :  { %4382 = vmatpush2.bf16.msra.mxu1 %v7423_v29  ;;  %4398 = vmatprep.subr.bf16.mxu0 %v7431_v17  ;;  %v7498_v48 = vld [vmem:[#allocation2 + $0x1188] ss:$16 sps:$4 sm:$0xff]   ;;  %v7503_v29 = vld [vmem:[#allocation2 + $0xf0c] ss:$16 sps:$4 sm:$0xff]   ;;  %v745_v17 = vsub.s32 3, %v8031_v58 }
 0x257   :  { %4433 = vmatprep.subr.bf16.mxu1 %v7434_v18  ;;  %v7501_v18 = vld [vmem:[#allocation2 + $0xf08] ss:$16 sps:$4 sm:$0xff]  }
 0x259   :  { %v8119_v31 = vpop.f32.mrf.mxu1  ;;  %4384 = vmatmul.mubr.bf16.vlgmr.msra.gmra.mxu1 %v8041_v6  ;;  %4399 = vmatpush1.bf16.msra.mxu0 %v7429_v13  ;;  %v7449_v6 = vld [vmem:[#allocation2 + $0xe2c] ss:$16 sps:$4 sm:$0xff]   ;;  %v7504_v13 = vld [vmem:[#allocation2 + $0x1168] ss:$16 sps:$4 sm:$0xff]  }
 0x25a   :  { %4434 = vmatpush1.bf16.msra.mxu1 %v7432_v19  ;;  %4400 = vmatprep.subr.bf16.mxu0 %v7437_v50  ;;  %v7509_v19 = vld [vmem:[#allocation2 + $0x114c] ss:$16 sps:$4 sm:$0xff]  }
 0x25b   :  { %v8122_v22 = vpop.f32.mrf.mxu1  ;;  %4435 = vmatprep.subr.bf16.mxu1 %v7440_v47  ;;  %4465 = vmatprep.mubr.bf16.mxu1 %v8052_v16  ;;  %v7453_v16 = vld [vmem:[#allocation2 + $0xe08] ss:$16 sps:$4 sm:$0xff]   ;;  %v7512_v50 = vld [vmem:[#allocation2 + $0x124c] ss:$16 sps:$4 sm:$0xff]   ;;  %v7749_v47 = vld [vmem:[#allocation4] sm:$0xf] }
 0x25d   :  { %v4143_v26 = vpop.f32.mrf.mxu1  ;;  %4401 = vmatpush1.bf16.msra.mxu0 %v7435_v61  ;;  %v742_v61 = vrot.slane %v7749_v47, %v741_v15 }
 0x25e   :  { %4436 = vmatpush1.bf16.msra.mxu1 %v7438_v40  ;;  %4402 = vmatprep.subr.bf16.mxu0 %v7443_v24  ;;  %v746_v40 = vrot.slane %v7749_v47, %v745_v17  ;;  %v7507_v24 = vld [vmem:[#allocation2 + $0x1148] ss:$16 sps:$4 sm:$0xff]   ;;  %v7515_v26 = vld [vmem:[#allocation2 + $0x112c] ss:$16 sps:$4 sm:$0xff]  }
 0x25f   :  { %v4144_v28 = vpop.f32.mrf.mxu1  ;;  %4437 = vmatprep.subr.bf16.mxu1 %v7446_v25  ;;  %v7510_v25 = vld [vmem:[#allocation2 + $0x1248] ss:$16 sps:$4 sm:$0xff]  }
 0x260   :  { %v7641_v47 = vld [vmem:[#allocation6 + $0x224] ss:$16 sps:$4 sm:$0xff]  }
 0x261   :  { %4403 = vmatpush1.bf16.msra.mxu0 %v7441_v27  ;;  %v7518_v27 = vld [vmem:[#allocation2 + $0x122c] ss:$16 sps:$4 sm:$0xff]  }
 0x262   :  { %4438 = vmatpush1.bf16.msra.mxu1 %v7444_v30  ;;  %4404 = vmatprep.subr.bf16.mxu0 %v7449_v6  ;;  %v4140_v30 = vadd.f32 %v8119_v31, %v742_v61  ;;  %v4142_v6 = vadd.f32 %v8122_v22, %v746_v40  ;;  %v7519_v31 = vld [vmem:[#allocation2 + $0x1108] ss:$16 sps:$4 sm:$0xff]   ;;  %v7549_v61 = vld [vmem:[#allocation6 + $0x1e0] ss:$16 sps:$4 sm:$0xff]  }
 0x263   :  { %4439 = vmatprep.subr.bf16.mxu1 %v7452_v34  ;;  %v7527_v22 = vld [vmem:[#allocation6 + $0xe4] ss:$16 sps:$4 sm:$0xff]   ;;  %v7639_v40 = vld [vmem:[#allocation6 + $0x220] ss:$16 sps:$4 sm:$0xff]  }
 0x265   :  { %4405 = vmatpush1.bf16.msra.mxu0 %v7447_v35  ;;  %v7513_v35 = vld [vmem:[#allocation2 + $0x1128] ss:$16 sps:$4 sm:$0xff]  }
 0x266   :  { %4440 = vmatpush1.bf16.msra.mxu1 %v7450_v20  ;;  %4406 = vmatprep.subr.bf16.mxu0 %v7455_v36  ;;  %v7516_v20 = vld [vmem:[#allocation2 + $0x1228] ss:$16 sps:$4 sm:$0xff]  }
 0x267   :  { %4441 = vmatprep.subr.bf16.mxu1 %v7458_v38  ;;  %v7521_v38 = vld [vmem:[#allocation2 + $0x110c] ss:$16 sps:$4 sm:$0xff]  }
 0x269   :  { %4407 = vmatpush1.bf16.msra.mxu0 %v7453_v16  ;;  %v7524_v16 = vld [vmem:[#allocation2 + $0x120c] ss:$16 sps:$4 sm:$0xff]  }
 0x26a   :  { %4442 = vmatpush1.bf16.msra.mxu1 %v7456_v43  ;;  %4408 = vmatprep.subr.bf16.mxu0 %v7461_v39 }
 0x26b   :  { %4443 = vmatprep.subr.bf16.mxu1 %v7464_v52 }
 0x26d   :  { %4409 = vmatpush2.bf16.msra.mxu0 %v7459_v44  ;;  %v4516_v44 = vmax.f32 %v8117_v42, 0.0 }
 0x26e   :  { %4444 = vmatpush1.bf16.msra.mxu1 %v7462_v45  ;;  %4410 = vmatprep.subr.bf16.mxu0 %v7467_v46  ;;  %v7525_v45 = vld [vmem:[#allocation6 + $0xe0] ss:$16 sps:$4 sm:$0xff]   ;;  %v7530_v46 = vld [vmem:[#allocation6 + $0xc4] ss:$16 sps:$4 sm:$0xff]  }
 0x26f   :  { %4445 = vmatprep.subr.bf16.mxu1 %v7470_v21  ;;  %v8136_v21 = vpack.c.bf16 %v4516_v44, %v4516_v44 }
 0x271   :  { %4411 = vmatpush2.bf16.msra.mxu0 %v7465_v3 }
 0x272   :  { %4446 = vmatpush1.bf16.msra.mxu1 %v7468_v53  ;;  %4412 = vmatprep.subr.bf16.mxu0 %v7473_v54  ;;  %v7528_v53 = vld [vmem:[#allocation6 + $0xc0] ss:$16 sps:$4 sm:$0xff]   ;;  %v7533_v54 = vld [vmem:[#allocation6 + $0xa4] ss:$16 sps:$4 sm:$0xff]  }
 0x273   :  { %4447 = vmatprep.subr.bf16.mxu1 %v7476_v55 }
 0x275   :  { %4413 = vmatpush2.bf16.msra.mxu0 %v7471_v56 }
 0x276   :  { %4448 = vmatpush1.bf16.msra.mxu1 %v7474_v57  ;;  %4414 = vmatprep.subr.bf16.mxu0 %v7479_v8  ;;  %v7531_v57 = vld [vmem:[#allocation6 + $0xa0] ss:$16 sps:$4 sm:$0xff]  }
 0x277   :  { %4449 = vmatprep.subr.bf16.mxu1 %v7482_v32  ;;  %v7621_v32 = vld [vmem:[#allocation6 + $0x2e0] ss:$16 sps:$4 sm:$0xff]  }
 0x279   :  { %4415 = vmatpush2.bf16.msra.mxu0 %v7477_v59  ;;  %v7623_v59 = vld [vmem:[#allocation6 + $0x2e4] ss:$16 sps:$4 sm:$0xff]  }
 0x27a   :  { %4450 = vmatpush2.bf16.msra.mxu1 %v7480_v60  ;;  %4416 = vmatprep.subr.bf16.mxu0 %v7485_v62  ;;  %v7534_v60 = vld [vmem:[#allocation6 + $0x80] ss:$16 sps:$4 sm:$0xff]  }
 0x27b   :  { %4451 = vmatprep.subr.bf16.mxu1 %v7488_v37  ;;  %v7624_v62 = vld [vmem:[#allocation6 + $0x2c0] ss:$16 sps:$4 sm:$0xff]   ;;  %v7539_v37 = vld [vmem:[#allocation6 + $0x64] ss:$16 sps:$4 sm:$0xff]  }
 0x27d   :  { %4417 = vmatpush2.bf16.msra.mxu0 %v7483_v63  ;;  %v7629_v63 = vld [vmem:[#allocation6 + $0x2a4] ss:$16 sps:$4 sm:$0xff]  }
 0x27e   :  { %4452 = vmatpush2.bf16.msra.mxu1 %v7486_v0  ;;  %4418 = vmatprep.subr.bf16.mxu0 %v7491_v2  ;;  %v7537_v0 = vld [vmem:[#allocation6 + $0x60] ss:$16 sps:$4 sm:$0xff]  }
 0x27f   :  { %4453 = vmatprep.subr.bf16.mxu1 %v7494_v10  ;;  %v7627_v2 = vld [vmem:[#allocation6 + $0x2a0] ss:$16 sps:$4 sm:$0xff]   ;;  %v7542_v10 = vld [vmem:[#allocation6 + $0x44] ss:$16 sps:$4 sm:$0xff]  }
 0x281   :  { %4419 = vmatpush2.bf16.msra.mxu0 %v7489_v41  ;;  %v7632_v41 = vld [vmem:[#allocation6 + $0x284] ss:$16 sps:$4 sm:$0xff]  }
 0x282   :  { %4454 = vmatpush2.bf16.msra.mxu1 %v7492_v11  ;;  %4420 = vmatprep.subr.bf16.mxu0 %v7497_v49  ;;  %v7540_v11 = vld [vmem:[#allocation6 + $0x40] ss:$16 sps:$4 sm:$0xff]  }
 0x283   :  { %4455 = vmatprep.subr.bf16.mxu1 %v7500_v12  ;;  %v7630_v49 = vld [vmem:[#allocation6 + $0x280] ss:$16 sps:$4 sm:$0xff]   ;;  %v7545_v12 = vld [vmem:[#allocation6 + $0x24] ss:$16 sps:$4 sm:$0xff]  }
 0x285   :  { %4421 = vmatpush2.bf16.msra.mxu0 %v7495_v23  ;;  %v7635_v23 = vld [vmem:[#allocation6 + $0x264] ss:$16 sps:$4 sm:$0xff]  }
 0x286   :  { %4456 = vmatpush2.bf16.msra.mxu1 %v7498_v48  ;;  %4422 = vmatprep.subr.bf16.mxu0 %v7503_v29  ;;  %v7543_v48 = vld [vmem:[#allocation6 + $0x20] ss:$16 sps:$4 sm:$0xff]  }
 0x287   :  { %4457 = vmatprep.subr.bf16.mxu1 %v7506_v14  ;;  %v7633_v29 = vld [vmem:[#allocation6 + $0x260] ss:$16 sps:$4 sm:$0xff]   ;;  %v7548_v14 = vld [vmem:[#allocation6 + $0x4] ss:$16 sps:$4 sm:$0xff]  }
 0x289   :  { %4423 = vmatpush2.bf16.msra.mxu0 %v7501_v18  ;;  %v7638_v18 = vld [vmem:[#allocation6 + $0x244] ss:$16 sps:$4 sm:$0xff]  }
 0x28a   :  { %4458 = vmatpush2.bf16.msra.mxu1 %v7504_v13  ;;  %4484 = vmatprep.subr.bf16.mxu0 %v7512_v50  ;;  %v7546_v13 = vld [vmem:[#allocation6] ss:$16 sps:$4 sm:$0xff]   ;;  %v7551_v50 = vld [vmem:[#allocation6 + $0x1e4] ss:$16 sps:$4 sm:$0xff]  }
 0x28b   :  { %4459 = vmatprep.subr.bf16.mxu1 %v7509_v19  ;;  %v7636_v19 = vld [vmem:[#allocation6 + $0x240] ss:$16 sps:$4 sm:$0xff]  }
 0x28c   :  { %v4180_v28 = vpop.f32.mrf.mxu0  ;;  %4425 = vmatmul.mubr.bf16.vlgmr.msra.gmra.mxu0 %v8043_v7  ;;  %v7522_v7 = vld [vmem:[#allocation2 + $0x1208] ss:$16 sps:$4 sm:$0xff]  }
 0x28d   :  { %v4181_v34 = vadd.f32 %v4180_v28, %v4140_v30  ;;  %4485 = vmatpush1.bf16.msra.mxu0 %v7510_v25  ;;  %4506 = vmatprep.mubr.bf16.mxu0 %v7888_v33  ;;  %v7644_v25 = vld [vmem:[#allocation6 + $0x204] ss:$16 sps:$4 sm:$0xff]  }
 0x28e   :  { %4460 = vmatpush2.bf16.msra.mxu1 %v7507_v24  ;;  %v4182_v36 = vpop.f32.mrf.mxu0  ;;  %4486 = vmatprep.subr.bf16.mxu0 %v7518_v27  ;;  %v7554_v24 = vld [vmem:[#allocation6 + $0x1c4] ss:$16 sps:$4 sm:$0xff]   ;;  %v7642_v27 = vld [vmem:[#allocation6 + $0x200] ss:$16 sps:$4 sm:$0xff]  }
 0x28f   :  { %4461 = vmatprep.subr.bf16.mxu1 %v7515_v26  ;;  %v4183_v43 = vadd.f32 %v4182_v36, %v4142_v6  ;;  %v7552_v26 = vld [vmem:[#allocation6 + $0x1c0] ss:$16 sps:$4 sm:$0xff]   ;;  %v7557_v30 = vld [vmem:[#allocation6 + $0x1a4] ss:$16 sps:$4 sm:$0xff]  }
 0x290   :  { %v4184_v39 = vpop.f32.mrf.mxu0  ;;  %v7647_v28 = vld [vmem:[#allocation6 + $0x3e4] ss:$16 sps:$4 sm:$0xff]   ;;  %v7555_v6 = vld [vmem:[#allocation6 + $0x1a0] ss:$16 sps:$4 sm:$0xff]  }
 0x291   :  { %4487 = vmatpush1.bf16.msra.mxu0 %v7516_v20  ;;  %v7650_v20 = vld [vmem:[#allocation6 + $0x3c4] ss:$16 sps:$4 sm:$0xff]   ;;  %v7558_v36 = vld [vmem:[#allocation6 + $0x180] ss:$16 sps:$4 sm:$0xff]  }
 0x292   :  { %4462 = vmatpush2.bf16.msra.mxu1 %v7513_v35  ;;  %v4185_v52 = vpop.f32.mrf.mxu0  ;;  %4488 = vmatprep.subr.bf16.mxu0 %v7524_v16  ;;  %v7560_v35 = vld [vmem:[#allocation6 + $0x184] ss:$16 sps:$4 sm:$0xff]   ;;  %v7561_v39 = vld [vmem:[#allocation6 + $0x160] ss:$16 sps:$4 sm:$0xff]  }
 0x293   :  { %4463 = vmatprep.subr.bf16.mxu1 %v7521_v38  ;;  %v7648_v38 = vld [vmem:[#allocation6 + $0x3c0] ss:$16 sps:$4 sm:$0xff]   ;;  %v7563_v16 = vld [vmem:[#allocation6 + $0x164] ss:$16 sps:$4 sm:$0xff]  }
 0x294   :  { %v7564_v52 = vld [vmem:[#allocation6 + $0x140] ss:$16 sps:$4 sm:$0xff]  }
 0x295   :  { %4489 = vmatpush1.bf16.msra.mxu0 %v7522_v7  ;;  %v7566_v7 = vld [vmem:[#allocation6 + $0x144] ss:$16 sps:$4 sm:$0xff]  }
 0x296   :  { %4464 = vmatpush2.bf16.msra.mxu1 %v7519_v31  ;;  %5313 = vmatprep.subr.bf16.mxu0 %v7527_v22  ;;  %v7651_v31 = vld [vmem:[#allocation6 + $0x3a0] ss:$16 sps:$4 sm:$0xff]   ;;  %v7569_v22 = vld [vmem:[#allocation6 + $0x124] ss:$16 sps:$4 sm:$0xff]  }
 0x297   :  { %5354 = vmatprep.subr.bf16.mxu1 %v7623_v59 }
 0x298   :  { %6426 = vmatmul.mubr.msk.bf16.vlgmr.msra.gmra.mxu0 %vm3691_vm0, %v8065_v51  ;;  %v7626_v51 = vld [vmem:[#allocation6 + $0x2c4] ss:$16 sps:$4 sm:$0xff]  }
 0x299   :  { %v4221_v3 = vpop.f32.mrf.mxu1  ;;  %4466 = vmatmul.mubr.bf16.vlgmr.msra.gmra.mxu1 %v8073_v4  ;;  %5314 = vmatpush1.bf16.msra.mxu0 %v7525_v45  ;;  %v7536_v4 = vld [vmem:[#allocation6 + $0x84] ss:$16 sps:$4 sm:$0xff]  }
 0x29a   :  { %v8141_v33 = vadd.f32 %v4221_v3, %v4181_v34  ;;  %5345 = vmatprep.mubr.bf16.mxu0 %v8136_v21  ;;  %5315 = vmatprep.subr.bf16.mxu0 %v7530_v46  ;;  %v7645_v34 = vld [vmem:[#allocation6 + $0x3e0] ss:$16 sps:$4 sm:$0xff]   ;;  %v7656_v3 = vld [vmem:[#allocation6 + $0x384] ss:$16 sps:$4 sm:$0xff]  }
 0x29b   :  { %v4223_v42 = vpop.f32.mrf.mxu1  ;;  %5355 = vmatpush1.bf16.msra.mxu1 %v7621_v32  ;;  %v7567_v46 = vld [vmem:[#allocation6 + $0x120] ss:$16 sps:$4 sm:$0xff]   ;;  %v7659_v32 = vld [vmem:[#allocation6 + $0x364] ss:$16 sps:$4 sm:$0xff]  }
 0x29c   :  { %v8144_v55 = vadd.f32 %v4223_v42, %v4183_v43  ;;  %5356 = vmatprep.subr.bf16.mxu1 %v7626_v51  ;;  %v7653_v43 = vld [vmem:[#allocation6 + $0x3a4] ss:$16 sps:$4 sm:$0xff]   ;;  %v7657_v51 = vld [vmem:[#allocation6 + $0x360] ss:$16 sps:$4 sm:$0xff]  }
 0x29d   :  { %v4225_v56 = vpop.f32.mrf.mxu1  ;;  %5316 = vmatpush1.bf16.msra.mxu0 %v7528_v53  ;;  %v7572_v42 = vld [vmem:[#allocation6 + $0x104] ss:$16 sps:$4 sm:$0xff]  }
 0x29e   :  { %5317 = vmatprep.subr.bf16.mxu0 %v7533_v54  ;;  %v7654_v54 = vld [vmem:[#allocation6 + $0x380] ss:$16 sps:$4 sm:$0xff]  }
 0x29f   :  { %v4226_v8 = vpop.f32.mrf.mxu1  ;;  %5357 = vmatpush1.bf16.msra.mxu1 %v7624_v62  ;;  %v7660_v62 = vld [vmem:[#allocation6 + $0x340] ss:$16 sps:$4 sm:$0xff]  }
 0x2a0   :  { %5358 = vmatprep.subr.bf16.mxu1 %v7629_v63  ;;  %v4515_v8 = vmax.f32 %v8112_v9, 0.0  ;;  %v7578_v63 = vld [vmem:[#allocation6 + $0xcc] ss:$16 sps:$4 sm:$0xff]  }
 0x2a1   :  { %5318 = vmatpush1.bf16.msra.mxu0 %v7531_v57 }
 0x2a2   :  { %5319 = vmatprep.subr.bf16.mxu0 %v7536_v4  ;;  %v7570_v4 = vld [vmem:[#allocation6 + $0x100] ss:$16 sps:$4 sm:$0xff]  }
 0x2a3   :  { %5359 = vmatpush1.bf16.msra.mxu1 %v7627_v2  ;;  %v7576_v2 = vld [vmem:[#allocation6 + $0xc8] ss:$16 sps:$4 sm:$0xff]  }
 0x2a4   :  { %5360 = vmatprep.subr.bf16.mxu1 %v7632_v41 }
 0x2a5   :  { %5320 = vmatpush1.bf16.msra.mxu0 %v7534_v60  ;;  %v7662_v60 = vld [vmem:[#allocation6 + $0x344] ss:$16 sps:$4 sm:$0xff]  }
 0x2a6   :  { %5321 = vmatprep.subr.bf16.mxu0 %v7539_v37  ;;  %v7573_v37 = vld [vmem:[#allocation6 + $0xe8] ss:$16 sps:$4 sm:$0xff]  }
 0x2a7   :  { %5361 = vmatpush1.bf16.msra.mxu1 %v7630_v49  ;;  %v7663_v49 = vld [vmem:[#allocation6 + $0x320] ss:$16 sps:$4 sm:$0xff]  }
 0x2a8   :  { %5362 = vmatprep.subr.bf16.mxu1 %v7635_v23 }
 0x2a9   :  { %5322 = vmatpush1.bf16.msra.mxu0 %v7537_v0 }
 0x2aa   :  { %5323 = vmatprep.subr.bf16.mxu0 %v7542_v10  ;;  %v7665_v10 = vld [vmem:[#allocation6 + $0x324] ss:$16 sps:$4 sm:$0xff]  }
 0x2ab   :  { %5363 = vmatpush1.bf16.msra.mxu1 %v7633_v29  ;;  %v7668_v29 = vld [vmem:[#allocation6 + $0x304] ss:$16 sps:$4 sm:$0xff]  }
 0x2ac   :  { %5364 = vmatprep.subr.bf16.mxu1 %v7638_v18  ;;  %v7584_v18 = vld [vmem:[#allocation6 + $0x8c] ss:$16 sps:$4 sm:$0xff]  }
 0x2ad   :  { %5324 = vmatpush1.bf16.msra.mxu0 %v7540_v11  ;;  %v7581_v11 = vld [vmem:[#allocation6 + $0xac] ss:$16 sps:$4 sm:$0xff]  }
 0x2ae   :  { %5325 = vmatprep.subr.bf16.mxu0 %v7545_v12 }
 0x2af   :  { %5365 = vmatpush1.bf16.msra.mxu1 %v7636_v19  ;;  %v7671_v19 = vld [vmem:[#allocation6 + $0x2ec] ss:$16 sps:$4 sm:$0xff]  }
 0x2b0   :  { %5366 = vmatprep.subr.bf16.mxu1 %v7641_v47  ;;  %v7585_v47 = vld [vmem:[#allocation6 + $0x68] ss:$16 sps:$4 sm:$0xff]  }
 0x2b1   :  { %5326 = vmatpush1.bf16.msra.mxu0 %v7543_v48  ;;  %v7579_v48 = vld [vmem:[#allocation6 + $0xa8] ss:$16 sps:$4 sm:$0xff]  }
 0x2b2   :  { %5327 = vmatprep.subr.bf16.mxu0 %v7548_v14 }
 0x2b3   :  { %5367 = vmatpush1.bf16.msra.mxu1 %v7639_v40  ;;  %v7588_v40 = vld [vmem:[#allocation6 + $0x48] ss:$16 sps:$4 sm:$0xff]  }
 0x2b4   :  { %5368 = vmatprep.subr.bf16.mxu1 %v7644_v25  ;;  %v7591_v25 = vld [vmem:[#allocation6 + $0x28] ss:$16 sps:$4 sm:$0xff]  }
 0x2b5   :  { %5328 = vmatpush1.bf16.msra.mxu0 %v7546_v13  ;;  %v7666_v13 = vld [vmem:[#allocation6 + $0x300] ss:$16 sps:$4 sm:$0xff]  }
 0x2b6   :  { %5329 = vmatprep.subr.bf16.mxu0 %v7551_v50  ;;  %v7587_v50 = vld [vmem:[#allocation6 + $0x6c] ss:$16 sps:$4 sm:$0xff]  }
 0x2b7   :  { %5369 = vmatpush1.bf16.msra.mxu1 %v7642_v27  ;;  %v7594_v27 = vld [vmem:[#allocation6 + $0x8] ss:$16 sps:$4 sm:$0xff]  }
 0x2b8   :  { %5370 = vmatprep.subr.bf16.mxu1 %v7647_v28  ;;  %v7597_v28 = vld [vmem:[#allocation6 + $0x1e8] ss:$16 sps:$4 sm:$0xff]  }
 0x2b9   :  { %5330 = vmatpush2.bf16.msra.mxu0 %v7549_v61  ;;  %v7590_v61 = vld [vmem:[#allocation6 + $0x4c] ss:$16 sps:$4 sm:$0xff]  }
 0x2ba   :  { %5331 = vmatprep.subr.bf16.mxu0 %v7554_v24  ;;  %v7593_v24 = vld [vmem:[#allocation6 + $0x2c] ss:$16 sps:$4 sm:$0xff]  }
 0x2bb   :  { %5371 = vmatpush2.bf16.msra.mxu1 %v7645_v34  ;;  %v7600_v34 = vld [vmem:[#allocation6 + $0x1c8] ss:$16 sps:$4 sm:$0xff]  }
 0x2bc   :  { %5372 = vmatprep.subr.bf16.mxu1 %v7650_v20  ;;  %v7603_v20 = vld [vmem:[#allocation6 + $0x1a8] ss:$16 sps:$4 sm:$0xff]  }
 0x2bd   :  { %5332 = vmatpush2.bf16.msra.mxu0 %v7552_v26  ;;  %v7596_v26 = vld [vmem:[#allocation6 + $0xc] ss:$16 sps:$4 sm:$0xff]  }
 0x2be   :  { %5333 = vmatprep.subr.bf16.mxu0 %v7557_v30  ;;  %v7599_v30 = vld [vmem:[#allocation6 + $0x1ec] ss:$16 sps:$4 sm:$0xff]  }
 0x2bf   :  { %5373 = vmatpush2.bf16.msra.mxu1 %v7648_v38  ;;  %v7606_v38 = vld [vmem:[#allocation6 + $0x188] ss:$16 sps:$4 sm:$0xff]  }
 0x2c0   :  { %5374 = vmatprep.subr.bf16.mxu1 %v7653_v43  ;;  %v7609_v43 = vld [vmem:[#allocation6 + $0x168] ss:$16 sps:$4 sm:$0xff]  }
 0x2c1   :  { %5334 = vmatpush2.bf16.msra.mxu0 %v7555_v6  ;;  %v7602_v6 = vld [vmem:[#allocation6 + $0x1cc] ss:$16 sps:$4 sm:$0xff]  }
 0x2c2   :  { %5335 = vmatprep.subr.bf16.mxu0 %v7560_v35  ;;  %v7605_v35 = vld [vmem:[#allocation6 + $0x1ac] ss:$16 sps:$4 sm:$0xff]  }
 0x2c3   :  { %5375 = vmatpush2.bf16.msra.mxu1 %v7651_v31  ;;  %v7612_v31 = vld [vmem:[#allocation6 + $0x148] ss:$16 sps:$4 sm:$0xff]  }
 0x2c4   :  { %5376 = vmatprep.subr.bf16.mxu1 %v7656_v3 }
 0x2c5   :  { %5336 = vmatpush2.bf16.msra.mxu0 %v7558_v36  ;;  %v7608_v36 = vld [vmem:[#allocation6 + $0x18c] ss:$16 sps:$4 sm:$0xff]  }
 0x2c6   :  { %5337 = vmatprep.subr.bf16.mxu0 %v7563_v16  ;;  %v7611_v16 = vld [vmem:[#allocation6 + $0x16c] ss:$16 sps:$4 sm:$0xff]  }
 0x2c7   :  { %5377 = vmatpush2.bf16.msra.mxu1 %v7654_v54 }
 0x2c8   :  { %5378 = vmatprep.subr.bf16.mxu1 %v7659_v32 }
 0x2c9   :  { %5338 = vmatpush2.bf16.msra.mxu0 %v7561_v39  ;;  %v7614_v39 = vld [vmem:[#allocation6 + $0x14c] ss:$16 sps:$4 sm:$0xff]  }
 0x2ca   :  { %5339 = vmatprep.subr.bf16.mxu0 %v7566_v7  ;;  %v7617_v7 = vld [vmem:[#allocation6 + $0x12c] ss:$16 sps:$4 sm:$0xff]  }
 0x2cb   :  { %5379 = vmatpush2.bf16.msra.mxu1 %v7657_v51 }
 0x2cc   :  { %v4262_v44 = vpop.f32.mrf.mxu0  ;;  %5380 = vmatprep.subr.bf16.mxu1 %v7662_v60 }
 0x2cd   :  { %v4263_v45 = vadd.f32 %v4262_v44, %v8141_v33  ;;  %5340 = vmatpush2.bf16.msra.mxu0 %v7564_v52  ;;  %v7575_v33 = vld [vmem:[#allocation6 + $0xec] ss:$16 sps:$4 sm:$0xff]   ;;  %v7615_v44 = vld [vmem:[#allocation6 + $0x128] ss:$16 sps:$4 sm:$0xff]  }
 0x2ce   :  { %v4264_v53 = vpop.f32.mrf.mxu0  ;;  %5341 = vmatprep.subr.bf16.mxu0 %v7569_v22 }
 0x2cf   :  { %v4265_v56 = vadd.f32 %v4264_v53, %v8144_v55  ;;  %v8149_v55 = vpack.c.bf16 %v4515_v8, %v4515_v8  ;;  %5381 = vmatpush2.bf16.msra.mxu1 %v7660_v62 }
 0x2d0   :  { %v4266_v57 = vpop.f32.mrf.mxu0  ;;  %5382 = vmatprep.subr.bf16.mxu1 %v7665_v10 }
 0x2d1   :  { %5342 = vmatpush2.bf16.msra.mxu0 %v7567_v46  ;;  %v7620_v46 = vld [vmem:[#allocation6 + $0x10c] ss:$16 sps:$4 sm:$0xff]  }
 0x2d2   :  { %v4267_v59 = vpop.f32.mrf.mxu0  ;;  %5343 = vmatprep.subr.bf16.mxu0 %v7572_v42  ;;  %v7618_v42 = vld [vmem:[#allocation6 + $0x108] ss:$16 sps:$4 sm:$0xff]  }
 0x2d3   :  { %5383 = vmatpush2.bf16.msra.mxu1 %v7663_v49 }
 0x2d4   :  { %5384 = vmatprep.subr.bf16.mxu1 %v7668_v29 }
 0x2d5   :  { %5344 = vmatpush2.bf16.msra.mxu0 %v7570_v4 }
 0x2d6   :  { %5395 = vmatprep.subr.bf16.mxu0 %v7575_v33 }
 0x2d7   :  { %5385 = vmatpush2.bf16.msra.mxu1 %v7666_v13  ;;  %v7718_v13 = vld [vmem:[#allocation9 + $0x38] sm:$0xff]  }
 0x2d8   :  { %5346 = vmatmul.mubr.bf16.vlgmr.msra.gmra.mxu0 %v8149_v55  ;;  %5436 = vmatprep.subr.bf16.mxu1 %v7671_v19 }
 0x2d9   :  { %v4303_v0 = vpop.f32.mrf.mxu1  ;;  %5396 = vmatpush1.bf16.msra.mxu0 %v7573_v37  ;;  %5427 = vmatprep.mubr.bf16.mxu0 %v8136_v21  ;;  %v7582_v21 = vld [vmem:[#allocation6 + $0x88] ss:$16 sps:$4 sm:$0xff]  }
 0x2da   :  { %v8152_v9 = vadd.f32 %v4303_v0, %v4263_v45  ;;  %5397 = vmatprep.subr.bf16.mxu0 %v7578_v63 }
 0x2db   :  { %v4305_v41 = vpop.f32.mrf.mxu1 }
 0x2dc   :  { %v8155_v12 = vadd.f32 %v4305_v41, %v4265_v56 }
 0x2dd   :  { %v4307_v23 = vpop.f32.mrf.mxu1  ;;  %5398 = vmatpush1.bf16.msra.mxu0 %v7576_v2 }
 0x2de   :  { %5399 = vmatprep.subr.bf16.mxu0 %v7581_v11 }
 0x2df   :  { %v4308_v14 = vpop.f32.mrf.mxu1 }
 0x2e1   :  { %5400 = vmatpush1.bf16.msra.mxu0 %v7579_v48 }
 0x2e2   :  { %5401 = vmatprep.subr.bf16.mxu0 %v7584_v18  ;;  %v7717_v18 = vld [vmem:[#allocation9 + $0x78] sm:$0xff]  }
 0x2e5   :  { %5402 = vmatpush1.bf16.msra.mxu0 %v7582_v21  ;;  %v7719_v21 = vld [vmem:[#allocation9 + $0x70] sm:$0xff]  }
 0x2e6   :  { %5403 = vmatprep.subr.bf16.mxu0 %v7587_v50 }
 0x2e9   :  { %5404 = vmatpush1.bf16.msra.mxu0 %v7585_v47  ;;  %v7669_v47 = vld [vmem:[#allocation6 + $0x2e8] ss:$16 sps:$4 sm:$0xff]  }
 0x2ea   :  { %5405 = vmatprep.subr.bf16.mxu0 %v7590_v61 }
 0x2ed   :  { %5406 = vmatpush1.bf16.msra.mxu0 %v7588_v40  ;;  %v7674_v40 = vld [vmem:[#allocation6 + $0x2cc] ss:$16 sps:$4 sm:$0xff]  }
 0x2ee   :  { %5407 = vmatprep.subr.bf16.mxu0 %v7593_v24  ;;  %v7720_v24 = vld [vmem:[#allocation9 + $0x30] sm:$0xff]  }
 0x2f1   :  { %5408 = vmatpush1.bf16.msra.mxu0 %v7591_v25  ;;  %v7721_v25 = vld [vmem:[#allocation9 + $0x68] sm:$0xff]  }
 0x2f2   :  { %5409 = vmatprep.subr.bf16.mxu0 %v7596_v26  ;;  %v7672_v26 = vld [vmem:[#allocation6 + $0x2c8] ss:$16 sps:$4 sm:$0xff]  }
 0x2f5   :  { %5410 = vmatpush1.bf16.msra.mxu0 %v7594_v27  ;;  %v7677_v27 = vld [vmem:[#allocation6 + $0x2ac] ss:$16 sps:$4 sm:$0xff]  }
 0x2f6   :  { %5411 = vmatprep.subr.bf16.mxu0 %v7599_v30  ;;  %v7722_v30 = vld [vmem:[#allocation9 + $0x28] sm:$0xff]  }
 0x2f9   :  { %5412 = vmatpush2.bf16.msra.mxu0 %v7597_v28  ;;  %v7723_v28 = vld [vmem:[#allocation9 + $0x60] sm:$0xff]  }
 0x2fa   :  { %5413 = vmatprep.subr.bf16.mxu0 %v7602_v6  ;;  %v7675_v6 = vld [vmem:[#allocation6 + $0x2a8] ss:$16 sps:$4 sm:$0xff]  }
 0x2fd   :  { %5414 = vmatpush2.bf16.msra.mxu0 %v7600_v34  ;;  %v7680_v34 = vld [vmem:[#allocation6 + $0x28c] ss:$16 sps:$4 sm:$0xff]  }
 0x2fe   :  { %5415 = vmatprep.subr.bf16.mxu0 %v7605_v35  ;;  %v7724_v35 = vld [vmem:[#allocation9 + $0x20] sm:$0xff]  }
 0x301   :  { %5416 = vmatpush2.bf16.msra.mxu0 %v7603_v20  ;;  %v7725_v20 = vld [vmem:[#allocation9 + $0x58] sm:$0xff]  }
 0x302   :  { %5417 = vmatprep.subr.bf16.mxu0 %v7608_v36  ;;  %v7678_v36 = vld [vmem:[#allocation6 + $0x288] ss:$16 sps:$4 sm:$0xff]  }
 0x305   :  { %5418 = vmatpush2.bf16.msra.mxu0 %v7606_v38  ;;  %v7683_v38 = vld [vmem:[#allocation6 + $0x26c] ss:$16 sps:$4 sm:$0xff]  }
 0x306   :  { %5419 = vmatprep.subr.bf16.mxu0 %v7611_v16  ;;  %v7726_v16 = vld [vmem:[#allocation9 + $0x18] sm:$0xff]  }
 0x309   :  { %5420 = vmatpush2.bf16.msra.mxu0 %v7609_v43  ;;  %v7727_v43 = vld [vmem:[#allocation9 + $0x50] sm:$0xff]  }
 0x30a   :  { %5421 = vmatprep.subr.bf16.mxu0 %v7614_v39  ;;  %v7681_v39 = vld [vmem:[#allocation6 + $0x268] ss:$16 sps:$4 sm:$0xff]  }
 0x30c   :  { %v4344_v52 = vpop.f32.mrf.mxu0 }
 0x30d   :  { %v4345_v22 = vadd.f32 %v4344_v52, %v8152_v9  ;;  %5422 = vmatpush2.bf16.msra.mxu0 %v7612_v31  ;;  %v7686_v31 = vld [vmem:[#allocation6 + $0x24c] ss:$16 sps:$4 sm:$0xff]   ;;  %v7684_v52 = vld [vmem:[#allocation6 + $0x248] ss:$16 sps:$4 sm:$0xff]  }
 0x30e   :  { %v4346_v45 = vpop.f32.mrf.mxu0  ;;  %5423 = vmatprep.subr.bf16.mxu0 %v7617_v7  ;;  %v7728_v7 = vld [vmem:[#allocation9 + $0x10] sm:$0xff]  }
 0x30f   :  { %v4347_v3 = vadd.f32 %v4346_v45, %v8155_v12  ;;  %v7692_v45 = vld [vmem:[#allocation6 + $0x20c] ss:$16 sps:$4 sm:$0xff]  }
 0x310   :  { %v4348_v53 = vpop.f32.mrf.mxu0 }
 0x311   :  { %5424 = vmatpush2.bf16.msra.mxu0 %v7615_v44  ;;  %v7687_v44 = vld [vmem:[#allocation6 + $0x228] ss:$16 sps:$4 sm:$0xff]  }
 0x312   :  { %v4349_v54 = vpop.f32.mrf.mxu0  ;;  %5425 = vmatprep.subr.bf16.mxu0 %v7620_v46  ;;  %v7690_v46 = vld [vmem:[#allocation6 + $0x208] ss:$16 sps:$4 sm:$0xff]  }
 0x313   :  { %v7693_v53 = vld [vmem:[#allocation6 + $0x3e8] ss:$16 sps:$4 sm:$0xff]  }
 0x314   :  { %v7696_v54 = vld [vmem:[#allocation6 + $0x3c8] ss:$16 sps:$4 sm:$0xff]  }
 0x315   :  { %5426 = vmatpush2.bf16.msra.mxu0 %v7618_v42  ;;  %v7698_v42 = vld [vmem:[#allocation6 + $0x3cc] ss:$16 sps:$4 sm:$0xff]  }
 0x316   :  { %6588 = vmatprep.subr.bf16.mxu0 %v7717_v18  ;;  %v7738_v18 = vld [vmem:[#allocation9 + $0xa8] sm:$0xff]  }
 0x318   :  { %5428 = vmatmul.mubr.bf16.vlgmr.msra.gmra.mxu0 %v8149_v55 }
 0x319   :  { %v4385_v56 = vpop.f32.mrf.mxu1  ;;  %6589 = vmatpush3.bf16.msra.mxu0 %v7718_v13  ;;  %v7739_v13 = vld [vmem:[#allocation9 + $0xe0] sm:$0xff]  }
 0x31a   :  { %v4386_v60 = vadd.f32 %v4385_v56, %v4345_v22  ;;  %6590 = vmatprep.subr.bf16.mxu0 %v7719_v21  ;;  %v7689_v22 = vld [vmem:[#allocation6 + $0x22c] ss:$16 sps:$4 sm:$0xff]   ;;  %v7740_v21 = vld [vmem:[#allocation9 + $0xa0] sm:$0xff]  }
 0x31b   :  { %v4387_v57 = vpop.f32.mrf.mxu1  ;;  %v7701_v56 = vld [vmem:[#allocation6 + $0x3ac] ss:$16 sps:$4 sm:$0xff]  }
 0x31c   :  { %v4388_v62 = vadd.f32 %v4387_v57, %v4347_v3  ;;  %v7695_v3 = vld [vmem:[#allocation6 + $0x3ec] ss:$16 sps:$4 sm:$0xff]   ;;  %v7699_v57 = vld [vmem:[#allocation6 + $0x3a8] ss:$16 sps:$4 sm:$0xff]  }
 0x31d   :  { %v4389_v8 = vpop.f32.mrf.mxu1  ;;  %6591 = vmatpush3.bf16.msra.mxu0 %v7720_v24 }
 0x31e   :  { %6592 = vmatprep.subr.bf16.mxu0 %v7721_v25  ;;  %v7704_v8 = vld [vmem:[#allocation6 + $0x38c] ss:$16 sps:$4 sm:$0xff]  }
 0x31f   :  { %v4390_v4 = vpop.f32.mrf.mxu1 }
 0x320   :  { %v7702_v4 = vld [vmem:[#allocation6 + $0x388] ss:$16 sps:$4 sm:$0xff]  }
 0x321   :  { %6593 = vmatpush3.bf16.msra.mxu0 %v7722_v30  ;;  %v7746_v30 = vld [vmem:[#allocation9 + $0x88] sm:$0xff]  }
 0x322   :  { %6594 = vmatprep.subr.bf16.mxu0 %v7723_v28  ;;  %v7747_v28 = vld [vmem:[#allocation9 + $0xc0] sm:$0xff]  }
 0x325   :  { %6595 = vmatpush3.bf16.msra.mxu0 %v7724_v35 }
 0x326   :  { %6596 = vmatprep.subr.bf16.mxu0 %v7725_v20 }
 0x329   :  { %6597 = vmatpush3.bf16.msra.mxu0 %v7726_v16 }
 0x32a   :  { %6598 = vmatprep.subr.bf16.mxu0 %v7727_v43 }
 0x32d   :  { %6599 = vmatpush3.bf16.msra.mxu0 %v7728_v7 }
 0x34c   :  { %v4426_v32 = vpop.f32.mrf.mxu0 }
 0x34d   :  { %v4427_v37 = vadd.f32 %v4426_v32, %v4386_v60  ;;  %v7707_v32 = vld [vmem:[#allocation6 + $0x36c] ss:$16 sps:$4 sm:$0xff]  }
 0x34e   :  { %v4428_v59 = vpop.f32.mrf.mxu0  ;;  %v7713_v60 = vld [vmem:[#allocation6 + $0x32c] ss:$16 sps:$4 sm:$0xff]  }
 0x34f   :  { %v4429_v9 = vadd.f32 %v4428_v59, %v4388_v62  ;;  %v7705_v59 = vld [vmem:[#allocation6 + $0x368] ss:$16 sps:$4 sm:$0xff]  }
 0x350   :  { %v4430_v33 = vpop.f32.mrf.mxu0 }
 0x351   :  { %v7710_v33 = vld [vmem:[#allocation6 + $0x34c] ss:$16 sps:$4 sm:$0xff]  }
 0x352   :  { %v4431_v51 = vpop.f32.mrf.mxu0 }
 0x353   :  { %v7708_v51 = vld [vmem:[#allocation6 + $0x348] ss:$16 sps:$4 sm:$0xff]  }
 0x358   :  { %v4508_v0 = vpop.f32.mrf.mxu0 }
 0x359   :  { %v4467_v63 = vpop.f32.mrf.mxu1 }
 0x35a   :  { %v4468_v2 = vadd.f32 %v4467_v63, %v4427_v37  ;;  %v4510_v41 = vpop.f32.mrf.mxu0  ;;  %v7711_v37 = vld [vmem:[#allocation6 + $0x328] ss:$16 sps:$4 sm:$0xff]  }
 0x35b   :  { %v4469_v10 = vpop.f32.mrf.mxu1 }
 0x35c   :  { %v4509_v11 = vadd.f32 %v4508_v0, %v4468_v2  ;;  %v4470_v49 = vadd.f32 %v4469_v10, %v4429_v9  ;;  %v4512_v55 = vpop.f32.mrf.mxu0  ;;  %v7716_v0 = vld [vmem:[#allocation6 + $0x30c] ss:$16 sps:$4 sm:$0xff]   ;;  %v7714_v2 = vld [vmem:[#allocation6 + $0x308] ss:$16 sps:$4 sm:$0xff]  }
 0x35d   :  { %v4471_v12 = vpop.f32.mrf.mxu1  ;;  %v7733_v55 = vld [vmem:[#allocation9 + $0xf8] sm:$0xff]  }
 0x35e   :  { %v4511_v23 = vadd.f32 %v4510_v41, %v4470_v49  ;;  %v4517_v48 = vmax.f32 %v4509_v11, 0.0  ;;  %v4513_v14 = vpop.f32.mrf.mxu0  ;;  %v7729_v41 = vld [vmem:[#allocation9 + $0x48] sm:$0xff]   ;;  %v7731_v49 = vld [vmem:[#allocation9 + $0x40] sm:$0xff]  }
 0x35f   :  { %v4472_v29 = vpop.f32.mrf.mxu1  ;;  %v7730_v11 = vld [vmem:[#allocation9 + $0x8] sm:$0xff]   ;;  %6600 = vmatprep.subr.bf16.mxu0 %v7729_v41  ;;  %v7732_v12 = vld [vmem:[#allocation9] sm:$0xff]  }
 0x360   :  { %v4518_v19 = vmax.f32 %v4511_v23, 0.0  ;;  %v8160_v61 = vpack.c.bf16 %v4517_v48, %v4517_v48  ;;  %6601 = vmatpush3.bf16.msra.mxu0 %v7730_v11  ;;  %v7734_v23 = vld [vmem:[#allocation9 + $0xb8] sm:$0xff]   ;;  %v7735_v48 = vld [vmem:[#allocation9 + $0xf0] sm:$0xff]   ;;  %v7737_v14 = vld [vmem:[#allocation9 + $0xe8] sm:$0xff]  }
 0x361   :  { %6602 = vmatprep.subr.bf16.mxu0 %v7731_v49  ;;  %v7736_v29 = vld [vmem:[#allocation9 + $0xb0] sm:$0xff]  }
 0x362   :  { %v4522_v50 = vpack.c.bf16 %v4518_v19, %v4518_v19  ;;  %v7741_v19 = vld [vmem:[#allocation9 + $0xd8] sm:$0xff]  }
 0x364   :  { %5386 = vmatprep.mubr.bf16.mxu1 %v4522_v50  ;;  %6603 = vmatpush3.bf16.msra.mxu0 %v7732_v12 }
 0x365   :  { %5387 = vmatmul.mubr.bf16.vlgmr.msra.gmra.mxu1 %v8160_v61 }
 0x366   :  { %5437 = vmatpush1.bf16.msra.mxu1 %v7669_v47  ;;  %5468 = vmatprep.mubr.bf16.mxu1 %v4522_v50  ;;  %v7742_v50 = vld [vmem:[#allocation9 + $0x98] sm:$0xff]   ;;  %v7743_v47 = vld [vmem:[#allocation9 + $0xd0] sm:$0xff]  }
 0x367   :  { %5438 = vmatprep.subr.bf16.mxu1 %v7674_v40 }
 0x36a   :  { %5439 = vmatpush1.bf16.msra.mxu1 %v7672_v26 }
 0x36b   :  { %5440 = vmatprep.subr.bf16.mxu1 %v7677_v27  ;;  %v7745_v27 = vld [vmem:[#allocation9 + $0xc8] sm:$0xff]  }
 0x36e   :  { %5441 = vmatpush1.bf16.msra.mxu1 %v7675_v6  ;;  %v7748_v6 = vld [vmem:[#allocation9 + $0x80] sm:$0xff]  }
 0x36f   :  { %5442 = vmatprep.subr.bf16.mxu1 %v7680_v34  ;;  %v4651_v34 = vld [vmem:[#allocation7] sm:$0xf] }
 0x370   :  { %v4656_v35 = vrot.slane %v4651_v34, %v733_v1  ;;  %v4660_v20 = vrot.slane %v4651_v34, %v737_v5  ;;  %v4664_v1 = vrot.slane %v4651_v34, %v741_v15  ;;  %v4668_v5 = vrot.slane %v4651_v34, %v745_v17  ;;  %v6555_v17 = vld [vmem:[#allocation10] ss:$0 sm:$0xff] }
 0x372   :  { %5443 = vmatpush1.bf16.msra.mxu1 %v7678_v36 }
 0x373   :  { %5444 = vmatprep.subr.bf16.mxu1 %v7683_v38 }
 0x376   :  { %5445 = vmatpush1.bf16.msra.mxu1 %v7681_v39 }
 0x377   :  { %5446 = vmatprep.subr.bf16.mxu1 %v7686_v31 }
 0x37a   :  { %5447 = vmatpush1.bf16.msra.mxu1 %v7684_v52 }
 0x37b   :  { %5448 = vmatprep.subr.bf16.mxu1 %v7689_v22 }
 0x37e   :  { %5449 = vmatpush1.bf16.msra.mxu1 %v7687_v44 }
 0x37f   :  { %5450 = vmatprep.subr.bf16.mxu1 %v7692_v45 }
 0x382   :  { %5451 = vmatpush1.bf16.msra.mxu1 %v7690_v46 }
 0x383   :  { %5452 = vmatprep.subr.bf16.mxu1 %v7695_v3 }
 0x386   :  { %5453 = vmatpush2.bf16.msra.mxu1 %v7693_v53 }
 0x387   :  { %5454 = vmatprep.subr.bf16.mxu1 %v7698_v42 }
 0x38a   :  { %5455 = vmatpush2.bf16.msra.mxu1 %v7696_v54 }
 0x38b   :  { %5456 = vmatprep.subr.bf16.mxu1 %v7701_v56 }
 0x38e   :  { %5457 = vmatpush2.bf16.msra.mxu1 %v7699_v57 }
 0x38f   :  { %5458 = vmatprep.subr.bf16.mxu1 %v7704_v8 }
 0x392   :  { %5459 = vmatpush2.bf16.msra.mxu1 %v7702_v4 }
 0x393   :  { %5460 = vmatprep.subr.bf16.mxu1 %v7707_v32 }
 0x396   :  { %5461 = vmatpush2.bf16.msra.mxu1 %v7705_v59 }
 0x397   :  { %5462 = vmatprep.subr.bf16.mxu1 %v7710_v33 }
 0x398   :  { %v5347_v62 = vpop.f32.mrf.mxu0 }
 0x399   :  { %v5348_v36 = vadd.f32 %v5347_v62, %v4656_v35 }
 0x39a   :  { %5463 = vmatpush2.bf16.msra.mxu1 %v7708_v51  ;;  %v5349_v63 = vpop.f32.mrf.mxu0 }
 0x39b   :  { %5464 = vmatprep.subr.bf16.mxu1 %v7713_v60  ;;  %v5350_v16 = vadd.f32 %v5349_v63, %v4660_v20 }
 0x39c   :  { %v5351_v9 = vpop.f32.mrf.mxu0 }
 0x39e   :  { %5465 = vmatpush2.bf16.msra.mxu1 %v7711_v37  ;;  %v5352_v10 = vpop.f32.mrf.mxu0 }
 0x39f   :  { %5466 = vmatprep.subr.bf16.mxu1 %v7716_v0 }
 0x3a2   :  { %5467 = vmatpush2.bf16.msra.mxu1 %v7714_v2 }
 0x3a3   :  { %6610 = vmatprep.subr.bf16.mxu1 %v7733_v55 }
 0x3a5   :  { %5469 = vmatmul.mubr.bf16.vlgmr.msra.gmra.mxu1 %v8160_v61  ;;  %v7744_v61 = vld [vmem:[#allocation9 + $0x90] sm:$0xff]  }
 0x3a6   :  { %6611 = vmatpush3.bf16.msra.mxu1 %v7734_v23 }
 0x3a7   :  { %6612 = vmatprep.subr.bf16.mxu1 %v7735_v48 }
 0x3aa   :  { %6613 = vmatpush3.bf16.msra.mxu1 %v7736_v29 }
 0x3ab   :  { %6614 = vmatprep.subr.bf16.mxu1 %v7737_v14 }
 0x3ae   :  { %6615 = vmatpush3.bf16.msra.mxu1 %v7738_v18 }
 0x3af   :  { %6616 = vmatprep.subr.bf16.mxu1 %v7739_v13 }
 0x3b2   :  { %6617 = vmatpush3.bf16.msra.mxu1 %v7740_v21 }
 0x3b3   :  { %6618 = vmatprep.subr.bf16.mxu1 %v7741_v19 }
 0x3b6   :  { %6619 = vmatpush3.bf16.msra.mxu1 %v7742_v50 }
 0x3b7   :  { %6620 = vmatprep.subr.bf16.mxu1 %v7743_v47 }
 0x3ba   :  { %6621 = vmatpush3.bf16.msra.mxu1 %v7744_v61 }
 0x3bb   :  { %6622 = vmatprep.subr.bf16.mxu1 %v7745_v27 }
 0x3be   :  { %6623 = vmatpush3.bf16.msra.mxu1 %v7746_v30 }
 0x3bf   :  { %6624 = vmatprep.subr.bf16.mxu1 %v7747_v28 }
 0x3c2   :  { %6625 = vmatpush3.bf16.msra.mxu1 %v7748_v6 }
 0x3d8   :  { %v5429_v40 = vpop.f32.mrf.mxu0 }
 0x3d9   :  { %v5430_v3 = vadd.f32 %v5429_v40, %v4664_v1 }
 0x3da   :  { %v5431_v24 = vpop.f32.mrf.mxu0 }
 0x3db   :  { %v5432_v42 = vadd.f32 %v5431_v24, %v4668_v5 }
 0x3dc   :  { %v5433_v25 = vpop.f32.mrf.mxu0 }
 0x3de   :  { %v5434_v26 = vpop.f32.mrf.mxu0 }
 0x425   :  { %v5388_v38 = vpop.f32.mrf.mxu1 }
 0x426   :  { %v5389_v43 = vadd.f32 %v5388_v38, %v5348_v36 }
 0x427   :  { %v5390_v39 = vpop.f32.mrf.mxu1 }
 0x428   :  { %v5391_v31 = vadd.f32 %v5390_v39, %v5350_v16  ;;  %v5477_v7 = vmax.f32 %v5389_v43, 0.0 }
 0x429   :  { %v5392_v52 = vpop.f32.mrf.mxu1 }
 0x42a   :  { %v5478_v22 = vmax.f32 %v5391_v31, 0.0  ;;  %v5481_v46 = vpack.c.bf16 %v5477_v7, %v5477_v7 }
 0x42b   :  { %v5393_v44 = vpop.f32.mrf.mxu1 }
 0x42c   :  { %v5482_v45 = vpack.c.bf16 %v5478_v22, %v5478_v22 }
 0x42e   :  { %5780 = vmatprep.mubr.bf16.mxu0 %v5482_v45 }
 0x42f   :  { %5781 = vmatmul.mubr.bf16.vlgmr.msra.gmra.mxu0 %v5481_v46 }
 0x465   :  { %v5470_v53 = vpop.f32.mrf.mxu1 }
 0x466   :  { %v5471_v54 = vadd.f32 %v5470_v53, %v5430_v3 }
 0x467   :  { %v5472_v56 = vpop.f32.mrf.mxu1 }
 0x468   :  { %v5473_v57 = vadd.f32 %v5472_v56, %v5432_v42  ;;  %v5479_v8 = vmax.f32 %v5471_v54, 0.0 }
 0x469   :  { %v5474_v4 = vpop.f32.mrf.mxu1 }
 0x46a   :  { %v5480_v32 = vmax.f32 %v5473_v57, 0.0  ;;  %v5483_v51 = vpack.c.bf16 %v5479_v8, %v5479_v8 }
 0x46b   :  { %v5475_v59 = vpop.f32.mrf.mxu1 }
 0x46c   :  { %v5484_v33 = vpack.c.bf16 %v5480_v32, %v5480_v32 }
 0x46e   :  { %5820 = vmatprep.mubr.bf16.mxu1 %v5484_v33 }
 0x46f   :  { %5821 = vmatmul.mubr.bf16.vlgmr.msra.gmra.mxu1 %v5483_v51 }
 0x4ef   :  { %v6604_v60 = vpop.f32.mrf.mxu0 }
 0x4f1   :  { %v6605_v62 = vpop.f32.mrf.mxu0 }
 0x4f2   :  { %v6606_v58 = vadd.f32 %v6605_v62, %v6604_v60 }
 0x4f3   :  { %v6607_v15 = vpop.f32.mrf.mxu0 }
 0x4f4   :  { %v5783_v9 = vadd.f32 %v6606_v58, %v6555_v17 }
 0x4f5   :  { %v6608_v37 = vpop.f32.mrf.mxu0 }
 0x52f   :  { %v6626_v63 = vpop.f32.mrf.mxu1 }
 0x531   :  { %v6627_v0 = vpop.f32.mrf.mxu1 }
 0x532   :  { %v6628_v2 = vadd.f32 %v6627_v0, %v6626_v63 }
 0x533   :  { %v6629_v10 = vpop.f32.mrf.mxu1 }
 0x534   :  { %v5823_v41 = vadd.f32 %v6628_v2, %v5783_v9 }
 0x535   :  { %v6630_v11 = vpop.f32.mrf.mxu1 }
 0x536   :  { %5828 = vst [vmem:[%s8182_s7] sm:$0xff] %v5823_v41 }
 0x537   :  { %5833 = vsyncpa [#allocation3], 1 }
 0x538   :  { %5834 = vsyncpa [#allocation5], 1 }
 0x539   :  { %5835 = vsyncpa [#allocation8], 1 }
 0x53a   :  { %5836 = vsyncpa [#allocation11], 1 }

</bundles_post_ra>
